<compile_context>
chip_gen: v6e
topology: v6e:2x2x1
jax: 0.10.0
libtpu: 0.0.40
codegen_flags: <defaults>
</compile_context>

<pallas_src>
import math
import functools

import jax
import jax.numpy as jnp
from jax.experimental import pallas as pl
from jax.experimental.pallas import tpu as pltpu


# ---------------- backbone kernels ----------------

def _conv_relu_kernel(xp_ref, w_ref, b_ref, o_ref, *, H, W, Cin):
    """3x3 conv (pad already applied) + ReLU; 9-tap x Cin broadcast-FMA accumulation."""
    Cout = o_ref.shape[-1]
    # start the accumulator from the (broadcast) bias; one less full-tile add
    acc = jnp.broadcast_to(b_ref[...][None], (H, W, Cout)).astype(jnp.float32)
    idx = 0
    for ky in range(3):
        for kx in range(3):
            for ci in range(Cin):
                pc = xp_ref[0, ky:ky + H, kx:kx + W, ci:ci + 1]   # (H, W, 1)
                acc = acc + pc * w_ref[idx][None]                 # (1, 1, Cout) broadcast
                idx += 1
    o_ref[0] = jnp.maximum(acc, 0.0)


def conv3x3_relu(xp, w, b, *, H, W):
    """xp: padded NHWC (B, H+2, W+2, Cin); w: (9*Cin, 1, Cout); b: (Cout,)."""
    B = xp.shape[0]
    Cin = xp.shape[-1]
    Cout = w.shape[-1]
    return pl.pallas_call(
        functools.partial(_conv_relu_kernel, H=H, W=W, Cin=Cin),
        grid=(B,),
        in_specs=[pl.BlockSpec((1, H + 2, W + 2, Cin), lambda i: (i, 0, 0, 0)),
                  pl.BlockSpec((9 * Cin, 1, Cout), lambda i: (0, 0, 0)),
                  pl.BlockSpec((1, Cout), lambda i: (0, 0))],
        out_specs=pl.BlockSpec((1, H, W, Cout), lambda i: (i, 0, 0, 0)),
        out_shape=jax.ShapeDtypeStruct((B, H, W, Cout), jnp.float32),
        compiler_params=pltpu.CompilerParams(dimension_semantics=("parallel",)),
    )(xp, w, b.reshape(1, Cout))


def _maxpool_kernel(x_ref, o_ref):
    m = jnp.maximum(x_ref[0, 0], x_ref[0, 1])      # (Wo, 2, C): max over row pair
    o_ref[0] = jnp.max(m, axis=1)                  # (Wo, C):   max over column pair


def maxpool2x2(feat):
    """MaxPool2d(kernel=2, stride=2) on NHWC features."""
    B, H, W, C = feat.shape
    Ho, Wo = H // 2, W // 2
    xr = feat.reshape(B * Ho, 2, Wo, 2, C)          # row-major compatible -> free reshape
    out = pl.pallas_call(
        _maxpool_kernel,
        grid=(B * Ho,),
        in_specs=[pl.BlockSpec((1, 2, Wo, 2, C), lambda i: (i, 0, 0, 0, 0))],
        out_specs=pl.BlockSpec((1, Wo, C), lambda i: (i, 0, 0)),
        out_shape=jax.ShapeDtypeStruct((B * Ho, Wo, C), jnp.float32),
        compiler_params=pltpu.CompilerParams(dimension_semantics=("parallel",)),
    )(xr)
    return out.reshape(B, Ho, Wo, C)


# ---------------- fused transformer encoder stack + prediction heads ----------------

def _layer_norm(x, w, b, eps=1e-5):
    mu = jnp.mean(x, axis=-1, keepdims=True)
    var = jnp.mean(jnp.square(x - mu), axis=-1, keepdims=True)
    return (x - mu) * jax.lax.rsqrt(var + eps) * w + b


def _encoder_heads_kernel(x_ref, pe_ref, mask_ref,
                          wq_ref, bq_ref, wk_ref, bk_ref, wv_ref, bv_ref,
                          wo_ref, bo_ref, ln1w_ref, ln1b_ref,
                          wf1_ref, bf1_ref, wf2_ref, bf2_ref,
                          ln2w_ref, ln2b_ref,
                          hw_ref, hb_ref,
                          o_ref, x_scr, *, nhead):
    """One full nn.TransformerEncoderLayer (post-norm, ReLU FFN, eval mode) per grid
    step; fused bbox+class head matmul on the last step."""
    l = pl.program_id(0)

    @pl.when(l == 0)
    def _():
        x_scr[...] = x_ref[...] + pe_ref[...]        # positional encoding, applied once

    x = x_scr[...]                                   # (M, D) f32, batch-major rows
    M, D = x.shape
    hd = D // nhead
    scale = 1.0 / math.sqrt(hd)

    xb = x.astype(jnp.bfloat16)
    q = (jnp.dot(xb, wq_ref[0], preferred_element_type=jnp.float32) + bq_ref[0]) * scale
    k = jnp.dot(xb, wk_ref[0], preferred_element_type=jnp.float32) + bk_ref[0]
    v = jnp.dot(xb, wv_ref[0], preferred_element_type=jnp.float32) + bv_ref[0]
    kbt = k.T.astype(jnp.bfloat16)                   # (D, M), one transpose per layer

    mask = mask_ref[...]                             # (M, M) additive block-diag batch mask
    lane = jax.lax.broadcasted_iota(jnp.int32, (1, D), 1)

    # per-head attention via lane masks: masked-Q gives exact per-head scores,
    # masked-V writes each head's (disjoint) output columns; sum == concat(heads).
    attn = jnp.zeros((M, D), jnp.float32)
    for h in range(nhead):
        hm = (lane >= h * hd) & (lane < (h + 1) * hd)              # (1, D)
        qh = jnp.where(hm, q, 0.0).astype(jnp.bfloat16)
        s = jnp.dot(qh, kbt, preferred_element_type=jnp.float32) + mask   # (M, M)
        s = s - jnp.max(s, axis=-1, keepdims=True)
        p = jnp.exp(s)
        p = p * pl.reciprocal(jnp.sum(p, axis=-1, keepdims=True), approx=True)
        vh = jnp.where(hm, v, 0.0).astype(jnp.bfloat16)
        attn = attn + jnp.dot(p.astype(jnp.bfloat16), vh,
                              preferred_element_type=jnp.float32)

    o = jnp.dot(attn.astype(jnp.bfloat16), wo_ref[0],
                preferred_element_type=jnp.float32) + bo_ref[0]
    y = _layer_norm(x + o, ln1w_ref[0], ln1b_ref[0])               # residual + LN1

    h1 = jnp.dot(y.astype(jnp.bfloat16), wf1_ref[0],
                 preferred_element_type=jnp.float32) + bf1_ref[0]
    h1 = jnp.maximum(h1, 0.0)                                      # ReLU
    z = jnp.dot(h1.astype(jnp.bfloat16), wf2_ref[0],
                preferred_element_type=jnp.float32) + bf2_ref[0]
    out = _layer_norm(y + z, ln2w_ref[0], ln2b_ref[0])             # residual + LN2

    x_scr[...] = out

    @pl.when(l == pl.num_programs(0) - 1)
    def _():
        # fused bbox + class heads; single lane-dense matmul, written once at the end
        o_ref[...] = (jnp.dot(out.astype(jnp.bfloat16), hw_ref[...],
                              preferred_element_type=jnp.float32) + hb_ref[...])


def encoder_heads(x0, pe, mask, lp, head_w, head_b, *, nhead):
    """All encoder layers + prediction heads in one pallas_call; grid over layers."""
    M, D = x0.shape
    L = lp["wq"].shape[0]
    F = lp["wf1"].shape[-1]
    N = head_w.shape[-1]

    def wspec(a, b):
        return pl.BlockSpec((1, a, b), lambda l: (l, 0, 0))

    full_md = pl.BlockSpec((M, D), lambda l: (0, 0))
    full_mm = pl.BlockSpec((M, M), lambda l: (0, 0))

    return pl.pallas_call(
        functools.partial(_encoder_heads_kernel, nhead=nhead),
        grid=(L,),
        in_specs=[full_md, full_md, full_mm,
                  wspec(D, D), wspec(1, D),      # wq, bq
                  wspec(D, D), wspec(1, D),      # wk, bk
                  wspec(D, D), wspec(1, D),      # wv, bv
                  wspec(D, D), wspec(1, D),      # wo, bo
                  wspec(1, D), wspec(1, D),      # ln1 w, b
                  wspec(D, F), wspec(1, F),      # ff1 w, b
                  wspec(F, D), wspec(1, D),      # ff2 w, b
                  wspec(1, D), wspec(1, D),      # ln2 w, b
                  pl.BlockSpec((D, N), lambda l: (0, 0)),   # fused head weight
                  pl.BlockSpec((1, N), lambda l: (0, 0))],  # fused head bias
        out_specs=pl.BlockSpec((M, N), lambda l: (0, 0)),
        out_shape=jax.ShapeDtypeStruct((M, N), jnp.float32),
        scratch_shapes=[pltpu.VMEM((M, D), jnp.float32)],
        compiler_params=pltpu.CompilerParams(
            dimension_semantics=("arbitrary",),
            vmem_limit_bytes=32 * 1024 * 1024),
    )(x0, pe, mask,
      lp["wq"], lp["bq"], lp["wk"], lp["bk"], lp["wv"], lp["bv"],
      lp["wo"], lp["bo"], lp["ln1_w"], lp["ln1_b"],
      lp["wf1"], lp["bf1"], lp["wf2"], lp["bf2"],
      lp["ln2_w"], lp["ln2_b"],
      head_w, head_b)


# ---------------- model glue (plain JAX wrappers) ----------------

def make_positional_encoding(d_model, num_positions):
    position = jnp.arange(0, num_positions, dtype=jnp.float32)[:, None]
    div_term = jnp.exp(jnp.arange(0, d_model, 2, dtype=jnp.float32)
                       * (-math.log(10000.0) / d_model))
    angles = position * div_term
    pe = jnp.zeros((num_positions, d_model), dtype=jnp.float32)
    pe = pe.at[:, 0::2].set(jnp.sin(angles))
    pe = pe.at[:, 1::2].set(jnp.cos(angles))
    return pe                                              # (num_positions, d_model)


def detr_forward(params, x_nchw, *, num_classes, nhead, num_positions):
    B, Cin, H, W = x_nchw.shape
    D = params["conv_w"].shape[-1]
    Ho, Wo = H // 2, W // 2
    S = Ho * Wo
    P = num_positions

    # backbone: Conv2d(3, D, k=3, s=1, p=1) + ReLU + MaxPool2d(2, 2)
    xh = jnp.transpose(x_nchw, (0, 2, 3, 1))               # NHWC
    xp = jnp.pad(xh, ((0, 0), (1, 1), (1, 1), (0, 0)))
    feat = conv3x3_relu(xp, params["conv_w"], params["conv_b"], H=H, W=W)
    pooled = maxpool2x2(feat)                              # (B, Ho, Wo, D)

    # x.flatten(2).permute(2, 0, 1) == row-major spatial flatten; we keep a batch-major
    # (B*S, D) layout inside the kernel and restore (S, B, ...) ordering at the end.
    x0 = pooled.reshape(B * S, D)
    pe = make_positional_encoding(D, num_positions)[:S]    # (S, D)
    pe_b = jnp.broadcast_to(pe[None], (B, S, D)).reshape(B * S, D)

    # additive block-diagonal batch mask (rows are batch-major: batch = row // S)
    M = B * S
    rb = jnp.arange(M, dtype=jnp.int32) // S
    mask = jnp.where(rb[:, None] == rb[None, :], 0.0, -1e30).astype(jnp.float32)

    heads = encoder_heads(x0, pe_b, mask, params["layers"],
                          params["head_w"], params["head_b"],
                          nhead=nhead)                     # (B*S, P*(4+C))

    # split fused head output and reorder to (S, B*P, ...) outside the kernel
    bbox = heads[:, :P * 4].reshape(B, S, P * 4).transpose(1, 0, 2).reshape(S, B * P, 4)
    cls = heads[:, P * 4:].reshape(B, S, P * num_classes).transpose(1, 0, 2) \
                          .reshape(S, B * P, num_classes)
    return bbox, cls


def init_params(key, num_classes, hidden_dim, nhead, num_layers, num_positions, dim_ff):
    def nrm(k, shape, std=0.02):
        return std * jax.random.normal(k, shape, dtype=jnp.float32)

    keys = jax.random.split(key, 3 + num_layers)
    Cin = 3
    params = {
        # (ky, kx, ci) flattened along axis 0; middle dim of 1 keeps the kernel lookup
        # a free leading-dim index.
        "conv_w": nrm(keys[0], (9 * Cin, 1, hidden_dim)),
        "conv_b": nrm(keys[1], (hidden_dim,)),
    }

    def one_layer(k):
        lk = jax.random.split(k, 12)
        d, f = hidden_dim, dim_ff
        return {
            "wq": nrm(lk[0], (d, d)), "bq": nrm(lk[1], (1, d)),
            "wk": nrm(lk[2], (d, d)), "bk": nrm(lk[3], (1, d)),
            "wv": nrm(lk[4], (d, d)), "bv": nrm(lk[5], (1, d)),
            "wo": nrm(lk[6], (d, d)), "bo": nrm(lk[7], (1, d)),
            "ln1_w": jnp.ones((1, d), jnp.float32), "ln1_b": jnp.zeros((1, d), jnp.float32),
            "wf1": nrm(lk[8], (d, f)), "bf1": nrm(lk[9], (1, f)),
            "wf2": nrm(lk[10], (f, d)), "bf2": nrm(lk[11], (1, d)),
            "ln2_w": jnp.ones((1, d), jnp.float32), "ln2_b": jnp.zeros((1, d), jnp.float32),
        }

    per_layer = [one_layer(keys[2 + li]) for li in range(num_layers)]
    stacked = {name: jnp.stack([lyr[name] for lyr in per_layer]) for name in per_layer[0]}
    # MXU operands in bf16 (f32 accumulation in-kernel); biases / LN params stay f32.
    for name in ("wq", "wk", "wv", "wo", "wf1", "wf2"):
        stacked[name] = stacked[name].astype(jnp.bfloat16)
    params["layers"] = stacked

    hk = jax.random.split(keys[2 + num_layers], 4)
    bbox_w = nrm(hk[0], (hidden_dim, num_positions * 4))
    bbox_b = nrm(hk[1], (num_positions * 4,))
    cls_w = nrm(hk[2], (hidden_dim, num_positions * num_classes))
    cls_b = nrm(hk[3], (num_positions * num_classes,))
    # fused head: out[:, :P*4] -> bbox, out[:, P*4:] -> class
    params["head_w"] = jnp.concatenate([bbox_w, cls_w], axis=1).astype(jnp.bfloat16)
    params["head_b"] = jnp.concatenate([bbox_b, cls_b], axis=0).reshape(1, -1)
    return params


if __name__ == "__main__":
    num_classes = 5
    hidden_dim = 32
    nhead = 4
    num_encoder_layers = 2
    num_positions = 20
    dim_ff = 2048            # nn.TransformerEncoderLayer default dim_feedforward
    B, H, W = 2, 8, 8        # -> seq len S = (H/2)*(W/2) = 16 <= num_positions

    key = jax.random.PRNGKey(0)
    kp, kx = jax.random.split(key)
    params = init_params(kp, num_classes, hidden_dim, nhead,
                         num_encoder_layers, num_positions, dim_ff)
    x = jax.random.normal(kx, (B, 3, H, W), dtype=jnp.float32)

    fwd = jax.jit(functools.partial(detr_forward, num_classes=num_classes,
                                    nhead=nhead, num_positions=num_positions))
    bbox_preds, class_preds = fwd(params, x)
    jax.block_until_ready((bbox_preds, class_preds))

    S = (H // 2) * (W // 2)
    assert bbox_preds.shape == (S, B * num_positions, 4), bbox_preds.shape
    assert class_preds.shape == (S, B * num_positions, num_classes), class_preds.shape
    assert bool(jnp.all(jnp.isfinite(bbox_preds))) and bool(jnp.all(jnp.isfinite(class_preds)))
    print("KERNEL_OK")
</pallas_src>

<mosaic_0001>
module attributes {stable_mosaic.version = 11 : i64} {
  func.func @_conv_relu_kernel(%arg0: i32, %arg1: memref<1x10x10x3xf32, #tpu.memory_space<vmem>>, %arg2: memref<27x1x32xf32, #tpu.memory_space<vmem>>, %arg3: memref<1x32xf32, #tpu.memory_space<vmem>>, %arg4: memref<1x8x8x32xf32, #tpu.memory_space<vmem>>) attributes {dimension_semantics = [#tpu.dimension_semantics<parallel>], iteration_bounds = array<i64: 2>, scalar_prefetch = 0 : i64, scratch_operands = 0 : i64, tpu.core_type = #tpu.core_type<tc>, window_params = [{transform_indices = @transform_0, window_bounds = array<i64: 1, 10, 10, 3>}, {pipeline_mode = #tpu.pipeline_mode<synchronous>, transform_indices = @transform_1, window_bounds = array<i64: 27, 1, 32>}, {pipeline_mode = #tpu.pipeline_mode<synchronous>, transform_indices = @transform_2, window_bounds = array<i64: 1, 32>}, {transform_indices = @transform_3, window_bounds = array<i64: 1, 8, 8, 32>}]} {
    %c0 = arith.constant 0 : index
    %c0_0 = arith.constant 0 : index
    %0 = vector.load %arg3[%c0, %c0_0] : memref<1x32xf32, #tpu.memory_space<vmem>>, vector<1x32xf32>
    %1 = vector.shape_cast %0 : vector<1x32xf32> to vector<1x1x32xf32>
    %2 = vector.shape_cast %1 : vector<1x1x32xf32> to vector<1x1x32xf32>
    %3 = vector.broadcast %2 : vector<1x1x32xf32> to vector<8x8x32xf32>
    %c0_1 = arith.constant 0 : index
    %c0_2 = arith.constant 0 : index
    %c0_3 = arith.constant 0 : index
    %c0_4 = arith.constant 0 : index
    %4 = vector.load %arg1[%c0_1, %c0_2, %c0_3, %c0_4] : memref<1x10x10x3xf32, #tpu.memory_space<vmem>>, vector<1x8x8x1xf32>
    %5 = vector.shape_cast %4 : vector<1x8x8x1xf32> to vector<8x8x1xf32>
    %c0_5 = arith.constant 0 : index
    %c0_6 = arith.constant 0 : index
    %c0_7 = arith.constant 0 : index
    %6 = vector.load %arg2[%c0_5, %c0_6, %c0_7] : memref<27x1x32xf32, #tpu.memory_space<vmem>>, vector<1x1x32xf32>
    %7 = vector.shape_cast %6 : vector<1x1x32xf32> to vector<1x32xf32>
    %8 = vector.shape_cast %7 : vector<1x32xf32> to vector<1x1x32xf32>
    %9 = vector.broadcast %5 : vector<8x8x1xf32> to vector<8x8x32xf32>
    %10 = vector.broadcast %8 : vector<1x1x32xf32> to vector<8x8x32xf32>
    %11 = arith.mulf %9, %10 : vector<8x8x32xf32>
    %12 = arith.addf %3, %11 : vector<8x8x32xf32>
    %c0_8 = arith.constant 0 : index
    %c0_9 = arith.constant 0 : index
    %c0_10 = arith.constant 0 : index
    %c1 = arith.constant 1 : index
    %13 = vector.load %arg1[%c0_8, %c0_9, %c0_10, %c1] : memref<1x10x10x3xf32, #tpu.memory_space<vmem>>, vector<1x8x8x1xf32>
    %14 = vector.shape_cast %13 : vector<1x8x8x1xf32> to vector<8x8x1xf32>
    %c1_11 = arith.constant 1 : index
    %c0_12 = arith.constant 0 : index
    %c0_13 = arith.constant 0 : index
    %15 = vector.load %arg2[%c1_11, %c0_12, %c0_13] : memref<27x1x32xf32, #tpu.memory_space<vmem>>, vector<1x1x32xf32>
    %16 = vector.shape_cast %15 : vector<1x1x32xf32> to vector<1x32xf32>
    %17 = vector.shape_cast %16 : vector<1x32xf32> to vector<1x1x32xf32>
    %18 = vector.broadcast %14 : vector<8x8x1xf32> to vector<8x8x32xf32>
    %19 = vector.broadcast %17 : vector<1x1x32xf32> to vector<8x8x32xf32>
    %20 = arith.mulf %18, %19 : vector<8x8x32xf32>
    %21 = arith.addf %12, %20 : vector<8x8x32xf32>
    %c0_14 = arith.constant 0 : index
    %c0_15 = arith.constant 0 : index
    %c0_16 = arith.constant 0 : index
    %c2 = arith.constant 2 : index
    %22 = vector.load %arg1[%c0_14, %c0_15, %c0_16, %c2] : memref<1x10x10x3xf32, #tpu.memory_space<vmem>>, vector<1x8x8x1xf32>
    %23 = vector.shape_cast %22 : vector<1x8x8x1xf32> to vector<8x8x1xf32>
    %c2_17 = arith.constant 2 : index
    %c0_18 = arith.constant 0 : index
    %c0_19 = arith.constant 0 : index
    %24 = vector.load %arg2[%c2_17, %c0_18, %c0_19] : memref<27x1x32xf32, #tpu.memory_space<vmem>>, vector<1x1x32xf32>
    %25 = vector.shape_cast %24 : vector<1x1x32xf32> to vector<1x32xf32>
    %26 = vector.shape_cast %25 : vector<1x32xf32> to vector<1x1x32xf32>
    %27 = vector.broadcast %23 : vector<8x8x1xf32> to vector<8x8x32xf32>
    %28 = vector.broadcast %26 : vector<1x1x32xf32> to vector<8x8x32xf32>
    %29 = arith.mulf %27, %28 : vector<8x8x32xf32>
    %30 = arith.addf %21, %29 : vector<8x8x32xf32>
    %c0_20 = arith.constant 0 : index
    %c0_21 = arith.constant 0 : index
    %c1_22 = arith.constant 1 : index
    %c0_23 = arith.constant 0 : index
    %31 = vector.load %arg1[%c0_20, %c0_21, %c1_22, %c0_23] : memref<1x10x10x3xf32, #tpu.memory_space<vmem>>, vector<1x8x8x1xf32>
    %32 = vector.shape_cast %31 : vector<1x8x8x1xf32> to vector<8x8x1xf32>
    %c3 = arith.constant 3 : index
    %c0_24 = arith.constant 0 : index
    %c0_25 = arith.constant 0 : index
    %33 = vector.load %arg2[%c3, %c0_24, %c0_25] : memref<27x1x32xf32, #tpu.memory_space<vmem>>, vector<1x1x32xf32>
    %34 = vector.shape_cast %33 : vector<1x1x32xf32> to vector<1x32xf32>
    %35 = vector.shape_cast %34 : vector<1x32xf32> to vector<1x1x32xf32>
    %36 = vector.broadcast %32 : vector<8x8x1xf32> to vector<8x8x32xf32>
    %37 = vector.broadcast %35 : vector<1x1x32xf32> to vector<8x8x32xf32>
    %38 = arith.mulf %36, %37 : vector<8x8x32xf32>
    %39 = arith.addf %30, %38 : vector<8x8x32xf32>
    %c0_26 = arith.constant 0 : index
    %c0_27 = arith.constant 0 : index
    %c1_28 = arith.constant 1 : index
    %c1_29 = arith.constant 1 : index
    %40 = vector.load %arg1[%c0_26, %c0_27, %c1_28, %c1_29] : memref<1x10x10x3xf32, #tpu.memory_space<vmem>>, vector<1x8x8x1xf32>
    %41 = vector.shape_cast %40 : vector<1x8x8x1xf32> to vector<8x8x1xf32>
    %c4 = arith.constant 4 : index
    %c0_30 = arith.constant 0 : index
    %c0_31 = arith.constant 0 : index
    %42 = vector.load %arg2[%c4, %c0_30, %c0_31] : memref<27x1x32xf32, #tpu.memory_space<vmem>>, vector<1x1x32xf32>
    %43 = vector.shape_cast %42 : vector<1x1x32xf32> to vector<1x32xf32>
    %44 = vector.shape_cast %43 : vector<1x32xf32> to vector<1x1x32xf32>
    %45 = vector.broadcast %41 : vector<8x8x1xf32> to vector<8x8x32xf32>
    %46 = vector.broadcast %44 : vector<1x1x32xf32> to vector<8x8x32xf32>
    %47 = arith.mulf %45, %46 : vector<8x8x32xf32>
    %48 = arith.addf %39, %47 : vector<8x8x32xf32>
    %c0_32 = arith.constant 0 : index
    %c0_33 = arith.constant 0 : index
    %c1_34 = arith.constant 1 : index
    %c2_35 = arith.constant 2 : index
    %49 = vector.load %arg1[%c0_32, %c0_33, %c1_34, %c2_35] : memref<1x10x10x3xf32, #tpu.memory_space<vmem>>, vector<1x8x8x1xf32>
    %50 = vector.shape_cast %49 : vector<1x8x8x1xf32> to vector<8x8x1xf32>
    %c5 = arith.constant 5 : index
    %c0_36 = arith.constant 0 : index
    %c0_37 = arith.constant 0 : index
    %51 = vector.load %arg2[%c5, %c0_36, %c0_37] : memref<27x1x32xf32, #tpu.memory_space<vmem>>, vector<1x1x32xf32>
    %52 = vector.shape_cast %51 : vector<1x1x32xf32> to vector<1x32xf32>
    %53 = vector.shape_cast %52 : vector<1x32xf32> to vector<1x1x32xf32>
    %54 = vector.broadcast %50 : vector<8x8x1xf32> to vector<8x8x32xf32>
    %55 = vector.broadcast %53 : vector<1x1x32xf32> to vector<8x8x32xf32>
    %56 = arith.mulf %54, %55 : vector<8x8x32xf32>
    %57 = arith.addf %48, %56 : vector<8x8x32xf32>
    %c0_38 = arith.constant 0 : index
    %c0_39 = arith.constant 0 : index
    %c2_40 = arith.constant 2 : index
    %c0_41 = arith.constant 0 : index
    %58 = vector.load %arg1[%c0_38, %c0_39, %c2_40, %c0_41] : memref<1x10x10x3xf32, #tpu.memory_space<vmem>>, vector<1x8x8x1xf32>
    %59 = vector.shape_cast %58 : vector<1x8x8x1xf32> to vector<8x8x1xf32>
    %c6 = arith.constant 6 : index
    %c0_42 = arith.constant 0 : index
    %c0_43 = arith.constant 0 : index
    %60 = vector.load %arg2[%c6, %c0_42, %c0_43] : memref<27x1x32xf32, #tpu.memory_space<vmem>>, vector<1x1x32xf32>
    %61 = vector.shape_cast %60 : vector<1x1x32xf32> to vector<1x32xf32>
    %62 = vector.shape_cast %61 : vector<1x32xf32> to vector<1x1x32xf32>
    %63 = vector.broadcast %59 : vector<8x8x1xf32> to vector<8x8x32xf32>
    %64 = vector.broadcast %62 : vector<1x1x32xf32> to vector<8x8x32xf32>
    %65 = arith.mulf %63, %64 : vector<8x8x32xf32>
    %66 = arith.addf %57, %65 : vector<8x8x32xf32>
    %c0_44 = arith.constant 0 : index
    %c0_45 = arith.constant 0 : index
    %c2_46 = arith.constant 2 : index
    %c1_47 = arith.constant 1 : index
    %67 = vector.load %arg1[%c0_44, %c0_45, %c2_46, %c1_47] : memref<1x10x10x3xf32, #tpu.memory_space<vmem>>, vector<1x8x8x1xf32>
    %68 = vector.shape_cast %67 : vector<1x8x8x1xf32> to vector<8x8x1xf32>
    %c7 = arith.constant 7 : index
    %c0_48 = arith.constant 0 : index
    %c0_49 = arith.constant 0 : index
    %69 = vector.load %arg2[%c7, %c0_48, %c0_49] : memref<27x1x32xf32, #tpu.memory_space<vmem>>, vector<1x1x32xf32>
    %70 = vector.shape_cast %69 : vector<1x1x32xf32> to vector<1x32xf32>
    %71 = vector.shape_cast %70 : vector<1x32xf32> to vector<1x1x32xf32>
    %72 = vector.broadcast %68 : vector<8x8x1xf32> to vector<8x8x32xf32>
    %73 = vector.broadcast %71 : vector<1x1x32xf32> to vector<8x8x32xf32>
    %74 = arith.mulf %72, %73 : vector<8x8x32xf32>
    %75 = arith.addf %66, %74 : vector<8x8x32xf32>
    %c0_50 = arith.constant 0 : index
    %c0_51 = arith.constant 0 : index
    %c2_52 = arith.constant 2 : index
    %c2_53 = arith.constant 2 : index
    %76 = vector.load %arg1[%c0_50, %c0_51, %c2_52, %c2_53] : memref<1x10x10x3xf32, #tpu.memory_space<vmem>>, vector<1x8x8x1xf32>
    %77 = vector.shape_cast %76 : vector<1x8x8x1xf32> to vector<8x8x1xf32>
    %c8 = arith.constant 8 : index
    %c0_54 = arith.constant 0 : index
    %c0_55 = arith.constant 0 : index
    %78 = vector.load %arg2[%c8, %c0_54, %c0_55] : memref<27x1x32xf32, #tpu.memory_space<vmem>>, vector<1x1x32xf32>
    %79 = vector.shape_cast %78 : vector<1x1x32xf32> to vector<1x32xf32>
    %80 = vector.shape_cast %79 : vector<1x32xf32> to vector<1x1x32xf32>
    %81 = vector.broadcast %77 : vector<8x8x1xf32> to vector<8x8x32xf32>
    %82 = vector.broadcast %80 : vector<1x1x32xf32> to vector<8x8x32xf32>
    %83 = arith.mulf %81, %82 : vector<8x8x32xf32>
    %84 = arith.addf %75, %83 : vector<8x8x32xf32>
    %c0_56 = arith.constant 0 : index
    %c1_57 = arith.constant 1 : index
    %c0_58 = arith.constant 0 : index
    %c0_59 = arith.constant 0 : index
    %85 = vector.load %arg1[%c0_56, %c1_57, %c0_58, %c0_59] : memref<1x10x10x3xf32, #tpu.memory_space<vmem>>, vector<1x8x8x1xf32>
    %86 = vector.shape_cast %85 : vector<1x8x8x1xf32> to vector<8x8x1xf32>
    %c9 = arith.constant 9 : index
    %c0_60 = arith.constant 0 : index
    %c0_61 = arith.constant 0 : index
    %87 = vector.load %arg2[%c9, %c0_60, %c0_61] : memref<27x1x32xf32, #tpu.memory_space<vmem>>, vector<1x1x32xf32>
    %88 = vector.shape_cast %87 : vector<1x1x32xf32> to vector<1x32xf32>
    %89 = vector.shape_cast %88 : vector<1x32xf32> to vector<1x1x32xf32>
    %90 = vector.broadcast %86 : vector<8x8x1xf32> to vector<8x8x32xf32>
    %91 = vector.broadcast %89 : vector<1x1x32xf32> to vector<8x8x32xf32>
    %92 = arith.mulf %90, %91 : vector<8x8x32xf32>
    %93 = arith.addf %84, %92 : vector<8x8x32xf32>
    %c0_62 = arith.constant 0 : index
    %c1_63 = arith.constant 1 : index
    %c0_64 = arith.constant 0 : index
    %c1_65 = arith.constant 1 : index
    %94 = vector.load %arg1[%c0_62, %c1_63, %c0_64, %c1_65] : memref<1x10x10x3xf32, #tpu.memory_space<vmem>>, vector<1x8x8x1xf32>
    %95 = vector.shape_cast %94 : vector<1x8x8x1xf32> to vector<8x8x1xf32>
    %c10 = arith.constant 10 : index
    %c0_66 = arith.constant 0 : index
    %c0_67 = arith.constant 0 : index
    %96 = vector.load %arg2[%c10, %c0_66, %c0_67] : memref<27x1x32xf32, #tpu.memory_space<vmem>>, vector<1x1x32xf32>
    %97 = vector.shape_cast %96 : vector<1x1x32xf32> to vector<1x32xf32>
    %98 = vector.shape_cast %97 : vector<1x32xf32> to vector<1x1x32xf32>
    %99 = vector.broadcast %95 : vector<8x8x1xf32> to vector<8x8x32xf32>
    %100 = vector.broadcast %98 : vector<1x1x32xf32> to vector<8x8x32xf32>
    %101 = arith.mulf %99, %100 : vector<8x8x32xf32>
    %102 = arith.addf %93, %101 : vector<8x8x32xf32>
    %c0_68 = arith.constant 0 : index
    %c1_69 = arith.constant 1 : index
    %c0_70 = arith.constant 0 : index
    %c2_71 = arith.constant 2 : index
    %103 = vector.load %arg1[%c0_68, %c1_69, %c0_70, %c2_71] : memref<1x10x10x3xf32, #tpu.memory_space<vmem>>, vector<1x8x8x1xf32>
    %104 = vector.shape_cast %103 : vector<1x8x8x1xf32> to vector<8x8x1xf32>
    %c11 = arith.constant 11 : index
    %c0_72 = arith.constant 0 : index
    %c0_73 = arith.constant 0 : index
    %105 = vector.load %arg2[%c11, %c0_72, %c0_73] : memref<27x1x32xf32, #tpu.memory_space<vmem>>, vector<1x1x32xf32>
    %106 = vector.shape_cast %105 : vector<1x1x32xf32> to vector<1x32xf32>
    %107 = vector.shape_cast %106 : vector<1x32xf32> to vector<1x1x32xf32>
    %108 = vector.broadcast %104 : vector<8x8x1xf32> to vector<8x8x32xf32>
    %109 = vector.broadcast %107 : vector<1x1x32xf32> to vector<8x8x32xf32>
    %110 = arith.mulf %108, %109 : vector<8x8x32xf32>
    %111 = arith.addf %102, %110 : vector<8x8x32xf32>
    %c0_74 = arith.constant 0 : index
    %c1_75 = arith.constant 1 : index
    %c1_76 = arith.constant 1 : index
    %c0_77 = arith.constant 0 : index
    %112 = vector.load %arg1[%c0_74, %c1_75, %c1_76, %c0_77] : memref<1x10x10x3xf32, #tpu.memory_space<vmem>>, vector<1x8x8x1xf32>
    %113 = vector.shape_cast %112 : vector<1x8x8x1xf32> to vector<8x8x1xf32>
    %c12 = arith.constant 12 : index
    %c0_78 = arith.constant 0 : index
    %c0_79 = arith.constant 0 : index
    %114 = vector.load %arg2[%c12, %c0_78, %c0_79] : memref<27x1x32xf32, #tpu.memory_space<vmem>>, vector<1x1x32xf32>
    %115 = vector.shape_cast %114 : vector<1x1x32xf32> to vector<1x32xf32>
    %116 = vector.shape_cast %115 : vector<1x32xf32> to vector<1x1x32xf32>
    %117 = vector.broadcast %113 : vector<8x8x1xf32> to vector<8x8x32xf32>
    %118 = vector.broadcast %116 : vector<1x1x32xf32> to vector<8x8x32xf32>
    %119 = arith.mulf %117, %118 : vector<8x8x32xf32>
    %120 = arith.addf %111, %119 : vector<8x8x32xf32>
    %c0_80 = arith.constant 0 : index
    %c1_81 = arith.constant 1 : index
    %c1_82 = arith.constant 1 : index
    %c1_83 = arith.constant 1 : index
    %121 = vector.load %arg1[%c0_80, %c1_81, %c1_82, %c1_83] : memref<1x10x10x3xf32, #tpu.memory_space<vmem>>, vector<1x8x8x1xf32>
    %122 = vector.shape_cast %121 : vector<1x8x8x1xf32> to vector<8x8x1xf32>
    %c13 = arith.constant 13 : index
    %c0_84 = arith.constant 0 : index
    %c0_85 = arith.constant 0 : index
    %123 = vector.load %arg2[%c13, %c0_84, %c0_85] : memref<27x1x32xf32, #tpu.memory_space<vmem>>, vector<1x1x32xf32>
    %124 = vector.shape_cast %123 : vector<1x1x32xf32> to vector<1x32xf32>
    %125 = vector.shape_cast %124 : vector<1x32xf32> to vector<1x1x32xf32>
    %126 = vector.broadcast %122 : vector<8x8x1xf32> to vector<8x8x32xf32>
    %127 = vector.broadcast %125 : vector<1x1x32xf32> to vector<8x8x32xf32>
    %128 = arith.mulf %126, %127 : vector<8x8x32xf32>
    %129 = arith.addf %120, %128 : vector<8x8x32xf32>
    %c0_86 = arith.constant 0 : index
    %c1_87 = arith.constant 1 : index
    %c1_88 = arith.constant 1 : index
    %c2_89 = arith.constant 2 : index
    %130 = vector.load %arg1[%c0_86, %c1_87, %c1_88, %c2_89] : memref<1x10x10x3xf32, #tpu.memory_space<vmem>>, vector<1x8x8x1xf32>
    %131 = vector.shape_cast %130 : vector<1x8x8x1xf32> to vector<8x8x1xf32>
    %c14 = arith.constant 14 : index
    %c0_90 = arith.constant 0 : index
    %c0_91 = arith.constant 0 : index
    %132 = vector.load %arg2[%c14, %c0_90, %c0_91] : memref<27x1x32xf32, #tpu.memory_space<vmem>>, vector<1x1x32xf32>
    %133 = vector.shape_cast %132 : vector<1x1x32xf32> to vector<1x32xf32>
    %134 = vector.shape_cast %133 : vector<1x32xf32> to vector<1x1x32xf32>
    %135 = vector.broadcast %131 : vector<8x8x1xf32> to vector<8x8x32xf32>
    %136 = vector.broadcast %134 : vector<1x1x32xf32> to vector<8x8x32xf32>
    %137 = arith.mulf %135, %136 : vector<8x8x32xf32>
    %138 = arith.addf %129, %137 : vector<8x8x32xf32>
    %c0_92 = arith.constant 0 : index
    %c1_93 = arith.constant 1 : index
    %c2_94 = arith.constant 2 : index
    %c0_95 = arith.constant 0 : index
    %139 = vector.load %arg1[%c0_92, %c1_93, %c2_94, %c0_95] : memref<1x10x10x3xf32, #tpu.memory_space<vmem>>, vector<1x8x8x1xf32>
    %140 = vector.shape_cast %139 : vector<1x8x8x1xf32> to vector<8x8x1xf32>
    %c15 = arith.constant 15 : index
    %c0_96 = arith.constant 0 : index
    %c0_97 = arith.constant 0 : index
    %141 = vector.load %arg2[%c15, %c0_96, %c0_97] : memref<27x1x32xf32, #tpu.memory_space<vmem>>, vector<1x1x32xf32>
    %142 = vector.shape_cast %141 : vector<1x1x32xf32> to vector<1x32xf32>
    %143 = vector.shape_cast %142 : vector<1x32xf32> to vector<1x1x32xf32>
    %144 = vector.broadcast %140 : vector<8x8x1xf32> to vector<8x8x32xf32>
    %145 = vector.broadcast %143 : vector<1x1x32xf32> to vector<8x8x32xf32>
    %146 = arith.mulf %144, %145 : vector<8x8x32xf32>
    %147 = arith.addf %138, %146 : vector<8x8x32xf32>
    %c0_98 = arith.constant 0 : index
    %c1_99 = arith.constant 1 : index
    %c2_100 = arith.constant 2 : index
    %c1_101 = arith.constant 1 : index
    %148 = vector.load %arg1[%c0_98, %c1_99, %c2_100, %c1_101] : memref<1x10x10x3xf32, #tpu.memory_space<vmem>>, vector<1x8x8x1xf32>
    %149 = vector.shape_cast %148 : vector<1x8x8x1xf32> to vector<8x8x1xf32>
    %c16 = arith.constant 16 : index
    %c0_102 = arith.constant 0 : index
    %c0_103 = arith.constant 0 : index
    %150 = vector.load %arg2[%c16, %c0_102, %c0_103] : memref<27x1x32xf32, #tpu.memory_space<vmem>>, vector<1x1x32xf32>
    %151 = vector.shape_cast %150 : vector<1x1x32xf32> to vector<1x32xf32>
    %152 = vector.shape_cast %151 : vector<1x32xf32> to vector<1x1x32xf32>
    %153 = vector.broadcast %149 : vector<8x8x1xf32> to vector<8x8x32xf32>
    %154 = vector.broadcast %152 : vector<1x1x32xf32> to vector<8x8x32xf32>
    %155 = arith.mulf %153, %154 : vector<8x8x32xf32>
    %156 = arith.addf %147, %155 : vector<8x8x32xf32>
    %c0_104 = arith.constant 0 : index
    %c1_105 = arith.constant 1 : index
    %c2_106 = arith.constant 2 : index
    %c2_107 = arith.constant 2 : index
    %157 = vector.load %arg1[%c0_104, %c1_105, %c2_106, %c2_107] : memref<1x10x10x3xf32, #tpu.memory_space<vmem>>, vector<1x8x8x1xf32>
    %158 = vector.shape_cast %157 : vector<1x8x8x1xf32> to vector<8x8x1xf32>
    %c17 = arith.constant 17 : index
    %c0_108 = arith.constant 0 : index
    %c0_109 = arith.constant 0 : index
    %159 = vector.load %arg2[%c17, %c0_108, %c0_109] : memref<27x1x32xf32, #tpu.memory_space<vmem>>, vector<1x1x32xf32>
    %160 = vector.shape_cast %159 : vector<1x1x32xf32> to vector<1x32xf32>
    %161 = vector.shape_cast %160 : vector<1x32xf32> to vector<1x1x32xf32>
    %162 = vector.broadcast %158 : vector<8x8x1xf32> to vector<8x8x32xf32>
    %163 = vector.broadcast %161 : vector<1x1x32xf32> to vector<8x8x32xf32>
    %164 = arith.mulf %162, %163 : vector<8x8x32xf32>
    %165 = arith.addf %156, %164 : vector<8x8x32xf32>
    %c0_110 = arith.constant 0 : index
    %c2_111 = arith.constant 2 : index
    %c0_112 = arith.constant 0 : index
    %c0_113 = arith.constant 0 : index
    %166 = vector.load %arg1[%c0_110, %c2_111, %c0_112, %c0_113] : memref<1x10x10x3xf32, #tpu.memory_space<vmem>>, vector<1x8x8x1xf32>
    %167 = vector.shape_cast %166 : vector<1x8x8x1xf32> to vector<8x8x1xf32>
    %c18 = arith.constant 18 : index
    %c0_114 = arith.constant 0 : index
    %c0_115 = arith.constant 0 : index
    %168 = vector.load %arg2[%c18, %c0_114, %c0_115] : memref<27x1x32xf32, #tpu.memory_space<vmem>>, vector<1x1x32xf32>
    %169 = vector.shape_cast %168 : vector<1x1x32xf32> to vector<1x32xf32>
    %170 = vector.shape_cast %169 : vector<1x32xf32> to vector<1x1x32xf32>
    %171 = vector.broadcast %167 : vector<8x8x1xf32> to vector<8x8x32xf32>
    %172 = vector.broadcast %170 : vector<1x1x32xf32> to vector<8x8x32xf32>
    %173 = arith.mulf %171, %172 : vector<8x8x32xf32>
    %174 = arith.addf %165, %173 : vector<8x8x32xf32>
    %c0_116 = arith.constant 0 : index
    %c2_117 = arith.constant 2 : index
    %c0_118 = arith.constant 0 : index
    %c1_119 = arith.constant 1 : index
    %175 = vector.load %arg1[%c0_116, %c2_117, %c0_118, %c1_119] : memref<1x10x10x3xf32, #tpu.memory_space<vmem>>, vector<1x8x8x1xf32>
    %176 = vector.shape_cast %175 : vector<1x8x8x1xf32> to vector<8x8x1xf32>
    %c19 = arith.constant 19 : index
    %c0_120 = arith.constant 0 : index
    %c0_121 = arith.constant 0 : index
    %177 = vector.load %arg2[%c19, %c0_120, %c0_121] : memref<27x1x32xf32, #tpu.memory_space<vmem>>, vector<1x1x32xf32>
    %178 = vector.shape_cast %177 : vector<1x1x32xf32> to vector<1x32xf32>
    %179 = vector.shape_cast %178 : vector<1x32xf32> to vector<1x1x32xf32>
    %180 = vector.broadcast %176 : vector<8x8x1xf32> to vector<8x8x32xf32>
    %181 = vector.broadcast %179 : vector<1x1x32xf32> to vector<8x8x32xf32>
    %182 = arith.mulf %180, %181 : vector<8x8x32xf32>
    %183 = arith.addf %174, %182 : vector<8x8x32xf32>
    %c0_122 = arith.constant 0 : index
    %c2_123 = arith.constant 2 : index
    %c0_124 = arith.constant 0 : index
    %c2_125 = arith.constant 2 : index
    %184 = vector.load %arg1[%c0_122, %c2_123, %c0_124, %c2_125] : memref<1x10x10x3xf32, #tpu.memory_space<vmem>>, vector<1x8x8x1xf32>
    %185 = vector.shape_cast %184 : vector<1x8x8x1xf32> to vector<8x8x1xf32>
    %c20 = arith.constant 20 : index
    %c0_126 = arith.constant 0 : index
    %c0_127 = arith.constant 0 : index
    %186 = vector.load %arg2[%c20, %c0_126, %c0_127] : memref<27x1x32xf32, #tpu.memory_space<vmem>>, vector<1x1x32xf32>
    %187 = vector.shape_cast %186 : vector<1x1x32xf32> to vector<1x32xf32>
    %188 = vector.shape_cast %187 : vector<1x32xf32> to vector<1x1x32xf32>
    %189 = vector.broadcast %185 : vector<8x8x1xf32> to vector<8x8x32xf32>
    %190 = vector.broadcast %188 : vector<1x1x32xf32> to vector<8x8x32xf32>
    %191 = arith.mulf %189, %190 : vector<8x8x32xf32>
    %192 = arith.addf %183, %191 : vector<8x8x32xf32>
    %c0_128 = arith.constant 0 : index
    %c2_129 = arith.constant 2 : index
    %c1_130 = arith.constant 1 : index
    %c0_131 = arith.constant 0 : index
    %193 = vector.load %arg1[%c0_128, %c2_129, %c1_130, %c0_131] : memref<1x10x10x3xf32, #tpu.memory_space<vmem>>, vector<1x8x8x1xf32>
    %194 = vector.shape_cast %193 : vector<1x8x8x1xf32> to vector<8x8x1xf32>
    %c21 = arith.constant 21 : index
    %c0_132 = arith.constant 0 : index
    %c0_133 = arith.constant 0 : index
    %195 = vector.load %arg2[%c21, %c0_132, %c0_133] : memref<27x1x32xf32, #tpu.memory_space<vmem>>, vector<1x1x32xf32>
    %196 = vector.shape_cast %195 : vector<1x1x32xf32> to vector<1x32xf32>
    %197 = vector.shape_cast %196 : vector<1x32xf32> to vector<1x1x32xf32>
    %198 = vector.broadcast %194 : vector<8x8x1xf32> to vector<8x8x32xf32>
    %199 = vector.broadcast %197 : vector<1x1x32xf32> to vector<8x8x32xf32>
    %200 = arith.mulf %198, %199 : vector<8x8x32xf32>
    %201 = arith.addf %192, %200 : vector<8x8x32xf32>
    %c0_134 = arith.constant 0 : index
    %c2_135 = arith.constant 2 : index
    %c1_136 = arith.constant 1 : index
    %c1_137 = arith.constant 1 : index
    %202 = vector.load %arg1[%c0_134, %c2_135, %c1_136, %c1_137] : memref<1x10x10x3xf32, #tpu.memory_space<vmem>>, vector<1x8x8x1xf32>
    %203 = vector.shape_cast %202 : vector<1x8x8x1xf32> to vector<8x8x1xf32>
    %c22 = arith.constant 22 : index
    %c0_138 = arith.constant 0 : index
    %c0_139 = arith.constant 0 : index
    %204 = vector.load %arg2[%c22, %c0_138, %c0_139] : memref<27x1x32xf32, #tpu.memory_space<vmem>>, vector<1x1x32xf32>
    %205 = vector.shape_cast %204 : vector<1x1x32xf32> to vector<1x32xf32>
    %206 = vector.shape_cast %205 : vector<1x32xf32> to vector<1x1x32xf32>
    %207 = vector.broadcast %203 : vector<8x8x1xf32> to vector<8x8x32xf32>
    %208 = vector.broadcast %206 : vector<1x1x32xf32> to vector<8x8x32xf32>
    %209 = arith.mulf %207, %208 : vector<8x8x32xf32>
    %210 = arith.addf %201, %209 : vector<8x8x32xf32>
    %c0_140 = arith.constant 0 : index
    %c2_141 = arith.constant 2 : index
    %c1_142 = arith.constant 1 : index
    %c2_143 = arith.constant 2 : index
    %211 = vector.load %arg1[%c0_140, %c2_141, %c1_142, %c2_143] : memref<1x10x10x3xf32, #tpu.memory_space<vmem>>, vector<1x8x8x1xf32>
    %212 = vector.shape_cast %211 : vector<1x8x8x1xf32> to vector<8x8x1xf32>
    %c23 = arith.constant 23 : index
    %c0_144 = arith.constant 0 : index
    %c0_145 = arith.constant 0 : index
    %213 = vector.load %arg2[%c23, %c0_144, %c0_145] : memref<27x1x32xf32, #tpu.memory_space<vmem>>, vector<1x1x32xf32>
    %214 = vector.shape_cast %213 : vector<1x1x32xf32> to vector<1x32xf32>
    %215 = vector.shape_cast %214 : vector<1x32xf32> to vector<1x1x32xf32>
    %216 = vector.broadcast %212 : vector<8x8x1xf32> to vector<8x8x32xf32>
    %217 = vector.broadcast %215 : vector<1x1x32xf32> to vector<8x8x32xf32>
    %218 = arith.mulf %216, %217 : vector<8x8x32xf32>
    %219 = arith.addf %210, %218 : vector<8x8x32xf32>
    %c0_146 = arith.constant 0 : index
    %c2_147 = arith.constant 2 : index
    %c2_148 = arith.constant 2 : index
    %c0_149 = arith.constant 0 : index
    %220 = vector.load %arg1[%c0_146, %c2_147, %c2_148, %c0_149] : memref<1x10x10x3xf32, #tpu.memory_space<vmem>>, vector<1x8x8x1xf32>
    %221 = vector.shape_cast %220 : vector<1x8x8x1xf32> to vector<8x8x1xf32>
    %c24 = arith.constant 24 : index
    %c0_150 = arith.constant 0 : index
    %c0_151 = arith.constant 0 : index
    %222 = vector.load %arg2[%c24, %c0_150, %c0_151] : memref<27x1x32xf32, #tpu.memory_space<vmem>>, vector<1x1x32xf32>
    %223 = vector.shape_cast %222 : vector<1x1x32xf32> to vector<1x32xf32>
    %224 = vector.shape_cast %223 : vector<1x32xf32> to vector<1x1x32xf32>
    %225 = vector.broadcast %221 : vector<8x8x1xf32> to vector<8x8x32xf32>
    %226 = vector.broadcast %224 : vector<1x1x32xf32> to vector<8x8x32xf32>
    %227 = arith.mulf %225, %226 : vector<8x8x32xf32>
    %228 = arith.addf %219, %227 : vector<8x8x32xf32>
    %c0_152 = arith.constant 0 : index
    %c2_153 = arith.constant 2 : index
    %c2_154 = arith.constant 2 : index
    %c1_155 = arith.constant 1 : index
    %229 = vector.load %arg1[%c0_152, %c2_153, %c2_154, %c1_155] : memref<1x10x10x3xf32, #tpu.memory_space<vmem>>, vector<1x8x8x1xf32>
    %230 = vector.shape_cast %229 : vector<1x8x8x1xf32> to vector<8x8x1xf32>
    %c25 = arith.constant 25 : index
    %c0_156 = arith.constant 0 : index
    %c0_157 = arith.constant 0 : index
    %231 = vector.load %arg2[%c25, %c0_156, %c0_157] : memref<27x1x32xf32, #tpu.memory_space<vmem>>, vector<1x1x32xf32>
    %232 = vector.shape_cast %231 : vector<1x1x32xf32> to vector<1x32xf32>
    %233 = vector.shape_cast %232 : vector<1x32xf32> to vector<1x1x32xf32>
    %234 = vector.broadcast %230 : vector<8x8x1xf32> to vector<8x8x32xf32>
    %235 = vector.broadcast %233 : vector<1x1x32xf32> to vector<8x8x32xf32>
    %236 = arith.mulf %234, %235 : vector<8x8x32xf32>
    %237 = arith.addf %228, %236 : vector<8x8x32xf32>
    %c0_158 = arith.constant 0 : index
    %c2_159 = arith.constant 2 : index
    %c2_160 = arith.constant 2 : index
    %c2_161 = arith.constant 2 : index
    %238 = vector.load %arg1[%c0_158, %c2_159, %c2_160, %c2_161] : memref<1x10x10x3xf32, #tpu.memory_space<vmem>>, vector<1x8x8x1xf32>
    %239 = vector.shape_cast %238 : vector<1x8x8x1xf32> to vector<8x8x1xf32>
    %c26 = arith.constant 26 : index
    %c0_162 = arith.constant 0 : index
    %c0_163 = arith.constant 0 : index
    %240 = vector.load %arg2[%c26, %c0_162, %c0_163] : memref<27x1x32xf32, #tpu.memory_space<vmem>>, vector<1x1x32xf32>
    %241 = vector.shape_cast %240 : vector<1x1x32xf32> to vector<1x32xf32>
    %242 = vector.shape_cast %241 : vector<1x32xf32> to vector<1x1x32xf32>
    %243 = vector.broadcast %239 : vector<8x8x1xf32> to vector<8x8x32xf32>
    %244 = vector.broadcast %242 : vector<1x1x32xf32> to vector<8x8x32xf32>
    %245 = arith.mulf %243, %244 : vector<8x8x32xf32>
    %246 = arith.addf %237, %245 : vector<8x8x32xf32>
    %cst = arith.constant 0.000000e+00 : f32
    %247 = vector.broadcast %cst : f32 to vector<8x8x32xf32>
    %248 = arith.maximumf %246, %247 : vector<8x8x32xf32>
    %c0_164 = arith.constant 0 : index
    %c0_165 = arith.constant 0 : index
    %c0_166 = arith.constant 0 : index
    %c0_167 = arith.constant 0 : index
    %249 = vector.load %arg4[%c0_164, %c0_165, %c0_166, %c0_167] : memref<1x8x8x32xf32, #tpu.memory_space<vmem>>, vector<1x8x8x32xf32>
    %250 = vector.shape_cast %249 : vector<1x8x8x32xf32> to vector<8x8x32xf32>
    %251 = vector.shape_cast %248 : vector<8x8x32xf32> to vector<1x8x8x32xf32>
    tpu.vector_store %arg4[%c0_164, %c0_165, %c0_166, %c0_167], %251 {strides = array<i32>} : memref<1x8x8x32xf32, #tpu.memory_space<vmem>>, vector<1x8x8x32xf32>,
    return
  }
  func.func @transform_0(%arg0: i32) -> (i32, i32, i32, i32) {
    %c0_i32 = arith.constant 0 : i32
    %c0_i32_0 = arith.constant 0 : i32
    %c0_i32_1 = arith.constant 0 : i32
    %c0_i32_2 = arith.constant 0 : i32
    return %arg0, %c0_i32, %c0_i32_0, %c0_i32_1 : i32, i32, i32, i32
  }
  func.func @transform_1(%arg0: i32) -> (i32, i32, i32) {
    %c0_i32 = arith.constant 0 : i32
    %c0_i32_0 = arith.constant 0 : i32
    %c0_i32_1 = arith.constant 0 : i32
    %c0_i32_2 = arith.constant 0 : i32
    return %c0_i32, %c0_i32_0, %c0_i32_1 : i32, i32, i32
  }
  func.func @transform_2(%arg0: i32) -> (i32, i32) {
    %c0_i32 = arith.constant 0 : i32
    %c0_i32_0 = arith.constant 0 : i32
    %c0_i32_1 = arith.constant 0 : i32
    return %c0_i32, %c0_i32_0 : i32, i32
  }
  func.func @transform_3(%arg0: i32) -> (i32, i32, i32, i32) {
    %c0_i32 = arith.constant 0 : i32
    %c0_i32_0 = arith.constant 0 : i32
    %c0_i32_1 = arith.constant 0 : i32
    %c0_i32_2 = arith.constant 0 : i32
    return %arg0, %c0_i32, %c0_i32_0, %c0_i32_1 : i32, i32, i32, i32
  }
}

module attributes {stable_mosaic.version = 11 : i64} {
  func.func @_maxpool_kernel(%arg0: i32, %arg1: memref<1x2x4x2x32xf32, #tpu.memory_space<vmem>>, %arg2: memref<1x4x32xf32, #tpu.memory_space<vmem>>) attributes {dimension_semantics = [#tpu.dimension_semantics<parallel>], iteration_bounds = array<i64: 8>, scalar_prefetch = 0 : i64, scratch_operands = 0 : i64, tpu.core_type = #tpu.core_type<tc>, window_params = [{transform_indices = @transform_0, window_bounds = array<i64: 1, 2, 4, 2, 32>}, {transform_indices = @transform_1, window_bounds = array<i64: 1, 4, 32>}]} {
    %c0 = arith.constant 0 : index
    %c0_0 = arith.constant 0 : index
    %c0_1 = arith.constant 0 : index
    %c0_2 = arith.constant 0 : index
    %c0_3 = arith.constant 0 : index
    %0 = vector.load %arg1[%c0, %c0_0, %c0_1, %c0_2, %c0_3] : memref<1x2x4x2x32xf32, #tpu.memory_space<vmem>>, vector<1x1x4x2x32xf32>
    %1 = vector.shape_cast %0 : vector<1x1x4x2x32xf32> to vector<4x2x32xf32>
    %c0_4 = arith.constant 0 : index
    %c1 = arith.constant 1 : index
    %c0_5 = arith.constant 0 : index
    %c0_6 = arith.constant 0 : index
    %c0_7 = arith.constant 0 : index
    %2 = vector.load %arg1[%c0_4, %c1, %c0_5, %c0_6, %c0_7] : memref<1x2x4x2x32xf32, #tpu.memory_space<vmem>>, vector<1x1x4x2x32xf32>
    %3 = vector.shape_cast %2 : vector<1x1x4x2x32xf32> to vector<4x2x32xf32>
    %4 = arith.maximumf %1, %3 : vector<4x2x32xf32>
    %cst = arith.constant dense<0xFF800000> : vector<4x32xf32>
    %5 = vector.multi_reduction <maximumf>, %4, %cst [1] : vector<4x2x32xf32> to vector<4x32xf32>
    %c0_8 = arith.constant 0 : index
    %c0_9 = arith.constant 0 : index
    %c0_10 = arith.constant 0 : index
    %6 = vector.load %arg2[%c0_8, %c0_9, %c0_10] : memref<1x4x32xf32, #tpu.memory_space<vmem>>, vector<1x4x32xf32>
    %7 = vector.shape_cast %6 : vector<1x4x32xf32> to vector<4x32xf32>
    %8 = vector.shape_cast %5 : vector<4x32xf32> to vector<1x4x32xf32>
    tpu.vector_store %arg2[%c0_8, %c0_9, %c0_10], %8 {strides = array<i32>} : memref<1x4x32xf32, #tpu.memory_space<vmem>>, vector<1x4x32xf32>,
    return
  }
  func.func @transform_0(%arg0: i32) -> (i32, i32, i32, i32, i32) {
    %c0_i32 = arith.constant 0 : i32
    %c0_i32_0 = arith.constant 0 : i32
    %c0_i32_1 = arith.constant 0 : i32
    %c0_i32_2 = arith.constant 0 : i32
    %c0_i32_3 = arith.constant 0 : i32
    return %arg0, %c0_i32, %c0_i32_0, %c0_i32_1, %c0_i32_2 : i32, i32, i32, i32, i32
  }
  func.func @transform_1(%arg0: i32) -> (i32, i32, i32) {
    %c0_i32 = arith.constant 0 : i32
    %c0_i32_0 = arith.constant 0 : i32
    %c0_i32_1 = arith.constant 0 : i32
    return %arg0, %c0_i32, %c0_i32_0 : i32, i32, i32
  }
}

module attributes {stable_mosaic.version = 11 : i64} {
  func.func @_encoder_heads_kernel(%arg0: i32, %arg1: memref<32x32xf32, #tpu.memory_space<vmem>>, %arg2: memref<32x32xf32, #tpu.memory_space<vmem>>, %arg3: memref<32x32xf32, #tpu.memory_space<vmem>>, %arg4: memref<1x32x32xbf16, #tpu.memory_space<vmem>>, %arg5: memref<1x1x32xf32, #tpu.memory_space<vmem>>, %arg6: memref<1x32x32xbf16, #tpu.memory_space<vmem>>, %arg7: memref<1x1x32xf32, #tpu.memory_space<vmem>>, %arg8: memref<1x32x32xbf16, #tpu.memory_space<vmem>>, %arg9: memref<1x1x32xf32, #tpu.memory_space<vmem>>, %arg10: memref<1x32x32xbf16, #tpu.memory_space<vmem>>, %arg11: memref<1x1x32xf32, #tpu.memory_space<vmem>>, %arg12: memref<1x1x32xf32, #tpu.memory_space<vmem>>, %arg13: memref<1x1x32xf32, #tpu.memory_space<vmem>>, %arg14: memref<1x32x2048xbf16, #tpu.memory_space<vmem>>, %arg15: memref<1x1x2048xf32, #tpu.memory_space<vmem>>, %arg16: memref<1x2048x32xbf16, #tpu.memory_space<vmem>>, %arg17: memref<1x1x32xf32, #tpu.memory_space<vmem>>, %arg18: memref<1x1x32xf32, #tpu.memory_space<vmem>>, %arg19: memref<1x1x32xf32, #tpu.memory_space<vmem>>, %arg20: memref<32x180xbf16, #tpu.memory_space<vmem>>, %arg21: memref<1x180xf32, #tpu.memory_space<vmem>>, %arg22: memref<32x180xf32, #tpu.memory_space<vmem>>, %arg23: memref<32x32xf32, #tpu.memory_space<vmem>>) attributes {dimension_semantics = [#tpu.dimension_semantics<arbitrary>], iteration_bounds = array<i64: 2>, scalar_prefetch = 0 : i64, scratch_operands = 1 : i64, tpu.core_type = #tpu.core_type<tc>, window_params = [{pipeline_mode = #tpu.pipeline_mode<synchronous>, transform_indices = @transform_0, window_bounds = array<i64: 32, 32>}, {pipeline_mode = #tpu.pipeline_mode<synchronous>, transform_indices = @transform_1, window_bounds = array<i64: 32, 32>}, {pipeline_mode = #tpu.pipeline_mode<synchronous>, transform_indices = @transform_2, window_bounds = array<i64: 32, 32>}, {transform_indices = @transform_3, window_bounds = array<i64: 1, 32, 32>}, {transform_indices = @transform_4, window_bounds = array<i64: 1, 1, 32>}, {transform_indices = @transform_5, window_bounds = array<i64: 1, 32, 32>}, {transform_indices = @transform_6, window_bounds = array<i64: 1, 1, 32>}, {transform_indices = @transform_7, window_bounds = array<i64: 1, 32, 32>}, {transform_indices = @transform_8, window_bounds = array<i64: 1, 1, 32>}, {transform_indices = @transform_9, window_bounds = array<i64: 1, 32, 32>}, {transform_indices = @transform_10, window_bounds = array<i64: 1, 1, 32>}, {transform_indices = @transform_11, window_bounds = array<i64: 1, 1, 32>}, {transform_indices = @transform_12, window_bounds = array<i64: 1, 1, 32>}, {transform_indices = @transform_13, window_bounds = array<i64: 1, 32, 2048>}, {transform_indices = @transform_14, window_bounds = array<i64: 1, 1, 2048>}, {transform_indices = @transform_15, window_bounds = array<i64: 1, 2048, 32>}, {transform_indices = @transform_16, window_bounds = array<i64: 1, 1, 32>}, {transform_indices = @transform_17, window_bounds = array<i64: 1, 1, 32>}, {transform_indices = @transform_18, window_bounds = array<i64: 1, 1, 32>}, {pipeline_mode = #tpu.pipeline_mode<synchronous>, transform_indices = @transform_19, window_bounds = array<i64: 32, 180>}, {pipeline_mode = #tpu.pipeline_mode<synchronous>, transform_indices = @transform_20, window_bounds = array<i64: 1, 180>}, {pipeline_mode = #tpu.pipeline_mode<synchronous>, transform_indices = @transform_21, window_bounds = array<i64: 32, 180>}]} {
    %c0_i32 = arith.constant 0 : i32
    %0 = arith.cmpi eq, %arg0, %c0_i32 : i32
    %1 = arith.extui %0 : i1 to i32
    %c0_i32_0 = arith.constant 0 : i32
    %2 = arith.cmpi ne, %1, %c0_i32_0 : i32
    scf.if %2 {
      %c0_101 = arith.constant 0 : index
      %c0_102 = arith.constant 0 : index
      %237 = vector.load %arg1[%c0_101, %c0_102] : memref<32x32xf32, #tpu.memory_space<vmem>>, vector<32x32xf32>
      %c0_103 = arith.constant 0 : index
      %c0_104 = arith.constant 0 : index
      %238 = vector.load %arg2[%c0_103, %c0_104] : memref<32x32xf32, #tpu.memory_space<vmem>>, vector<32x32xf32>
      %239 = arith.addf %237, %238 : vector<32x32xf32>
      %c0_105 = arith.constant 0 : index
      %c0_106 = arith.constant 0 : index
      %240 = vector.load %arg23[%c0_105, %c0_106] : memref<32x32xf32, #tpu.memory_space<vmem>>, vector<32x32xf32>
      tpu.vector_store %arg23[%c0_105, %c0_106], %239 {strides = array<i32>} : memref<32x32xf32, #tpu.memory_space<vmem>>, vector<32x32xf32>,
    } else {
    }
    %c0 = arith.constant 0 : index
    %c0_1 = arith.constant 0 : index
    %3 = vector.load %arg23[%c0, %c0_1] : memref<32x32xf32, #tpu.memory_space<vmem>>, vector<32x32xf32>
    %4 = arith.truncf %3 : vector<32x32xf32> to vector<32x32xbf16>
    %c0_2 = arith.constant 0 : index
    %c0_3 = arith.constant 0 : index
    %c0_4 = arith.constant 0 : index
    %5 = vector.load %arg4[%c0_2, %c0_3, %c0_4] : memref<1x32x32xbf16, #tpu.memory_space<vmem>>, vector<1x32x32xbf16>
    %6 = vector.shape_cast %5 : vector<1x32x32xbf16> to vector<32x32xbf16>
    %cst = arith.constant dense<0.000000e+00> : vector<32x32xf32>
    %7 = tpu.matmul %4, %6, %cst {dimension_numbers = #tpu.dot_dimension_numbers<[1], [0], [0], [1], [0, 0, 1, 1], [], []>} : vector<32x32xbf16>, vector<32x32xbf16>, vector<32x32xf32> -> vector<32x32xf32>
    %c0_5 = arith.constant 0 : index
    %c0_6 = arith.constant 0 : index
    %c0_7 = arith.constant 0 : index
    %8 = vector.load %arg5[%c0_5, %c0_6, %c0_7] : memref<1x1x32xf32, #tpu.memory_space<vmem>>, vector<1x1x32xf32>
    %9 = vector.shape_cast %8 : vector<1x1x32xf32> to vector<1x32xf32>
    %10 = vector.broadcast %9 : vector<1x32xf32> to vector<32x32xf32>
    %11 = arith.addf %7, %10 : vector<32x32xf32>
    %cst_8 = arith.constant 0.353553385 : f32
    %12 = vector.broadcast %cst_8 : f32 to vector<32x32xf32>
    %13 = arith.mulf %11, %12 : vector<32x32xf32>
    %c0_9 = arith.constant 0 : index
    %c0_10 = arith.constant 0 : index
    %c0_11 = arith.constant 0 : index
    %14 = vector.load %arg6[%c0_9, %c0_10, %c0_11] : memref<1x32x32xbf16, #tpu.memory_space<vmem>>, vector<1x32x32xbf16>
    %15 = vector.shape_cast %14 : vector<1x32x32xbf16> to vector<32x32xbf16>
    %cst_12 = arith.constant dense<0.000000e+00> : vector<32x32xf32>
    %16 = tpu.matmul %4, %15, %cst_12 {dimension_numbers = #tpu.dot_dimension_numbers<[1], [0], [0], [1], [0, 0, 1, 1], [], []>} : vector<32x32xbf16>, vector<32x32xbf16>, vector<32x32xf32> -> vector<32x32xf32>
    %c0_13 = arith.constant 0 : index
    %c0_14 = arith.constant 0 : index
    %c0_15 = arith.constant 0 : index
    %17 = vector.load %arg7[%c0_13, %c0_14, %c0_15] : memref<1x1x32xf32, #tpu.memory_space<vmem>>, vector<1x1x32xf32>
    %18 = vector.shape_cast %17 : vector<1x1x32xf32> to vector<1x32xf32>
    %19 = vector.broadcast %18 : vector<1x32xf32> to vector<32x32xf32>
    %20 = arith.addf %16, %19 : vector<32x32xf32>
    %c0_16 = arith.constant 0 : index
    %c0_17 = arith.constant 0 : index
    %c0_18 = arith.constant 0 : index
    %21 = vector.load %arg8[%c0_16, %c0_17, %c0_18] : memref<1x32x32xbf16, #tpu.memory_space<vmem>>, vector<1x32x32xbf16>
    %22 = vector.shape_cast %21 : vector<1x32x32xbf16> to vector<32x32xbf16>
    %cst_19 = arith.constant dense<0.000000e+00> : vector<32x32xf32>
    %23 = tpu.matmul %4, %22, %cst_19 {dimension_numbers = #tpu.dot_dimension_numbers<[1], [0], [0], [1], [0, 0, 1, 1], [], []>} : vector<32x32xbf16>, vector<32x32xbf16>, vector<32x32xf32> -> vector<32x32xf32>
    %c0_20 = arith.constant 0 : index
    %c0_21 = arith.constant 0 : index
    %c0_22 = arith.constant 0 : index
    %24 = vector.load %arg9[%c0_20, %c0_21, %c0_22] : memref<1x1x32xf32, #tpu.memory_space<vmem>>, vector<1x1x32xf32>
    %25 = vector.shape_cast %24 : vector<1x1x32xf32> to vector<1x32xf32>
    %26 = vector.broadcast %25 : vector<1x32xf32> to vector<32x32xf32>
    %27 = arith.addf %23, %26 : vector<32x32xf32>
    %28 = tpu.transpose %20, [1, 0] : vector<32x32xf32> -> vector<32x32xf32>
    %29 = arith.truncf %28 : vector<32x32xf32> to vector<32x32xbf16>
    %c0_23 = arith.constant 0 : index
    %c0_24 = arith.constant 0 : index
    %30 = vector.load %arg3[%c0_23, %c0_24] : memref<32x32xf32, #tpu.memory_space<vmem>>, vector<32x32xf32>
    %31 = tpu.iota {dimensions = array<i32: 1>} : vector<1x32xi32>
    %cst_25 = arith.constant 0.000000e+00 : f32
    %32 = vector.broadcast %cst_25 : f32 to vector<32x32xf32>
    %c0_i32_26 = arith.constant 0 : i32
    %33 = vector.broadcast %c0_i32_26 : i32 to vector<1x32xi32>
    %34 = arith.cmpi sge, %31, %33 : vector<1x32xi32>
    %c8_i32 = arith.constant 8 : i32
    %35 = vector.broadcast %c8_i32 : i32 to vector<1x32xi32>
    %36 = arith.cmpi slt, %31, %35 : vector<1x32xi32>
    %37 = arith.andi %34, %36 : vector<1x32xi1>
    %cst_27 = arith.constant 0.000000e+00 : f32
    %38 = vector.shape_cast %37 : vector<1x32xi1> to vector<1x32xi1>
    %39 = vector.broadcast %38 : vector<1x32xi1> to vector<32x32xi1>
    %40 = vector.broadcast %cst_27 : f32 to vector<32x32xf32>
    %41 = arith.select %39, %13, %40 : vector<32x32xi1>, vector<32x32xf32>
    %42 = arith.truncf %41 : vector<32x32xf32> to vector<32x32xbf16>
    %cst_28 = arith.constant dense<0.000000e+00> : vector<32x32xf32>
    %43 = tpu.matmul %42, %29, %cst_28 {dimension_numbers = #tpu.dot_dimension_numbers<[1], [0], [0], [1], [0, 0, 1, 1], [], []>} : vector<32x32xbf16>, vector<32x32xbf16>, vector<32x32xf32> -> vector<32x32xf32>
    %44 = arith.addf %43, %30 : vector<32x32xf32>
    %cst_29 = arith.constant dense<0xFF800000> : vector<32xf32>
    %45 = vector.multi_reduction <maximumf>, %44, %cst_29 [1] : vector<32x32xf32> to vector<32xf32>
    %46 = vector.shape_cast %45 : vector<32xf32> to vector<32x1xf32>
    %47 = vector.broadcast %46 : vector<32x1xf32> to vector<32x32xf32>
    %48 = arith.subf %44, %47 : vector<32x32xf32>
    %49 = math.exp %48 : vector<32x32xf32>
    %cst_30 = arith.constant dense<0.000000e+00> : vector<32xf32>
    %50 = vector.multi_reduction <add>, %49, %cst_30 [1] : vector<32x32xf32> to vector<32xf32>
    %51 = vector.shape_cast %50 : vector<32xf32> to vector<32x1xf32>
    %52 = tpu.reciprocal %51 {approx = true} : vector<32x1xf32> -> vector<32x1xf32>
    %53 = vector.broadcast %52 : vector<32x1xf32> to vector<32x32xf32>
    %54 = arith.mulf %49, %53 : vector<32x32xf32>
    %cst_31 = arith.constant 0.000000e+00 : f32
    %55 = vector.shape_cast %37 : vector<1x32xi1> to vector<1x32xi1>
    %56 = vector.broadcast %55 : vector<1x32xi1> to vector<32x32xi1>
    %57 = vector.broadcast %cst_31 : f32 to vector<32x32xf32>
    %58 = arith.select %56, %27, %57 : vector<32x32xi1>, vector<32x32xf32>
    %59 = arith.truncf %58 : vector<32x32xf32> to vector<32x32xbf16>
    %60 = arith.truncf %54 : vector<32x32xf32> to vector<32x32xbf16>
    %cst_32 = arith.constant dense<0.000000e+00> : vector<32x32xf32>
    %61 = tpu.matmul %60, %59, %cst_32 {dimension_numbers = #tpu.dot_dimension_numbers<[1], [0], [0], [1], [0, 0, 1, 1], [], []>} : vector<32x32xbf16>, vector<32x32xbf16>, vector<32x32xf32> -> vector<32x32xf32>
    %62 = arith.addf %32, %61 : vector<32x32xf32>
    %c8_i32_33 = arith.constant 8 : i32
    %63 = vector.broadcast %c8_i32_33 : i32 to vector<1x32xi32>
    %64 = arith.cmpi sge, %31, %63 : vector<1x32xi32>
    %c16_i32 = arith.constant 16 : i32
    %65 = vector.broadcast %c16_i32 : i32 to vector<1x32xi32>
    %66 = arith.cmpi slt, %31, %65 : vector<1x32xi32>
    %67 = arith.andi %64, %66 : vector<1x32xi1>
    %cst_34 = arith.constant 0.000000e+00 : f32
    %68 = vector.shape_cast %67 : vector<1x32xi1> to vector<1x32xi1>
    %69 = vector.broadcast %68 : vector<1x32xi1> to vector<32x32xi1>
    %70 = vector.broadcast %cst_34 : f32 to vector<32x32xf32>
    %71 = arith.select %69, %13, %70 : vector<32x32xi1>, vector<32x32xf32>
    %72 = arith.truncf %71 : vector<32x32xf32> to vector<32x32xbf16>
    %cst_35 = arith.constant dense<0.000000e+00> : vector<32x32xf32>
    %73 = tpu.matmul %72, %29, %cst_35 {dimension_numbers = #tpu.dot_dimension_numbers<[1], [0], [0], [1], [0, 0, 1, 1], [], []>} : vector<32x32xbf16>, vector<32x32xbf16>, vector<32x32xf32> -> vector<32x32xf32>
    %74 = arith.addf %73, %30 : vector<32x32xf32>
    %cst_36 = arith.constant dense<0xFF800000> : vector<32xf32>
    %75 = vector.multi_reduction <maximumf>, %74, %cst_36 [1] : vector<32x32xf32> to vector<32xf32>
    %76 = vector.shape_cast %75 : vector<32xf32> to vector<32x1xf32>
    %77 = vector.broadcast %76 : vector<32x1xf32> to vector<32x32xf32>
    %78 = arith.subf %74, %77 : vector<32x32xf32>
    %79 = math.exp %78 : vector<32x32xf32>
    %cst_37 = arith.constant dense<0.000000e+00> : vector<32xf32>
    %80 = vector.multi_reduction <add>, %79, %cst_37 [1] : vector<32x32xf32> to vector<32xf32>
    %81 = vector.shape_cast %80 : vector<32xf32> to vector<32x1xf32>
    %82 = tpu.reciprocal %81 {approx = true} : vector<32x1xf32> -> vector<32x1xf32>
    %83 = vector.broadcast %82 : vector<32x1xf32> to vector<32x32xf32>
    %84 = arith.mulf %79, %83 : vector<32x32xf32>
    %cst_38 = arith.constant 0.000000e+00 : f32
    %85 = vector.shape_cast %67 : vector<1x32xi1> to vector<1x32xi1>
    %86 = vector.broadcast %85 : vector<1x32xi1> to vector<32x32xi1>
    %87 = vector.broadcast %cst_38 : f32 to vector<32x32xf32>
    %88 = arith.select %86, %27, %87 : vector<32x32xi1>, vector<32x32xf32>
    %89 = arith.truncf %88 : vector<32x32xf32> to vector<32x32xbf16>
    %90 = arith.truncf %84 : vector<32x32xf32> to vector<32x32xbf16>
    %cst_39 = arith.constant dense<0.000000e+00> : vector<32x32xf32>
    %91 = tpu.matmul %90, %89, %cst_39 {dimension_numbers = #tpu.dot_dimension_numbers<[1], [0], [0], [1], [0, 0, 1, 1], [], []>} : vector<32x32xbf16>, vector<32x32xbf16>, vector<32x32xf32> -> vector<32x32xf32>
    %92 = arith.addf %62, %91 : vector<32x32xf32>
    %c16_i32_40 = arith.constant 16 : i32
    %93 = vector.broadcast %c16_i32_40 : i32 to vector<1x32xi32>
    %94 = arith.cmpi sge, %31, %93 : vector<1x32xi32>
    %c24_i32 = arith.constant 24 : i32
    %95 = vector.broadcast %c24_i32 : i32 to vector<1x32xi32>
    %96 = arith.cmpi slt, %31, %95 : vector<1x32xi32>
    %97 = arith.andi %94, %96 : vector<1x32xi1>
    %cst_41 = arith.constant 0.000000e+00 : f32
    %98 = vector.shape_cast %97 : vector<1x32xi1> to vector<1x32xi1>
    %99 = vector.broadcast %98 : vector<1x32xi1> to vector<32x32xi1>
    %100 = vector.broadcast %cst_41 : f32 to vector<32x32xf32>
    %101 = arith.select %99, %13, %100 : vector<32x32xi1>, vector<32x32xf32>
    %102 = arith.truncf %101 : vector<32x32xf32> to vector<32x32xbf16>
    %cst_42 = arith.constant dense<0.000000e+00> : vector<32x32xf32>
    %103 = tpu.matmul %102, %29, %cst_42 {dimension_numbers = #tpu.dot_dimension_numbers<[1], [0], [0], [1], [0, 0, 1, 1], [], []>} : vector<32x32xbf16>, vector<32x32xbf16>, vector<32x32xf32> -> vector<32x32xf32>
    %104 = arith.addf %103, %30 : vector<32x32xf32>
    %cst_43 = arith.constant dense<0xFF800000> : vector<32xf32>
    %105 = vector.multi_reduction <maximumf>, %104, %cst_43 [1] : vector<32x32xf32> to vector<32xf32>
    %106 = vector.shape_cast %105 : vector<32xf32> to vector<32x1xf32>
    %107 = vector.broadcast %106 : vector<32x1xf32> to vector<32x32xf32>
    %108 = arith.subf %104, %107 : vector<32x32xf32>
    %109 = math.exp %108 : vector<32x32xf32>
    %cst_44 = arith.constant dense<0.000000e+00> : vector<32xf32>
    %110 = vector.multi_reduction <add>, %109, %cst_44 [1] : vector<32x32xf32> to vector<32xf32>
    %111 = vector.shape_cast %110 : vector<32xf32> to vector<32x1xf32>
    %112 = tpu.reciprocal %111 {approx = true} : vector<32x1xf32> -> vector<32x1xf32>
    %113 = vector.broadcast %112 : vector<32x1xf32> to vector<32x32xf32>
    %114 = arith.mulf %109, %113 : vector<32x32xf32>
    %cst_45 = arith.constant 0.000000e+00 : f32
    %115 = vector.shape_cast %97 : vector<1x32xi1> to vector<1x32xi1>
    %116 = vector.broadcast %115 : vector<1x32xi1> to vector<32x32xi1>
    %117 = vector.broadcast %cst_45 : f32 to vector<32x32xf32>
    %118 = arith.select %116, %27, %117 : vector<32x32xi1>, vector<32x32xf32>
    %119 = arith.truncf %118 : vector<32x32xf32> to vector<32x32xbf16>
    %120 = arith.truncf %114 : vector<32x32xf32> to vector<32x32xbf16>
    %cst_46 = arith.constant dense<0.000000e+00> : vector<32x32xf32>
    %121 = tpu.matmul %120, %119, %cst_46 {dimension_numbers = #tpu.dot_dimension_numbers<[1], [0], [0], [1], [0, 0, 1, 1], [], []>} : vector<32x32xbf16>, vector<32x32xbf16>, vector<32x32xf32> -> vector<32x32xf32>
    %122 = arith.addf %92, %121 : vector<32x32xf32>
    %c24_i32_47 = arith.constant 24 : i32
    %123 = vector.broadcast %c24_i32_47 : i32 to vector<1x32xi32>
    %124 = arith.cmpi sge, %31, %123 : vector<1x32xi32>
    %c32_i32 = arith.constant 32 : i32
    %125 = vector.broadcast %c32_i32 : i32 to vector<1x32xi32>
    %126 = arith.cmpi slt, %31, %125 : vector<1x32xi32>
    %127 = arith.andi %124, %126 : vector<1x32xi1>
    %cst_48 = arith.constant 0.000000e+00 : f32
    %128 = vector.shape_cast %127 : vector<1x32xi1> to vector<1x32xi1>
    %129 = vector.broadcast %128 : vector<1x32xi1> to vector<32x32xi1>
    %130 = vector.broadcast %cst_48 : f32 to vector<32x32xf32>
    %131 = arith.select %129, %13, %130 : vector<32x32xi1>, vector<32x32xf32>
    %132 = arith.truncf %131 : vector<32x32xf32> to vector<32x32xbf16>
    %cst_49 = arith.constant dense<0.000000e+00> : vector<32x32xf32>
    %133 = tpu.matmul %132, %29, %cst_49 {dimension_numbers = #tpu.dot_dimension_numbers<[1], [0], [0], [1], [0, 0, 1, 1], [], []>} : vector<32x32xbf16>, vector<32x32xbf16>, vector<32x32xf32> -> vector<32x32xf32>
    %134 = arith.addf %133, %30 : vector<32x32xf32>
    %cst_50 = arith.constant dense<0xFF800000> : vector<32xf32>
    %135 = vector.multi_reduction <maximumf>, %134, %cst_50 [1] : vector<32x32xf32> to vector<32xf32>
    %136 = vector.shape_cast %135 : vector<32xf32> to vector<32x1xf32>
    %137 = vector.broadcast %136 : vector<32x1xf32> to vector<32x32xf32>
    %138 = arith.subf %134, %137 : vector<32x32xf32>
    %139 = math.exp %138 : vector<32x32xf32>
    %cst_51 = arith.constant dense<0.000000e+00> : vector<32xf32>
    %140 = vector.multi_reduction <add>, %139, %cst_51 [1] : vector<32x32xf32> to vector<32xf32>
    %141 = vector.shape_cast %140 : vector<32xf32> to vector<32x1xf32>
    %142 = tpu.reciprocal %141 {approx = true} : vector<32x1xf32> -> vector<32x1xf32>
    %143 = vector.broadcast %142 : vector<32x1xf32> to vector<32x32xf32>
    %144 = arith.mulf %139, %143 : vector<32x32xf32>
    %cst_52 = arith.constant 0.000000e+00 : f32
    %145 = vector.shape_cast %127 : vector<1x32xi1> to vector<1x32xi1>
    %146 = vector.broadcast %145 : vector<1x32xi1> to vector<32x32xi1>
    %147 = vector.broadcast %cst_52 : f32 to vector<32x32xf32>
    %148 = arith.select %146, %27, %147 : vector<32x32xi1>, vector<32x32xf32>
    %149 = arith.truncf %148 : vector<32x32xf32> to vector<32x32xbf16>
    %150 = arith.truncf %144 : vector<32x32xf32> to vector<32x32xbf16>
    %cst_53 = arith.constant dense<0.000000e+00> : vector<32x32xf32>
    %151 = tpu.matmul %150, %149, %cst_53 {dimension_numbers = #tpu.dot_dimension_numbers<[1], [0], [0], [1], [0, 0, 1, 1], [], []>} : vector<32x32xbf16>, vector<32x32xbf16>, vector<32x32xf32> -> vector<32x32xf32>
    %152 = arith.addf %122, %151 : vector<32x32xf32>
    %153 = arith.truncf %152 : vector<32x32xf32> to vector<32x32xbf16>
    %c0_54 = arith.constant 0 : index
    %c0_55 = arith.constant 0 : index
    %c0_56 = arith.constant 0 : index
    %154 = vector.load %arg10[%c0_54, %c0_55, %c0_56] : memref<1x32x32xbf16, #tpu.memory_space<vmem>>, vector<1x32x32xbf16>
    %155 = vector.shape_cast %154 : vector<1x32x32xbf16> to vector<32x32xbf16>
    %cst_57 = arith.constant dense<0.000000e+00> : vector<32x32xf32>
    %156 = tpu.matmul %153, %155, %cst_57 {dimension_numbers = #tpu.dot_dimension_numbers<[1], [0], [0], [1], [0, 0, 1, 1], [], []>} : vector<32x32xbf16>, vector<32x32xbf16>, vector<32x32xf32> -> vector<32x32xf32>
    %c0_58 = arith.constant 0 : index
    %c0_59 = arith.constant 0 : index
    %c0_60 = arith.constant 0 : index
    %157 = vector.load %arg11[%c0_58, %c0_59, %c0_60] : memref<1x1x32xf32, #tpu.memory_space<vmem>>, vector<1x1x32xf32>
    %158 = vector.shape_cast %157 : vector<1x1x32xf32> to vector<1x32xf32>
    %159 = vector.broadcast %158 : vector<1x32xf32> to vector<32x32xf32>
    %160 = arith.addf %156, %159 : vector<32x32xf32>
    %161 = arith.addf %3, %160 : vector<32x32xf32>
    %c0_61 = arith.constant 0 : index
    %c0_62 = arith.constant 0 : index
    %c0_63 = arith.constant 0 : index
    %162 = vector.load %arg12[%c0_61, %c0_62, %c0_63] : memref<1x1x32xf32, #tpu.memory_space<vmem>>, vector<1x1x32xf32>
    %163 = vector.shape_cast %162 : vector<1x1x32xf32> to vector<1x32xf32>
    %c0_64 = arith.constant 0 : index
    %c0_65 = arith.constant 0 : index
    %c0_66 = arith.constant 0 : index
    %164 = vector.load %arg13[%c0_64, %c0_65, %c0_66] : memref<1x1x32xf32, #tpu.memory_space<vmem>>, vector<1x1x32xf32>
    %165 = vector.shape_cast %164 : vector<1x1x32xf32> to vector<1x32xf32>
    %cst_67 = arith.constant dense<0.000000e+00> : vector<32xf32>
    %166 = vector.multi_reduction <add>, %161, %cst_67 [1] : vector<32x32xf32> to vector<32xf32>
    %167 = vector.shape_cast %166 : vector<32xf32> to vector<32x1xf32>
    %cst_68 = arith.constant 3.200000e+01 : f32
    %168 = vector.broadcast %cst_68 : f32 to vector<32x1xf32>
    %169 = arith.divf %167, %168 : vector<32x1xf32>
    %170 = vector.broadcast %169 : vector<32x1xf32> to vector<32x32xf32>
    %171 = arith.subf %161, %170 : vector<32x32xf32>
    %172 = arith.mulf %171, %171 : vector<32x32xf32>
    %cst_69 = arith.constant dense<0.000000e+00> : vector<32xf32>
    %173 = vector.multi_reduction <add>, %172, %cst_69 [1] : vector<32x32xf32> to vector<32xf32>
    %174 = vector.shape_cast %173 : vector<32xf32> to vector<32x1xf32>
    %cst_70 = arith.constant 3.200000e+01 : f32
    %175 = vector.broadcast %cst_70 : f32 to vector<32x1xf32>
    %176 = arith.divf %174, %175 : vector<32x1xf32>
    %177 = vector.broadcast %169 : vector<32x1xf32> to vector<32x32xf32>
    %178 = arith.subf %161, %177 : vector<32x32xf32>
    %cst_71 = arith.constant 9.99999974E-6 : f32
    %179 = vector.broadcast %cst_71 : f32 to vector<32x1xf32>
    %180 = arith.addf %176, %179 : vector<32x1xf32>
    %181 = math.rsqrt %180 : vector<32x1xf32>
    %182 = vector.broadcast %181 : vector<32x1xf32> to vector<32x32xf32>
    %183 = arith.mulf %178, %182 : vector<32x32xf32>
    %184 = vector.broadcast %163 : vector<1x32xf32> to vector<32x32xf32>
    %185 = arith.mulf %183, %184 : vector<32x32xf32>
    %186 = vector.broadcast %165 : vector<1x32xf32> to vector<32x32xf32>
    %187 = arith.addf %185, %186 : vector<32x32xf32>
    %188 = arith.truncf %187 : vector<32x32xf32> to vector<32x32xbf16>
    %c0_72 = arith.constant 0 : index
    %c0_73 = arith.constant 0 : index
    %c0_74 = arith.constant 0 : index
    %189 = vector.load %arg14[%c0_72, %c0_73, %c0_74] : memref<1x32x2048xbf16, #tpu.memory_space<vmem>>, vector<1x32x2048xbf16>
    %190 = vector.shape_cast %189 : vector<1x32x2048xbf16> to vector<32x2048xbf16>
    %cst_75 = arith.constant dense<0.000000e+00> : vector<32x2048xf32>
    %191 = tpu.matmul %188, %190, %cst_75 {dimension_numbers = #tpu.dot_dimension_numbers<[1], [0], [0], [1], [0, 0, 1, 1], [], []>} : vector<32x32xbf16>, vector<32x2048xbf16>, vector<32x2048xf32> -> vector<32x2048xf32>
    %c0_76 = arith.constant 0 : index
    %c0_77 = arith.constant 0 : index
    %c0_78 = arith.constant 0 : index
    %192 = vector.load %arg15[%c0_76, %c0_77, %c0_78] : memref<1x1x2048xf32, #tpu.memory_space<vmem>>, vector<1x1x2048xf32>
    %193 = vector.shape_cast %192 : vector<1x1x2048xf32> to vector<1x2048xf32>
    %194 = vector.broadcast %193 : vector<1x2048xf32> to vector<32x2048xf32>
    %195 = arith.addf %191, %194 : vector<32x2048xf32>
    %cst_79 = arith.constant 0.000000e+00 : f32
    %196 = vector.broadcast %cst_79 : f32 to vector<32x2048xf32>
    %197 = arith.maximumf %195, %196 : vector<32x2048xf32>
    %198 = arith.truncf %197 : vector<32x2048xf32> to vector<32x2048xbf16>
    %c0_80 = arith.constant 0 : index
    %c0_81 = arith.constant 0 : index
    %c0_82 = arith.constant 0 : index
    %199 = vector.load %arg16[%c0_80, %c0_81, %c0_82] : memref<1x2048x32xbf16, #tpu.memory_space<vmem>>, vector<1x2048x32xbf16>
    %200 = vector.shape_cast %199 : vector<1x2048x32xbf16> to vector<2048x32xbf16>
    %cst_83 = arith.constant dense<0.000000e+00> : vector<32x32xf32>
    %201 = tpu.matmul %198, %200, %cst_83 {dimension_numbers = #tpu.dot_dimension_numbers<[1], [0], [0], [1], [0, 0, 1, 1], [], []>} : vector<32x2048xbf16>, vector<2048x32xbf16>, vector<32x32xf32> -> vector<32x32xf32>
    %c0_84 = arith.constant 0 : index
    %c0_85 = arith.constant 0 : index
    %c0_86 = arith.constant 0 : index
    %202 = vector.load %arg17[%c0_84, %c0_85, %c0_86] : memref<1x1x32xf32, #tpu.memory_space<vmem>>, vector<1x1x32xf32>
    %203 = vector.shape_cast %202 : vector<1x1x32xf32> to vector<1x32xf32>
    %204 = vector.broadcast %203 : vector<1x32xf32> to vector<32x32xf32>
    %205 = arith.addf %201, %204 : vector<32x32xf32>
    %206 = arith.addf %187, %205 : vector<32x32xf32>
    %c0_87 = arith.constant 0 : index
    %c0_88 = arith.constant 0 : index
    %c0_89 = arith.constant 0 : index
    %207 = vector.load %arg18[%c0_87, %c0_88, %c0_89] : memref<1x1x32xf32, #tpu.memory_space<vmem>>, vector<1x1x32xf32>
    %208 = vector.shape_cast %207 : vector<1x1x32xf32> to vector<1x32xf32>
    %c0_90 = arith.constant 0 : index
    %c0_91 = arith.constant 0 : index
    %c0_92 = arith.constant 0 : index
    %209 = vector.load %arg19[%c0_90, %c0_91, %c0_92] : memref<1x1x32xf32, #tpu.memory_space<vmem>>, vector<1x1x32xf32>
    %210 = vector.shape_cast %209 : vector<1x1x32xf32> to vector<1x32xf32>
    %cst_93 = arith.constant dense<0.000000e+00> : vector<32xf32>
    %211 = vector.multi_reduction <add>, %206, %cst_93 [1] : vector<32x32xf32> to vector<32xf32>
    %212 = vector.shape_cast %211 : vector<32xf32> to vector<32x1xf32>
    %cst_94 = arith.constant 3.200000e+01 : f32
    %213 = vector.broadcast %cst_94 : f32 to vector<32x1xf32>
    %214 = arith.divf %212, %213 : vector<32x1xf32>
    %215 = vector.broadcast %214 : vector<32x1xf32> to vector<32x32xf32>
    %216 = arith.subf %206, %215 : vector<32x32xf32>
    %217 = arith.mulf %216, %216 : vector<32x32xf32>
    %cst_95 = arith.constant dense<0.000000e+00> : vector<32xf32>
    %218 = vector.multi_reduction <add>, %217, %cst_95 [1] : vector<32x32xf32> to vector<32xf32>
    %219 = vector.shape_cast %218 : vector<32xf32> to vector<32x1xf32>
    %cst_96 = arith.constant 3.200000e+01 : f32
    %220 = vector.broadcast %cst_96 : f32 to vector<32x1xf32>
    %221 = arith.divf %219, %220 : vector<32x1xf32>
    %222 = vector.broadcast %214 : vector<32x1xf32> to vector<32x32xf32>
    %223 = arith.subf %206, %222 : vector<32x32xf32>
    %cst_97 = arith.constant 9.99999974E-6 : f32
    %224 = vector.broadcast %cst_97 : f32 to vector<32x1xf32>
    %225 = arith.addf %221, %224 : vector<32x1xf32>
    %226 = math.rsqrt %225 : vector<32x1xf32>
    %227 = vector.broadcast %226 : vector<32x1xf32> to vector<32x32xf32>
    %228 = arith.mulf %223, %227 : vector<32x32xf32>
    %229 = vector.broadcast %208 : vector<1x32xf32> to vector<32x32xf32>
    %230 = arith.mulf %228, %229 : vector<32x32xf32>
    %231 = vector.broadcast %210 : vector<1x32xf32> to vector<32x32xf32>
    %232 = arith.addf %230, %231 : vector<32x32xf32>
    %c0_98 = arith.constant 0 : index
    %c0_99 = arith.constant 0 : index
    %233 = vector.load %arg23[%c0_98, %c0_99] : memref<32x32xf32, #tpu.memory_space<vmem>>, vector<32x32xf32>
    tpu.vector_store %arg23[%c0_98, %c0_99], %232 {strides = array<i32>} : memref<32x32xf32, #tpu.memory_space<vmem>>, vector<32x32xf32>,
    %c1_i32 = arith.constant 1 : i32
    %234 = arith.cmpi eq, %arg0, %c1_i32 : i32
    %235 = arith.extui %234 : i1 to i32
    %c0_i32_100 = arith.constant 0 : i32
    %236 = arith.cmpi ne, %235, %c0_i32_100 : i32
    scf.if %236 {
      %237 = arith.truncf %232 : vector<32x32xf32> to vector<32x32xbf16>
      %c0_101 = arith.constant 0 : index
      %c0_102 = arith.constant 0 : index
      %238 = vector.load %arg20[%c0_101, %c0_102] : memref<32x180xbf16, #tpu.memory_space<vmem>>, vector<32x180xbf16>
      %cst_103 = arith.constant dense<0.000000e+00> : vector<32x180xf32>
      %239 = tpu.matmul %237, %238, %cst_103 {dimension_numbers = #tpu.dot_dimension_numbers<[1], [0], [0], [1], [0, 0, 1, 1], [], []>} : vector<32x32xbf16>, vector<32x180xbf16>, vector<32x180xf32> -> vector<32x180xf32>
      %c0_104 = arith.constant 0 : index
      %c0_105 = arith.constant 0 : index
      %240 = vector.load %arg21[%c0_104, %c0_105] : memref<1x180xf32, #tpu.memory_space<vmem>>, vector<1x180xf32>
      %241 = vector.broadcast %240 : vector<1x180xf32> to vector<32x180xf32>
      %242 = arith.addf %239, %241 : vector<32x180xf32>
      %c0_106 = arith.constant 0 : index
      %c0_107 = arith.constant 0 : index
      %243 = vector.load %arg22[%c0_106, %c0_107] : memref<32x180xf32, #tpu.memory_space<vmem>>, vector<32x180xf32>
      tpu.vector_store %arg22[%c0_106, %c0_107], %242 {strides = array<i32>} : memref<32x180xf32, #tpu.memory_space<vmem>>, vector<32x180xf32>,
    } else {
    }
    return
  }
  func.func @transform_0(%arg0: i32) -> (i32, i32) {
    %c0_i32 = arith.constant 0 : i32
    %c0_i32_0 = arith.constant 0 : i32
    %c0_i32_1 = arith.constant 0 : i32
    return %c0_i32, %c0_i32_0 : i32, i32
  }
  func.func @transform_1(%arg0: i32) -> (i32, i32) {
    %c0_i32 = arith.constant 0 : i32
    %c0_i32_0 = arith.constant 0 : i32
    %c0_i32_1 = arith.constant 0 : i32
    return %c0_i32, %c0_i32_0 : i32, i32
  }
  func.func @transform_2(%arg0: i32) -> (i32, i32) {
    %c0_i32 = arith.constant 0 : i32
    %c0_i32_0 = arith.constant 0 : i32
    %c0_i32_1 = arith.constant 0 : i32
    return %c0_i32, %c0_i32_0 : i32, i32
  }
  func.func @transform_3(%arg0: i32) -> (i32, i32, i32) {
    %c0_i32 = arith.constant 0 : i32
    %c0_i32_0 = arith.constant 0 : i32
    %c0_i32_1 = arith.constant 0 : i32
    return %arg0, %c0_i32, %c0_i32_0 : i32, i32, i32
  }
  func.func @transform_4(%arg0: i32) -> (i32, i32, i32) {
    %c0_i32 = arith.constant 0 : i32
    %c0_i32_0 = arith.constant 0 : i32
    %c0_i32_1 = arith.constant 0 : i32
    return %arg0, %c0_i32, %c0_i32_0 : i32, i32, i32
  }
  func.func @transform_5(%arg0: i32) -> (i32, i32, i32) {
    %c0_i32 = arith.constant 0 : i32
    %c0_i32_0 = arith.constant 0 : i32
    %c0_i32_1 = arith.constant 0 : i32
    return %arg0, %c0_i32, %c0_i32_0 : i32, i32, i32
  }
  func.func @transform_6(%arg0: i32) -> (i32, i32, i32) {
    %c0_i32 = arith.constant 0 : i32
    %c0_i32_0 = arith.constant 0 : i32
    %c0_i32_1 = arith.constant 0 : i32
    return %arg0, %c0_i32, %c0_i32_0 : i32, i32, i32
  }
  func.func @transform_7(%arg0: i32) -> (i32, i32, i32) {
    %c0_i32 = arith.constant 0 : i32
    %c0_i32_0 = arith.constant 0 : i32
    %c0_i32_1 = arith.constant 0 : i32
    return %arg0, %c0_i32, %c0_i32_0 : i32, i32, i32
  }
  func.func @transform_8(%arg0: i32) -> (i32, i32, i32) {
    %c0_i32 = arith.constant 0 : i32
    %c0_i32_0 = arith.constant 0 : i32
    %c0_i32_1 = arith.constant 0 : i32
    return %arg0, %c0_i32, %c0_i32_0 : i32, i32, i32
  }
  func.func @transform_9(%arg0: i32) -> (i32, i32, i32) {
    %c0_i32 = arith.constant 0 : i32
    %c0_i32_0 = arith.constant 0 : i32
    %c0_i32_1 = arith.constant 0 : i32
    return %arg0, %c0_i32, %c0_i32_0 : i32, i32, i32
  }
  func.func @transform_10(%arg0: i32) -> (i32, i32, i32) {
    %c0_i32 = arith.constant 0 : i32
    %c0_i32_0 = arith.constant 0 : i32
    %c0_i32_1 = arith.constant 0 : i32
    return %arg0, %c0_i32, %c0_i32_0 : i32, i32, i32
  }
  func.func @transform_11(%arg0: i32) -> (i32, i32, i32) {
    %c0_i32 = arith.constant 0 : i32
    %c0_i32_0 = arith.constant 0 : i32
    %c0_i32_1 = arith.constant 0 : i32
    return %arg0, %c0_i32, %c0_i32_0 : i32, i32, i32
  }
  func.func @transform_12(%arg0: i32) -> (i32, i32, i32) {
    %c0_i32 = arith.constant 0 : i32
    %c0_i32_0 = arith.constant 0 : i32
    %c0_i32_1 = arith.constant 0 : i32
    return %arg0, %c0_i32, %c0_i32_0 : i32, i32, i32
  }
  func.func @transform_13(%arg0: i32) -> (i32, i32, i32) {
    %c0_i32 = arith.constant 0 : i32
    %c0_i32_0 = arith.constant 0 : i32
    %c0_i32_1 = arith.constant 0 : i32
    return %arg0, %c0_i32, %c0_i32_0 : i32, i32, i32
  }
  func.func @transform_14(%arg0: i32) -> (i32, i32, i32) {
    %c0_i32 = arith.constant 0 : i32
    %c0_i32_0 = arith.constant 0 : i32
    %c0_i32_1 = arith.constant 0 : i32
    return %arg0, %c0_i32, %c0_i32_0 : i32, i32, i32
  }
  func.func @transform_15(%arg0: i32) -> (i32, i32, i32) {
    %c0_i32 = arith.constant 0 : i32
    %c0_i32_0 = arith.constant 0 : i32
    %c0_i32_1 = arith.constant 0 : i32
    return %arg0, %c0_i32, %c0_i32_0 : i32, i32, i32
  }
  func.func @transform_16(%arg0: i32) -> (i32, i32, i32) {
    %c0_i32 = arith.constant 0 : i32
    %c0_i32_0 = arith.constant 0 : i32
    %c0_i32_1 = arith.constant 0 : i32
    return %arg0, %c0_i32, %c0_i32_0 : i32, i32, i32
  }
  func.func @transform_17(%arg0: i32) -> (i32, i32, i32) {
    %c0_i32 = arith.constant 0 : i32
    %c0_i32_0 = arith.constant 0 : i32
    %c0_i32_1 = arith.constant 0 : i32
    return %arg0, %c0_i32, %c0_i32_0 : i32, i32, i32
  }
  func.func @transform_18(%arg0: i32) -> (i32, i32, i32) {
    %c0_i32 = arith.constant 0 : i32
    %c0_i32_0 = arith.constant 0 : i32
    %c0_i32_1 = arith.constant 0 : i32
    return %arg0, %c0_i32, %c0_i32_0 : i32, i32, i32
  }
  func.func @transform_19(%arg0: i32) -> (i32, i32) {
    %c0_i32 = arith.constant 0 : i32
    %c0_i32_0 = arith.constant 0 : i32
    %c0_i32_1 = arith.constant 0 : i32
    return %c0_i32, %c0_i32_0 : i32, i32
  }
  func.func @transform_20(%arg0: i32) -> (i32, i32) {
    %c0_i32 = arith.constant 0 : i32
    %c0_i32_0 = arith.constant 0 : i32
    %c0_i32_1 = arith.constant 0 : i32
    return %c0_i32, %c0_i32_0 : i32, i32
  }
  func.func @transform_21(%arg0: i32) -> (i32, i32) {
    %c0_i32 = arith.constant 0 : i32
    %c0_i32_0 = arith.constant 0 : i32
    %c0_i32_1 = arith.constant 0 : i32
    return %c0_i32, %c0_i32_0 : i32, i32
  }
}

</mosaic_0001>

<bundles_post_ra>
// kernel: detr_forward.4
= control target key start
LH: loop header
LB: loop body
LE: loop exit
PB: predicated region body
PF: predicated region fallthrough
CT: control target
= control target key end

     0   :  { %s264_s6 = smov 0   ;;  %s289_s0 = inlined_call_operand.vmem [shape: f32[8,2,4,2,32], index: 0, kind: input, shape index: {}]   ;;  %s290_s1 = inlined_call_operand.vmem [shape: f32[8,4,32], index: 1, kind: output, shape index: {}]  }
   0x1 LB: > { %s223_s7 = sadd.s32 4294967295, %s252_s6   ;;  %p227_p0 = scmp.ge.s32.totalorder %s252_s6, 1  ;;  %s252_s6 = sphi %s264_s6, %s11_s6  }
   0x2   : > { %p87_p1 = scmp.lt.s32.totalorder %s252_s6, 9 }
   0x4   : > { %p88_p2 = pnand %p227_p0, %p87_p1 }
   0x5   : > { %p106_p3 = scmp.lt.s32.totalorder (!%p88_p2), %s223_s7, 7 }
   0x6   : > { %91 = sbr.rel (%p88_p2) target bundleno = 35 (0x23), region = 24 }
   0xb   : > { %s292_s7 = smov (!%p106_p3, %s223_s7), 7  ;;  %vm128_vm0 = vcmask 254976   ;;  %vm161_vm1 = vcmask 1041409   ;;  %vm163_vm2 = vcmask 1042434   ;;  %vm165_vm3 = vcmask 1043459  }
   0xc   : > { %s237_s8 = sshll.u32 %s292_s7, 4  ;;  %s230_s12 = sshll.u32 %s292_s7, 2  ;;  %vm168_vm4 = vcmask 257024  }
   0xd   : > { %s110_s11 = scalar_lea.vmem %s289_s0, %s237_s8  ;;  %s114_s15 = scalar_lea.vmem %s290_s1, %s230_s12 }
   0xe   : > { %v115_v0 = vld [vmem:[%s110_s11] sm:$0x3]  ;;  %v116_v1 = vld [vmem:[%s110_s11 + $0x2] sm:$0x3]  ;;  %v117_v2 = vld [vmem:[%s110_s11 + $0x4] sm:$0x3] }
   0xf   : > { %v118_v3 = vld [vmem:[%s110_s11 + $0x6] sm:$0x3]  ;;  %v231_v4 = vld [vmem:[%s110_s11 + $0x8] sm:$0x3]  ;;  %v232_v5 = vld [vmem:[%s110_s11 + $0xa] sm:$0x3] }
  0x10   : > { %v233_v6 = vld [vmem:[%s110_s11 + $0xc] sm:$0x3]  ;;  %v234_v7 = vld [vmem:[%s110_s11 + $0xe] sm:$0x3]  ;;  %v124_v8 = vmax.f32 %v115_v0, %v231_v4  ;;  %v125_v9 = vmax.f32 %v116_v1, %v232_v5 }
  0x11   : > { %v126_v10 = vmax.f32 %v117_v2, %v233_v6  ;;  %v127_v11 = vmax.f32 %v118_v3, %v234_v7 }
  0x12   : > { %v129_v12 = vsel %vm128_vm0, %v124_v8, -inf  ;;  %v136_v13 = vsel %vm128_vm0, %v125_v9, -inf }
  0x13   : > { %v130_v14 = vrot.slane %v129_v12, 4  ;;  %v137_v15 = vrot.slane %v136_v13, 4  ;;  %v143_v16 = vsel %vm128_vm0, %v126_v10, -inf  ;;  %v150_v17 = vsel %vm128_vm0, %v127_v11, -inf }
  0x14   : > { %v144_v18 = vrot.slane %v143_v16, 4  ;;  %v151_v19 = vrot.slane %v150_v17, 4 }
  0x15   : > { %v131_v20 = vmax.f32 %v129_v12, %v130_v14  ;;  %v138_v21 = vmax.f32 %v136_v13, %v137_v15 }
  0x16   : > { %v145_v22 = vmax.f32 %v143_v16, %v144_v18  ;;  %v152_v23 = vmax.f32 %v150_v17, %v151_v19 }
  0x17   : > { %v132_v24 = vrot.slane %v131_v20, 2  ;;  %v139_v25 = vrot.slane %v138_v21, 2 }
  0x18   : > { %v146_v26 = vrot.slane %v145_v22, 2  ;;  %v153_v27 = vrot.slane %v152_v23, 2 }
  0x19   : > { %v133_v28 = vmax.f32 %v131_v20, %v132_v24  ;;  %v140_v29 = vmax.f32 %v138_v21, %v139_v25 }
  0x1a   : > { %v147_v30 = vmax.f32 %v145_v22, %v146_v26  ;;  %v154_v31 = vmax.f32 %v152_v23, %v153_v27 }
  0x1b   : > { %v134_v32 = vrot.slane %v133_v28, 1  ;;  %v141_v33 = vrot.slane %v140_v29, 1 }
  0x1c   : > { %v148_v34 = vrot.slane %v147_v30, 1  ;;  %v155_v35 = vrot.slane %v154_v31, 1 }
  0x1d   : > { %v135_v36 = vmax.f32 %v133_v28, %v134_v32  ;;  %v142_v37 = vmax.f32 %v140_v29, %v141_v33 }
  0x1e   : > { %v149_v38 = vmax.f32 %v147_v30, %v148_v34  ;;  %v156_v39 = vmax.f32 %v154_v31, %v155_v35 }
  0x1f   : > { %v162_v40 = vsel %vm161_vm1, %v142_v37, %v135_v36 }
  0x20   : > { %v164_v41 = vsel %vm163_vm2, %v149_v38, %v162_v40 }
  0x21   : > { %v166_v42 = vsel %vm165_vm3, %v156_v39, %v164_v41 }
  0x22   : > { %169 = vst.msk [vmem:[%s114_s15] sm:$0xf] %vm168_vm4, %v166_v42 }
  0x23 PF: > { %s11_s6 = sadd.s32 1, %s252_s6  }
  0x24   : > { %p8_p4 = scmp.ge.s32.totalorder %s11_s6, 10  }
  0x26   :  { %10 = sbr.rel (!%p8_p4) target bundleno = 1 (0x1), region = 55 }

// kernel: detr_forward.3
= control target key start
LH: loop header
LB: loop body
LE: loop exit
PB: predicated region body
PF: predicated region fallthrough
CT: control target
= control target key end

     0   :  { %s2106_s12 = smov 0   ;;  %s3283_s0 = inlined_call_operand.vmem [shape: f32[2,10,10,3], index: 0, kind: input, shape index: {}]   ;;  %s3284_s1 = inlined_call_operand.vmem [shape: f32[27,1,32], index: 1, kind: input, shape index: {}]   ;;  %s3285_s2 = inlined_call_operand.vmem [shape: f32[1,32], index: 2, kind: input, shape index: {}]   ;;  %s3286_s3 = inlined_call_operand.vmem [shape: f32[2,8,8,32], index: 3, kind: output, shape index: {}]  }
   0x1 LB: > { %s1907_s13 = sadd.s32 4294967295, %s2081_s12   ;;  %p1911_p0 = scmp.ge.s32.totalorder %s2081_s12, 1  ;;  %s2081_s12 = sphi %s2106_s12, %s13_s12  }
   0x2   : > { %p137_p1 = scmp.lt.s32.totalorder %s2081_s12, 3 }
   0x4   : > { %p138_p2 = pnand %p1911_p0, %p137_p1 }
   0x6   : > { %141 = sbr.rel (%p138_p2) target bundleno = 655 (0x28f), region = 32 }
   0xb   : > { %p161_p3 = scmp.lt.s32.totalorder %s1907_s13, 1  ;;  %v3289_v0 = vmov 0   ;;  %v3287_v10 = vmov 1   ;;  %v3291_v15 = vmov 2   ;;  %vm1843_vm0 = vcmask 261120  }
   0xc   : > { %2033 = vset.pattern.permute.xlu1 %v3289_v0  ;;  %2032 = vset.pattern.permute.xlu0 %v3289_v0 }
   0xd   : > { %s3503_s13 = smov (!%p161_p3, %s1907_s13), 1 }
   0xe   : > { %s2020_s14 = smul.u32 160, %s3503_s13  ;;  %s2019_s25 = sshll.u32 %s3503_s13, 6 }
   0xf   : > { %s3238_s28 = scalar_lea.vmem %s3286_s3, %s2019_s25 }
  0x10   : > { %s2122_s17 = scalar_lea.vmem %s3283_s0, %s2020_s14 }
  0x11   : > { %v2125_v1 = vld [vmem:[%s2122_s17 + $0x20] sm:$0xff]  ;;  %v2133_v3 = vld [vmem:[%s2122_s17 + $0x30] sm:$0xff] }
  0x12   : > { %v2128_v2 = vld [vmem:[%s2122_s17] sm:$0xff]  ;;  %199 = vperm.xlu1 %2033, %v2125_v1   ;;  %v2136_v4 = vld [vmem:[%s2122_s17 + $0x10] sm:$0xff] }
  0x13   : > { %189 = vperm.xlu0 %2032, %v2128_v2   ;;  %v2141_v5 = vld [vmem:[%s2122_s17 + $0x50] sm:$0xff]  ;;  %v2144_v6 = vld [vmem:[%s2122_s17 + $0x40] sm:$0xff] }
  0x14   : > { %v2149_v7 = vld [vmem:[%s2122_s17 + $0x70] sm:$0xff]  ;;  %v2152_v8 = vld [vmem:[%s2122_s17 + $0x60] sm:$0xff] }
  0x15   : > { %v2157_v9 = vld [vmem:[%s2122_s17 + $0x1] sm:$0xff]  ;;  %v2163_v11 = vld [vmem:[%s2122_s17 + $0x31] sm:$0xff] }
  0x16   : > { %204 = vperm.xlu1 %2033, %v2133_v3   ;;  %v2168_v12 = vld [vmem:[%s2122_s17 + $0x51] sm:$0xff]  ;;  %v2183_v16 = vld [vmem:[%s2122_s17 + $0x42] sm:$0xff] }
  0x17   : > { %194 = vperm.xlu0 %2032, %v2136_v4   ;;  %v2173_v13 = vld [vmem:[%s2122_s17 + $0x71] sm:$0xff]  ;;  %v2188_v17 = vld [vmem:[%s2122_s17 + $0x62] sm:$0xff] }
  0x18   : > { %v2178_v14 = vld [vmem:[%s2122_s17 + $0x12] sm:$0xff]  ;;  %v2202_v19 = vld [vmem:[%s2122_s17 + $0x80] sm:$0xff] }
  0x19   : > { %v2199_v18 = vld [vmem:[%s2122_s17 + $0x11] sm:$0xff]  ;;  %v2208_v20 = vld [vmem:[%s2122_s17 + $0x21] sm:$0xff] }
  0x1a   : > { %214 = vperm.xlu1 %2033, %v2141_v5   ;;  %v2213_v21 = vld [vmem:[%s2122_s17 + $0x41] sm:$0xff]  ;;  %v2249_v25 = vld [vmem:[%s2122_s17 + $0x91] sm:$0xff] }
  0x1b   : > { %209 = vperm.xlu0 %2032, %v2144_v6   ;;  %v2218_v22 = vld [vmem:[%s2122_s17 + $0x61] sm:$0xff]  ;;  %v2256_v27 = vld [vmem:[%s2122_s17 + $0x32] sm:$0xff] }
  0x1c   : > { %v2230_v23 = vld [vmem:[%s2122_s17 + $0x82] sm:$0xff]  ;;  %v2262_v28 = vld [vmem:[%s2122_s17 + $0x52] sm:$0xff] }
  0x1d   : > { %v545_v24 = vld [vmem:[%s2122_s17 + $0x2] sm:$0xff]  ;;  %v2271_v31 = vld [vmem:[%s2122_s17 + $0x72] sm:$0xff] }
  0x1e   : > { %224 = vperm.xlu1 %2033, %v2149_v7   ;;  %v2252_v26 = vld [vmem:[%s2122_s17 + $0x22] sm:$0xff] }
  0x1f   : > { %219 = vperm.xlu0 %2032, %v2152_v8  }
  0x22   : > { %2034 = vset.pattern.permute.xlu1 %v3287_v10 }
  0x23   : > { %373 = vperm.xlu0 %2032, %v2157_v9   ;;  %256 = vperm.xlu1 %2034, %v2136_v4  }
  0x27   : > { %388 = vperm.xlu0 %2032, %v2163_v11   ;;  %260 = vperm.xlu1 %2034, %v2125_v1  }
  0x2b   : > { %398 = vperm.xlu0 %2032, %v2168_v12   ;;  %268 = vperm.xlu1 %2034, %v2144_v6  }
  0x2f   : > { %408 = vperm.xlu0 %2032, %v2173_v13   ;;  %276 = vperm.xlu1 %2034, %v2152_v8  }
  0x33   : > { %562 = vperm.xlu0 %2032, %v2178_v14   ;;  %2035 = vset.pattern.permute.xlu1 %v3291_v15 }
  0x34   : > { %308 = vperm.xlu1 %2035, %v2128_v2  }
  0x37   : > { %577 = vperm.xlu0 %2032, %v2183_v16  }
  0x38   : > { %316 = vperm.xlu1 %2035, %v2125_v1  }
  0x3b   : > { %587 = vperm.xlu0 %2032, %v2188_v17  }
  0x3c   : > { %320 = vperm.xlu1 %2035, %v2133_v3  }
  0x3f   : > { %742 = vperm.xlu0 %2032, %v2136_v4  }
  0x40   : > { %328 = vperm.xlu1 %2035, %v2141_v5  }
  0x43   : > { %757 = vperm.xlu0 %2032, %v2144_v6  }
  0x44   : > { %336 = vperm.xlu1 %2035, %v2149_v7  }
  0x47   : > { %767 = vperm.xlu0 %2032, %v2152_v8  }
  0x48   : > { %2036 = vset.pattern.permute.xlu1 %v3289_v0 }
  0x49   : > { %378 = vperm.xlu1 %2036, %v2199_v18  }
  0x4b   : > { %777 = vperm.xlu0 %2032, %v2202_v19  }
  0x4d   : > { %383 = vperm.xlu1 %2036, %v2208_v20  }
  0x4f   : > { %931 = vperm.xlu0 %2032, %v2208_v20  }
  0x51   : > { %393 = vperm.xlu1 %2036, %v2213_v21  }
  0x53   : > { %946 = vperm.xlu0 %2032, %v2168_v12  }
  0x55   : > { %403 = vperm.xlu1 %2036, %v2218_v22  }
  0x57   : > { %956 = vperm.xlu0 %2032, %v2173_v13  }
  0x59   : > { %2037 = vset.pattern.permute.xlu1 %v3287_v10 }
  0x5a   : > { %436 = vperm.xlu1 %2037, %v2157_v9  }
  0x5b   : > { %1110 = vperm.xlu0 %2032, %v2178_v14  }
  0x5e   : > { %444 = vperm.xlu1 %2037, %v2208_v20  }
  0x5f   : > { %1125 = vperm.xlu0 %2032, %v2183_v16  }
  0x62   : > { %448 = vperm.xlu1 %2037, %v2163_v11  }
  0x63   : > { %1135 = vperm.xlu0 %2032, %v2188_v17  }
  0x66   : > { %456 = vperm.xlu1 %2037, %v2168_v12  }
  0x67   : > { %1145 = vperm.xlu0 %2032, %v2230_v23  }
  0x6a   : > { %464 = vperm.xlu1 %2037, %v2173_v13  }
  0x6b   : > { %1300 = vperm.xlu0 %2032, %v2133_v3  }
  0x6e   : > { %2038 = vset.pattern.permute.xlu1 %v3291_v15 }
  0x6f   : > { %1315 = vperm.xlu0 %2032, %v2152_v8   ;;  %496 = vperm.xlu1 %2038, %v2199_v18  }
  0x73   : > { %1325 = vperm.xlu0 %2032, %v2202_v19   ;;  %500 = vperm.xlu1 %2038, %v2208_v20  }
  0x77   : > { %1479 = vperm.xlu0 %2032, %v2208_v20   ;;  %508 = vperm.xlu1 %2038, %v2213_v21  }
  0x7b   : > { %1494 = vperm.xlu0 %2032, %v2168_v12   ;;  %516 = vperm.xlu1 %2038, %v2218_v22  }
  0x7f   : > { %1504 = vperm.xlu0 %2032, %v2173_v13   ;;  %2039 = vset.pattern.permute.xlu1 %v3289_v0 }
  0x80   : > { %557 = vperm.xlu1 %2039, %v545_v24  }
  0x83   : > { %1514 = vperm.xlu0 %2032, %v2249_v25  }
  0x84   : > { %567 = vperm.xlu1 %2039, %v2252_v26  }
  0x87   : > { %1668 = vperm.xlu0 %2032, %v2256_v27  }
  0x88   : > { %572 = vperm.xlu1 %2039, %v2256_v27  }
  0x8b   : > { %1683 = vperm.xlu0 %2032, %v2188_v17  }
  0x8c   : > { %582 = vperm.xlu1 %2039, %v2262_v28  }
  0x8d   : > { %v2266_v29 = vpop.permute.xlu1 %199 }
  0x8e   : > { %v2268_v30 = vpop.permute.xlu0 %189 }
  0x8f   : > { %1693 = vperm.xlu0 %2032, %v2230_v23  }
  0x90   : > { %592 = vperm.xlu1 %2039, %v2271_v31  }
  0x91   : > { %v2275_v32 = vpop.permute.xlu1 %204 }
  0x92   : > { %v2277_v33 = vpop.permute.xlu0 %194 }
  0x93   : > { %2058 = vset.pattern.permute.xlu0 %v3287_v10 }
  0x94   : > { %252 = vperm.xlu0 %2058, %v2128_v2   ;;  %2040 = vset.pattern.permute.xlu1 %v3287_v10 }
  0x95   : > { %v2282_v34 = vpop.permute.xlu1 %214  ;;  %624 = vperm.xlu1 %2040, %v2178_v14  }
  0x96   : > { %v2285_v35 = vpop.permute.xlu0 %209 }
  0x98   : > { %264 = vperm.xlu0 %2058, %v2133_v3  }
  0x99   : > { %v2288_v36 = vpop.permute.xlu1 %224  ;;  %628 = vperm.xlu1 %2040, %v2252_v26  }
  0x9a   : > { %v2291_v37 = vpop.permute.xlu0 %219 }
  0x9c   : > { %272 = vperm.xlu0 %2058, %v2141_v5  }
  0x9d   : > { %636 = vperm.xlu1 %2040, %v2183_v16  }
  0x9e   : > { %v2295_v38 = vpop.permute.xlu0 %373  ;;  %v2297_v39 = vpop.permute.xlu1 %256 }
  0xa0   : > { %280 = vperm.xlu0 %2058, %v2149_v7  }
  0xa1   : > { %644 = vperm.xlu1 %2040, %v2188_v17  }
  0xa2   : > { %v2301_v40 = vpop.permute.xlu0 %388  ;;  %v2303_v41 = vpop.permute.xlu1 %260 }
  0xa4   : > { %440 = vperm.xlu0 %2058, %v2199_v18  }
  0xa5   : > { %2041 = vset.pattern.permute.xlu1 %v3291_v15 }
  0xa6   : > { %v2307_v42 = vpop.permute.xlu0 %398  ;;  %v2309_v43 = vpop.permute.xlu1 %268  ;;  %676 = vperm.xlu1 %2041, %v545_v24  }
  0xa8   : > { %452 = vperm.xlu0 %2058, %v2213_v21  }
  0xaa   : > { %v2312_v44 = vpop.permute.xlu0 %408  ;;  %v2314_v45 = vpop.permute.xlu1 %276  ;;  %684 = vperm.xlu1 %2041, %v2252_v26  }
  0xac   : > { %460 = vperm.xlu0 %2058, %v2218_v22  }
  0xae   : > { %v2318_v46 = vpop.permute.xlu0 %562  ;;  %688 = vperm.xlu1 %2041, %v2256_v27  }
  0xaf   : > { %v2321_v47 = vpop.permute.xlu1 %308 }
  0xb0   : > { %620 = vperm.xlu0 %2058, %v545_v24   ;;  %v2378_v24 = vld [vmem:[%s2122_s17 + $0x81] sm:$0xff] }
  0xb1   : > { %3308 = vst [vmem:[#allocation11_spill] sm:$0xff] %v2378_v24 }
  0xb2   : > { %v2323_v48 = vpop.permute.xlu0 %577  ;;  %696 = vperm.xlu1 %2041, %v2262_v28  }
  0xb3   : > { %v2326_v49 = vpop.permute.xlu1 %316 }
  0xb4   : > { %632 = vperm.xlu0 %2058, %v2256_v27  }
  0xb6   : > { %v2329_v50 = vpop.permute.xlu0 %587  ;;  %704 = vperm.xlu1 %2041, %v2271_v31  }
  0xb7   : > { %v2332_v51 = vpop.permute.xlu1 %320 }
  0xb8   : > { %640 = vperm.xlu0 %2058, %v2262_v28  }
  0xba   : > { %v2335_v52 = vpop.permute.xlu0 %742  ;;  %2042 = vset.pattern.permute.xlu1 %v3289_v0 }
  0xbb   : > { %747 = vperm.xlu1 %2042, %v2125_v1   ;;  %v2339_v53 = vpop.permute.xlu1 %328 }
  0xbc   : > { %648 = vperm.xlu0 %2058, %v2271_v31  }
  0xbe   : > { %v2342_v54 = vpop.permute.xlu0 %757 }
  0xbf   : > { %752 = vperm.xlu1 %2042, %v2133_v3   ;;  %v2345_v55 = vpop.permute.xlu1 %336 }
  0xc0   : > { %3299 = vst [vmem:[#allocation2_spill] sm:$0xff] %v2345_v55  ;;  %809 = vperm.xlu0 %2058, %v2125_v1  }
  0xc2   : > { %v2348_v56 = vpop.permute.xlu0 %767 }
  0xc3   : > { %3300 = vst [vmem:[#allocation3_spill] sm:$0xff] %v2348_v56  ;;  %762 = vperm.xlu1 %2042, %v2141_v5  }
  0xc4   : > { %821 = vperm.xlu0 %2058, %v2141_v5   ;;  %v2352_v57 = vpop.permute.xlu1 %378 }
  0xc5   : > { %3301 = vst [vmem:[#allocation4_spill] sm:$0xff] %v2352_v57 }
  0xc6   : > { %v2354_v58 = vpop.permute.xlu0 %777 }
  0xc7   : > { %3302 = vst [vmem:[#allocation5_spill] sm:$0xff] %v2354_v58  ;;  %772 = vperm.xlu1 %2042, %v2149_v7  }
  0xc8   : > { %829 = vperm.xlu0 %2058, %v2149_v7   ;;  %v2358_v59 = vpop.permute.xlu1 %383 }
  0xca   : > { %v2360_v60 = vpop.permute.xlu0 %931 }
  0xcb   : > { %3303 = vst [vmem:[#allocation6_spill] sm:$0xff] %v2360_v60  ;;  %2043 = vset.pattern.permute.xlu1 %v3287_v10 }
  0xcc   : > { %989 = vperm.xlu0 %2058, %v2199_v18   ;;  %805 = vperm.xlu1 %2043, %v2136_v4   ;;  %v2365_v61 = vpop.permute.xlu1 %393 }
  0xcd   : > { %3304 = vst [vmem:[#allocation7_spill] sm:$0xff] %v2365_v61 }
  0xce   : > { %v2367_v62 = vpop.permute.xlu0 %946 }
  0xcf   : > { %3305 = vst [vmem:[#allocation8_spill] sm:$0xff] %v2367_v62 }
  0xd0   : > { %1001 = vperm.xlu0 %2058, %v2213_v21   ;;  %813 = vperm.xlu1 %2043, %v2133_v3   ;;  %v2371_v63 = vpop.permute.xlu1 %403 }
  0xd1   : > { %3306 = vst [vmem:[#allocation9_spill] sm:$0xff] %v2371_v63 }
  0xd2   : > { %v2373_v2 = vpop.permute.xlu0 %956 }
  0xd3   : > { %3307 = vst [vmem:[#allocation10_spill] sm:$0xff] %v2373_v2 }
  0xd4   : > { %1009 = vperm.xlu0 %2058, %v2218_v22   ;;  %817 = vperm.xlu1 %2043, %v2144_v6  }
  0xd5   : > { %v2380_v10 = vpop.permute.xlu1 %436 }
  0xd6   : > { %3309 = vst [vmem:[#allocation12_spill] sm:$0xff] %v2380_v10  ;;  %v2382_v0 = vpop.permute.xlu0 %1110  ;;  %v3315_v10 = vmov 2  }
  0xd7   : > { %3310 = vst [vmem:[#allocation13_spill] sm:$0xff] %v2382_v0 }
  0xd8   : > { %1017 = vperm.xlu0 %2058, %v2378_v24   ;;  %825 = vperm.xlu1 %2043, %v2152_v8  }
  0xd9   : > { %v2386_v15 = vpop.permute.xlu1 %444 }
  0xda   : > { %3311 = vst [vmem:[#allocation14_spill] sm:$0xff] %v2386_v15  ;;  %v2388_v62 = vpop.permute.xlu0 %1125 }
  0xdb   : > { %3312 = vst [vmem:[#allocation15_spill] sm:$0xff] %v2388_v62 }
  0xdc   : > { %1177 = vperm.xlu0 %2058, %v2252_v26   ;;  %833 = vperm.xlu1 %2043, %v2202_v19  }
  0xdd   : > { %v2392_v2 = vpop.permute.xlu1 %448 }
  0xde   : > { %3313 = vst [vmem:[#allocation16_spill] sm:$0xff] %v2392_v2  ;;  %v2394_v63 = vpop.permute.xlu0 %1135 }
  0xdf   : > { %3314 = vst [vmem:[#allocation17_spill] sm:$0xff] %v2394_v63 }
  0xe0   : > { %1189 = vperm.xlu0 %2058, %v2262_v28   ;;  %2044 = vset.pattern.permute.xlu1 %v3315_v10 }
  0xe1   : > { %865 = vperm.xlu1 %2044, %v2125_v1   ;;  %v2399_v0 = vpop.permute.xlu1 %456 }
  0xe2   : > { %3316 = vst [vmem:[#allocation18_spill] sm:$0xff] %v2399_v0  ;;  %v2401_v61 = vpop.permute.xlu0 %1145 }
  0xe3   : > { %3317 = vst [vmem:[#allocation19_spill] sm:$0xff] %v2401_v61 }
  0xe4   : > { %1197 = vperm.xlu0 %2058, %v2271_v31  }
  0xe5   : > { %869 = vperm.xlu1 %2044, %v2133_v3   ;;  %v2405_v62 = vpop.permute.xlu1 %464 }
  0xe6   : > { %3318 = vst [vmem:[#allocation20_spill] sm:$0xff] %v2405_v62  ;;  %v2407_v2 = vpop.permute.xlu0 %1300  ;;  %v2423_v62 = vld [vmem:[%s2122_s17 + $0x90] sm:$0xff] }
  0xe7   : > { %3319 = vst [vmem:[#allocation21_spill] sm:$0xff] %v2407_v2  ;;  %v3324_v2 = vmov 0  }
  0xe8   : > { %1358 = vperm.xlu0 %2058, %v2125_v1  }
  0xe9   : > { %877 = vperm.xlu1 %2044, %v2141_v5  }
  0xea   : > { %v2411_v63 = vpop.permute.xlu0 %1315  ;;  %v2413_v60 = vpop.permute.xlu1 %496 }
  0xeb   : > { %3320 = vst [vmem:[#allocation22_spill] sm:$0xff] %v2411_v63  ;;  %3321 = vst [vmem:[#allocation23_spill] sm:$0xff] %v2413_v60 }
  0xec   : > { %1370 = vperm.xlu0 %2058, %v2141_v5  }
  0xed   : > { %885 = vperm.xlu1 %2044, %v2149_v7  }
  0xee   : > { %v2417_v61 = vpop.permute.xlu0 %1325  ;;  %v2419_v0 = vpop.permute.xlu1 %500 }
  0xef   : > { %3322 = vst [vmem:[#allocation24_spill] sm:$0xff] %v2417_v61  ;;  %3323 = vst [vmem:[#allocation25_spill] sm:$0xff] %v2419_v0 }
  0xf0   : > { %1378 = vperm.xlu0 %2058, %v2149_v7  }
  0xf1   : > { %2045 = vset.pattern.permute.xlu1 %v3324_v2 }
  0xf2   : > { %v2426_v15 = vpop.permute.xlu0 %1479  ;;  %926 = vperm.xlu1 %2045, %v2199_v18   ;;  %v2429_v63 = vpop.permute.xlu1 %508 }
  0xf3   : > { %3325 = vst [vmem:[#allocation26_spill] sm:$0xff] %v2426_v15  ;;  %3326 = vst [vmem:[#allocation27_spill] sm:$0xff] %v2429_v63 }
  0xf4   : > { %1386 = vperm.xlu0 %2058, %v2423_v62  }
  0xf6   : > { %v2432_v60 = vpop.permute.xlu0 %1494  ;;  %936 = vperm.xlu1 %2045, %v2163_v11   ;;  %v2435_v61 = vpop.permute.xlu1 %516 }
  0xf7   : > { %3327 = vst [vmem:[#allocation28_spill] sm:$0xff] %v2432_v60  ;;  %3328 = vst [vmem:[#allocation29_spill] sm:$0xff] %v2435_v61 }
  0xf8   : > { %1546 = vperm.xlu0 %2058, %v2163_v11  }
  0xfa   : > { %v2438_v0 = vpop.permute.xlu0 %1504  ;;  %941 = vperm.xlu1 %2045, %v2213_v21  }
  0xfb   : > { %3329 = vst [vmem:[#allocation30_spill] sm:$0xff] %v2438_v0  ;;  %v2441_v58 = vpop.permute.xlu1 %557 }
  0xfc   : > { %3330 = vst [vmem:[#allocation31_spill] sm:$0xff] %v2441_v58  ;;  %1558 = vperm.xlu0 %2058, %v2218_v22   ;;  %v3336_v58 = vmov 1  }
  0xfe   : > { %v2444_v15 = vpop.permute.xlu0 %1514  ;;  %951 = vperm.xlu1 %2045, %v2218_v22  }
  0xff   : > { %3331 = vst [vmem:[#allocation32_spill] sm:$0xff] %v2444_v15  ;;  %v2447_v60 = vpop.permute.xlu1 %567 }
 0x100   : > { %3332 = vst [vmem:[#allocation33_spill] sm:$0xff] %v2447_v60  ;;  %1566 = vperm.xlu0 %2058, %v2378_v24  }
 0x102   : > { %v2450_v61 = vpop.permute.xlu0 %1668  ;;  %961 = vperm.xlu1 %2045, %v2378_v24  }
 0x103   : > { %3333 = vst [vmem:[#allocation34_spill] sm:$0xff] %v2450_v61  ;;  %v2453_v0 = vpop.permute.xlu1 %572 }
 0x104   : > { %3334 = vst [vmem:[#allocation35_spill] sm:$0xff] %v2453_v0  ;;  %1726 = vperm.xlu0 %2058, %v2252_v26   ;;  %v2470_v0 = vld [vmem:[%s2122_s17 + $0x92] sm:$0xff] }
 0x105   : > { %3340 = vst [vmem:[#allocation40_spill] sm:$0xff] %v2470_v0 }
 0x106   : > { %v2456_v63 = vpop.permute.xlu0 %1683  ;;  %2046 = vset.pattern.permute.xlu1 %v3336_v58 }
 0x107   : > { %3335 = vst [vmem:[#allocation36_spill] sm:$0xff] %v2456_v63  ;;  %993 = vperm.xlu1 %2046, %v2208_v20   ;;  %v2460_v15 = vpop.permute.xlu1 %582 }
 0x108   : > { %3337 = vst [vmem:[#allocation37_spill] sm:$0xff] %v2460_v15  ;;  %1738 = vperm.xlu0 %2058, %v2262_v28  }
 0x10a   : > { %v2463_v60 = vpop.permute.xlu0 %1693 }
 0x10b   : > { %3338 = vst [vmem:[#allocation38_spill] sm:$0xff] %v2463_v60  ;;  %997 = vperm.xlu1 %2046, %v2163_v11   ;;  %v2466_v61 = vpop.permute.xlu1 %592 }
 0x10c   : > { %3339 = vst [vmem:[#allocation39_spill] sm:$0xff] %v2466_v61  ;;  %1746 = vperm.xlu0 %2058, %v2271_v31  }
 0x10f   : > { %v2472_v57 = vpop.permute.xlu0 %252  ;;  %1005 = vperm.xlu1 %2046, %v2168_v12  }
 0x110   : > { %1754 = vperm.xlu0 %2058, %v2470_v0   ;;  %v2476_v63 = vpop.permute.xlu1 %624 }
 0x111   : > { %3341 = vst [vmem:[#allocation41_spill] sm:$0xff] %v2476_v63 }
 0x113   : > { %v2478_v15 = vpop.permute.xlu0 %264  ;;  %1013 = vperm.xlu1 %2046, %v2173_v13  }
 0x114   : > { %2060 = vset.pattern.permute.xlu0 %v3315_v10  ;;  %v2482_v60 = vpop.permute.xlu1 %628 }
 0x115   : > { %3342 = vst [vmem:[#allocation42_spill] sm:$0xff] %v2482_v60  ;;  %312 = vperm.xlu0 %2060, %v2136_v4  }
 0x117   : > { %v2485_v61 = vpop.permute.xlu0 %272  ;;  %2047 = vset.pattern.permute.xlu1 %v3315_v10 }
 0x118   : > { %1045 = vperm.xlu1 %2047, %v2199_v18   ;;  %v2489_v56 = vpop.permute.xlu1 %636 }
 0x119   : > { %3343 = vst [vmem:[#allocation43_spill] sm:$0xff] %v2489_v56  ;;  %324 = vperm.xlu0 %2060, %v2144_v6  }
 0x11b   : > { %v2492_v0 = vpop.permute.xlu0 %280 }
 0x11c   : > { %3344 = vst [vmem:[#allocation44_spill] sm:$0xff] %v2492_v0  ;;  %1053 = vperm.xlu1 %2047, %v2163_v11   ;;  %v2495_v63 = vpop.permute.xlu1 %644 }
 0x11d   : > { %3345 = vst [vmem:[#allocation45_spill] sm:$0xff] %v2495_v63  ;;  %332 = vperm.xlu0 %2060, %v2152_v8  }
 0x11f   : > { %v2498_v60 = vpop.permute.xlu0 %440 }
 0x120   : > { %1057 = vperm.xlu1 %2047, %v2213_v21  }
 0x121   : > { %492 = vperm.xlu0 %2060, %v2157_v9   ;;  %v2502_v55 = vpop.permute.xlu1 %676 }
 0x122   : > { %3346 = vst [vmem:[#allocation46_spill] sm:$0xff] %v2502_v55 }
 0x123   : > { %v2504_v18 = vpop.permute.xlu0 %452 }
 0x124   : > { %1065 = vperm.xlu1 %2047, %v2218_v22  }
 0x125   : > { %504 = vperm.xlu0 %2060, %v2163_v11   ;;  %v2508_v56 = vpop.permute.xlu1 %684 }
 0x126   : > { %3347 = vst [vmem:[#allocation47_spill] sm:$0xff] %v2508_v56 }
 0x127   : > { %v2510_v0 = vpop.permute.xlu0 %460 }
 0x128   : > { %3348 = vst [vmem:[#allocation48_spill] sm:$0xff] %v2510_v0  ;;  %1073 = vperm.xlu1 %2047, %v2378_v24  }
 0x129   : > { %512 = vperm.xlu0 %2060, %v2168_v12   ;;  %v2514_v63 = vpop.permute.xlu1 %688 }
 0x12a   : > { %3349 = vst [vmem:[#allocation49_spill] sm:$0xff] %v2514_v63 }
 0x12b   : > { %v2516_v21 = vpop.permute.xlu0 %620 }
 0x12c   : > { %2048 = vset.pattern.permute.xlu1 %v3324_v2 }
 0x12d   : > { %520 = vperm.xlu0 %2060, %v2173_v13   ;;  %1115 = vperm.xlu1 %2048, %v2252_v26   ;;  %v2521_v9 = vpop.permute.xlu1 %696 }
 0x12e   : > { %3350 = vst [vmem:[#allocation50_spill] sm:$0xff] %v2521_v9 }
 0x12f   : > { %v2523_v55 = vpop.permute.xlu0 %632 }
 0x130   : > { %3351 = vst [vmem:[#allocation51_spill] sm:$0xff] %v2523_v55 }
 0x131   : > { %680 = vperm.xlu0 %2060, %v2178_v14   ;;  %1120 = vperm.xlu1 %2048, %v2256_v27   ;;  %v2527_v56 = vpop.permute.xlu1 %704 }
 0x132   : > { %3352 = vst [vmem:[#allocation52_spill] sm:$0xff] %v2527_v56 }
 0x133   : > { %v2529_v24 = vpop.permute.xlu0 %640 }
 0x134   : > { %3353 = vst [vmem:[#allocation53_spill] sm:$0xff] %v2529_v24 }
 0x135   : > { %692 = vperm.xlu0 %2060, %v2183_v16   ;;  %1130 = vperm.xlu1 %2048, %v2262_v28  }
 0x136   : > { %v2533_v63 = vpop.permute.xlu1 %747 }
 0x137   : > { %3354 = vst [vmem:[#allocation54_spill] sm:$0xff] %v2533_v63  ;;  %v2535_v0 = vpop.permute.xlu0 %648 }
 0x138   : > { %3355 = vst [vmem:[#allocation55_spill] sm:$0xff] %v2535_v0 }
 0x139   : > { %700 = vperm.xlu0 %2060, %v2188_v17   ;;  %1140 = vperm.xlu1 %2048, %v2271_v31  }
 0x13a   : > { %v2539_v9 = vpop.permute.xlu1 %752 }
 0x13b   : > { %v2541_v55 = vpop.permute.xlu0 %809 }
 0x13c   : > { %3356 = vst [vmem:[#allocation56_spill] sm:$0xff] %v2541_v55 }
 0x13d   : > { %861 = vperm.xlu0 %2060, %v2136_v4   ;;  %2049 = vset.pattern.permute.xlu1 %v3336_v58 }
 0x13e   : > { %1173 = vperm.xlu1 %2049, %v2178_v14   ;;  %v2546_v56 = vpop.permute.xlu1 %762 }
 0x13f   : > { %3357 = vst [vmem:[#allocation57_spill] sm:$0xff] %v2546_v56  ;;  %v2548_v24 = vpop.permute.xlu0 %821 }
 0x140   : > { %3358 = vst [vmem:[#allocation58_spill] sm:$0xff] %v2548_v24 }
 0x141   : > { %873 = vperm.xlu0 %2060, %v2144_v6  }
 0x142   : > { %1181 = vperm.xlu1 %2049, %v2256_v27   ;;  %v2552_v0 = vpop.permute.xlu1 %772 }
 0x143   : > { %3359 = vst [vmem:[#allocation59_spill] sm:$0xff] %v2552_v0  ;;  %v2554_v63 = vpop.permute.xlu0 %829 }
 0x144   : > { %3360 = vst [vmem:[#allocation60_spill] sm:$0xff] %v2554_v63 }
 0x145   : > { %881 = vperm.xlu0 %2060, %v2152_v8  }
 0x146   : > { %1185 = vperm.xlu1 %2049, %v2183_v16  }
 0x147   : > { %v2558_v4 = vpop.permute.xlu0 %989  ;;  %v2560_v55 = vpop.permute.xlu1 %805 }
 0x148   : > { %3361 = vst [vmem:[#allocation61_spill] sm:$0xff] %v2558_v4  ;;  %3362 = vst [vmem:[#allocation62_spill] sm:$0xff] %v2560_v55 }
 0x149   : > { %889 = vperm.xlu0 %2060, %v2202_v19  }
 0x14a   : > { %1193 = vperm.xlu1 %2049, %v2188_v17  }
 0x14b   : > { %v2564_v24 = vpop.permute.xlu0 %1001  ;;  %v2566_v56 = vpop.permute.xlu1 %813 }
 0x14c   : > { %3363 = vst [vmem:[#allocation63_spill] sm:$0xff] %v2564_v24  ;;  %3364 = vst [vmem:[#allocation64_spill] sm:$0xff] %v2566_v56 }
 0x14d   : > { %1049 = vperm.xlu0 %2060, %v2208_v20  }
 0x14e   : > { %1201 = vperm.xlu1 %2049, %v2230_v23  }
 0x14f   : > { %v2570_v63 = vpop.permute.xlu0 %1009  ;;  %v2572_v0 = vpop.permute.xlu1 %817 }
 0x150   : > { %3365 = vst [vmem:[#allocation65_spill] sm:$0xff] %v2570_v63  ;;  %3366 = vst [vmem:[#allocation66_spill] sm:$0xff] %v2572_v0 }
 0x151   : > { %1061 = vperm.xlu0 %2060, %v2168_v12  }
 0x152   : > { %2050 = vset.pattern.permute.xlu1 %v3315_v10 }
 0x153   : > { %v2576_v4 = vpop.permute.xlu0 %1017  ;;  %1233 = vperm.xlu1 %2050, %v2252_v26   ;;  %v2579_v55 = vpop.permute.xlu1 %825 }
 0x154   : > { %3367 = vst [vmem:[#allocation67_spill] sm:$0xff] %v2576_v4 }
 0x155   : > { %1069 = vperm.xlu0 %2060, %v2173_v13  }
 0x157   : > { %v2582_v24 = vpop.permute.xlu0 %1177  ;;  %1237 = vperm.xlu1 %2050, %v2256_v27   ;;  %v2585_v56 = vpop.permute.xlu1 %833 }
 0x158   : > { %3368 = vst [vmem:[#allocation68_spill] sm:$0xff] %v2582_v24  ;;  %3369 = vst [vmem:[#allocation69_spill] sm:$0xff] %v2585_v56 }
 0x159   : > { %1229 = vperm.xlu0 %2060, %v2178_v14  }
 0x15b   : > { %v2588_v63 = vpop.permute.xlu0 %1189  ;;  %1245 = vperm.xlu1 %2050, %v2262_v28  }
 0x15c   : > { %3370 = vst [vmem:[#allocation70_spill] sm:$0xff] %v2588_v63  ;;  %v2591_v0 = vpop.permute.xlu1 %865 }
 0x15d   : > { %1241 = vperm.xlu0 %2060, %v2183_v16  }
 0x15f   : > { %v2594_v26 = vpop.permute.xlu0 %1197  ;;  %1253 = vperm.xlu1 %2050, %v2271_v31  }
 0x160   : > { %3371 = vst [vmem:[#allocation71_spill] sm:$0xff] %v2594_v26  ;;  %v2597_v4 = vpop.permute.xlu1 %869 }
 0x161   : > { %1249 = vperm.xlu0 %2060, %v2188_v17  }
 0x163   : > { %v2600_v24 = vpop.permute.xlu0 %1358  ;;  %2051 = vset.pattern.permute.xlu1 %v3324_v2 }
 0x164   : > { %3372 = vst [vmem:[#allocation72_spill] sm:$0xff] %v2600_v24  ;;  %1295 = vperm.xlu1 %2051, %v2125_v1   ;;  %v2604_v14 = vpop.permute.xlu1 %877 }
 0x165   : > { %3373 = vst [vmem:[#allocation73_spill] sm:$0xff] %v2604_v14  ;;  %1257 = vperm.xlu0 %2060, %v2230_v23  }
 0x167   : > { %v2607_v28 = vpop.permute.xlu0 %1370 }
 0x168   : > { %3374 = vst [vmem:[#allocation74_spill] sm:$0xff] %v2607_v28  ;;  %1305 = vperm.xlu1 %2051, %v2144_v6   ;;  %v2610_v16 = vpop.permute.xlu1 %885 }
 0x169   : > { %3375 = vst [vmem:[#allocation75_spill] sm:$0xff] %v2610_v16  ;;  %1418 = vperm.xlu0 %2060, %v2133_v3  }
 0x16b   : > { %v2613_v31 = vpop.permute.xlu0 %1378 }
 0x16c   : > { %3376 = vst [vmem:[#allocation76_spill] sm:$0xff] %v2613_v31  ;;  %1310 = vperm.xlu1 %2051, %v2141_v5  }
 0x16d   : > { %1430 = vperm.xlu0 %2060, %v2152_v8   ;;  %v2617_v24 = vpop.permute.xlu1 %926 }
 0x16f   : > { %v2619_v26 = vpop.permute.xlu0 %1386 }
 0x170   : > { %3377 = vst [vmem:[#allocation77_spill] sm:$0xff] %v2619_v26  ;;  %1320 = vperm.xlu1 %2051, %v2149_v7  }
 0x171   : > { %1438 = vperm.xlu0 %2060, %v2202_v19   ;;  %v2623_v28 = vpop.permute.xlu1 %936 }
 0x172   : > { %3378 = vst [vmem:[#allocation78_spill] sm:$0xff] %v2623_v28 }
 0x173   : > { %v2625_v63 = vpop.permute.xlu0 %1546 }
 0x174   : > { %3379 = vst [vmem:[#allocation79_spill] sm:$0xff] %v2625_v63  ;;  %1330 = vperm.xlu1 %2051, %v2423_v62  }
 0x175   : > { %1598 = vperm.xlu0 %2060, %v2208_v20   ;;  %v2629_v31 = vpop.permute.xlu1 %941 }
 0x177   : > { %v2631_v16 = vpop.permute.xlu0 %1558 }
 0x178   : > { %3380 = vst [vmem:[#allocation80_spill] sm:$0xff] %v2631_v16  ;;  %2052 = vset.pattern.permute.xlu1 %v3336_v58 }
 0x179   : > { %1610 = vperm.xlu0 %2060, %v2168_v12   ;;  %1362 = vperm.xlu1 %2052, %v2133_v3   ;;  %v2636_v26 = vpop.permute.xlu1 %951 }
 0x17a   : > { %3381 = vst [vmem:[#allocation81_spill] sm:$0xff] %v2636_v26  ;;  %v3406_v26 = vld [vmem:[#allocation8_spill] sm:$0xff] }
 0x17b   : > { %v2638_v14 = vpop.permute.xlu0 %1566 }
 0x17c   : > { %3382 = vst [vmem:[#allocation82_spill] sm:$0xff] %v2638_v14 }
 0x17d   : > { %1618 = vperm.xlu0 %2060, %v2173_v13   ;;  %1366 = vperm.xlu1 %2052, %v2144_v6   ;;  %v2642_v63 = vpop.permute.xlu1 %961 }
 0x17e   : > { %3383 = vst [vmem:[#allocation83_spill] sm:$0xff] %v2642_v63 }
 0x17f   : > { %v2644_v28 = vpop.permute.xlu0 %1726 }
 0x180   : > { %3384 = vst [vmem:[#allocation84_spill] sm:$0xff] %v2644_v28 }
 0x181   : > { %1626 = vperm.xlu0 %2060, %v2249_v25   ;;  %1374 = vperm.xlu1 %2052, %v2152_v8  }
 0x182   : > { %v2648_v16 = vpop.permute.xlu1 %993 }
 0x183   : > { %3385 = vst [vmem:[#allocation85_spill] sm:$0xff] %v2648_v16  ;;  %v2650_v12 = vpop.permute.xlu0 %1738 }
 0x184   : > { %3386 = vst [vmem:[#allocation86_spill] sm:$0xff] %v2650_v12 }
 0x185   : > { %1786 = vperm.xlu0 %2060, %v2256_v27   ;;  %1382 = vperm.xlu1 %2052, %v2202_v19   ;;  %v1916_v19 = vld [vmem:[%s3284_s1] ss:$0 sm:$0xff] }
 0x186   : > { %v2654_v3 = vpop.permute.xlu1 %997  ;;  %v233_v27 = vmul.f32 %v1916_v19, %v2268_v30  ;;  %v235_v12 = vmul.f32 %v1916_v19, %v2266_v29  ;;  %v236_v28 = vmul.f32 %v1916_v19, %v2275_v32  ;;  %v239_v30 = vmul.f32 %v1916_v19, %v2291_v37 }
 0x187   : > { %3387 = vst [vmem:[#allocation87_spill] sm:$0xff] %v2654_v3  ;;  %v2656_v13 = vpop.permute.xlu0 %1746 }
 0x188   : > { %3388 = vst [vmem:[#allocation88_spill] sm:$0xff] %v2656_v13  ;;  %v234_v13 = vmul.f32 %v1916_v19, %v2277_v33  ;;  %v238_v33 = vmul.f32 %v1916_v19, %v2282_v34 }
 0x189   : > { %1798 = vperm.xlu0 %2060, %v2188_v17   ;;  %2053 = vset.pattern.permute.xlu1 %v3315_v10 }
 0x18a   : > { %1414 = vperm.xlu1 %2053, %v2125_v1   ;;  %v2661_v25 = vpop.permute.xlu1 %1005  ;;  %v237_v1 = vmul.f32 %v1916_v19, %v2285_v35  ;;  %v240_v35 = vmul.f32 %v1916_v19, %v2288_v36 }
 0x18b   : > { %3389 = vst [vmem:[#allocation89_spill] sm:$0xff] %v2661_v25  ;;  %v2663_v8 = vpop.permute.xlu0 %1754 }
 0x18c   : > { %3390 = vst [vmem:[#allocation90_spill] sm:$0xff] %v2663_v8  ;;  %v2678_v8 = vld [vmem:[%s3284_s1 + $0x1] ss:$0 sm:$0xff] }
 0x18d   : > { %1806 = vperm.xlu0 %2060, %v2230_v23   ;;  %v290_v25 = vmul.f32 %v2678_v8, %v2297_v39  ;;  %v289_v29 = vmul.f32 %v2678_v8, %v2472_v57  ;;  %v291_v37 = vmul.f32 %v2678_v8, %v2303_v41  ;;  %v293_v3 = vmul.f32 %v2678_v8, %v2309_v43  ;;  %v1922_v41 = vld [vmem:[%s3284_s1 + $0x3] ss:$0 sm:$0xff] }
 0x18e   : > { %1422 = vperm.xlu1 %2053, %v2144_v6   ;;  %v2672_v17 = vpop.permute.xlu1 %1013  ;;  %v1915_v6 = vld [vmem:[%s3285_s2] ss:$0 sm:$0xff]  ;;  %v295_v39 = vmul.f32 %v2678_v8, %v2314_v45  ;;  %v417_v45 = vmul.f32 %v1922_v41, %v2295_v38  ;;  %v2722_v16 = vmul.f32 %v1922_v41, %v2312_v44 }
 0x18f   : > { %3391 = vst [vmem:[#allocation91_spill] sm:$0xff] %v2672_v17  ;;  %v241_v14 = vadd.f32 %v1915_v6, %v233_v27  ;;  %v242_v17 = vadd.f32 %v1915_v6, %v234_v13  ;;  %v245_v32 = vadd.f32 %v1915_v6, %v237_v1  ;;  %v243_v19 = vadd.f32 %v1915_v6, %v235_v12 }
 0x190   : > { %v313_v23 = vpop.permute.xlu0 %312  ;;  %v244_v13 = vadd.f32 %v1915_v6, %v236_v28  ;;  %v247_v27 = vadd.f32 %v1915_v6, %v239_v30  ;;  %v246_v57 = vadd.f32 %v1915_v6, %v238_v33  ;;  %v2706_v1 = vadd.f32 %v1915_v6, %v240_v35 }
 0x191   : > { %v292_v28 = vmul.f32 %v2678_v8, %v2478_v15  ;;  %v298_v12 = vadd.f32 %v290_v25, %v242_v17  ;;  %v420_v30 = vmul.f32 %v1922_v41, %v2301_v40  ;;  %v299_v6 = vadd.f32 %v291_v37, %v243_v19  ;;  %v2727_v15 = vld [vmem:[%s3284_s1 + $0x6] ss:$0 sm:$0xff] }
 0x192   : > { %1426 = vperm.xlu1 %2053, %v2141_v5   ;;  %v2704_v5 = vld [vmem:[%s3284_s1 + $0x2] ss:$0 sm:$0xff]  ;;  %v301_v33 = vadd.f32 %v293_v3, %v245_v32  ;;  %v2719_v35 = vmul.f32 %v1922_v41, %v2307_v42  ;;  %v2731_v40 = vadd.f32 %v295_v39, %v247_v27  ;;  %v2741_v44 = vmul.f32 %v2727_v15, %v2323_v48  ;;  %v2759_v48 = vld [vmem:[%s3284_s1 + $0xc] ss:$0 sm:$0xff]  ;;  %v3398_v39 = vld [vmem:[#allocation5_spill] sm:$0xff] }
 0x193   : > { %v2697_v34 = vpop.permute.xlu1 %1045  ;;  %v347_v43 = vmul.f32 %v2704_v5, %v2326_v49  ;;  %v345_v42 = vmul.f32 %v2704_v5, %v2321_v47  ;;  %v2750_v25 = vmul.f32 %v2727_v15, %v2329_v50  ;;  %v300_v17 = vadd.f32 %v292_v28, %v244_v13 }
 0x194   : > { %3392 = vst [vmem:[#allocation92_spill] sm:$0xff] %v2697_v34  ;;  %v325_v36 = vpop.permute.xlu0 %324  ;;  %v297_v34 = vadd.f32 %v289_v29, %v241_v14  ;;  %v2746_v14 = vld [vmem:[%s3284_s1 + $0x9] ss:$0 sm:$0xff]  ;;  %v348_v47 = vmul.f32 %v2704_v5, %v2332_v51  ;;  %v419_v29 = vmul.f32 %v1922_v41, %v2358_v59  ;;  %v294_v37 = vmul.f32 %v2678_v8, %v2485_v61  ;;  %v2779_v61 = vld [vmem:[%s3284_s1 + $0x4] ss:$0 sm:$0xff] }
 0x195   : > { %v355_v3 = vadd.f32 %v347_v43, %v299_v6  ;;  %v2766_v50 = vmul.f32 %v2746_v14, %v2335_v52  ;;  %v350_v51 = vmul.f32 %v2704_v5, %v2339_v53  ;;  %v2772_v59 = vmul.f32 %v2746_v14, %v2342_v54  ;;  %v3396_v52 = vld [vmem:[#allocation3_spill] sm:$0xff]  ;;  %v3397_v53 = vld [vmem:[#allocation4_spill] sm:$0xff]  ;;  %v3400_v43 = vld [vmem:[#allocation14_spill] sm:$0xff] }
 0x196   : > { %1434 = vperm.xlu1 %2053, %v2149_v7   ;;  %v2735_v7 = vmul.f32 %v2727_v15, %v2318_v46  ;;  %v346_v46 = vmul.f32 %v2704_v5, %v313_v23  ;;  %v353_v32 = vadd.f32 %v345_v42, %v297_v34  ;;  %v3394_v23 = vld [vmem:[#allocation2_spill] sm:$0xff]  ;;  %v2785_v13 = vmul.f32 %v2746_v14, %v3396_v52 }
 0x197   : > { %v2729_v49 = vpop.permute.xlu1 %1053  ;;  %v352_v19 = vmul.f32 %v2704_v5, %v3394_v23  ;;  %v418_v27 = vmul.f32 %v1922_v41, %v3397_v53  ;;  %v2790_v54 = vmul.f32 %v2746_v14, %v3398_v39  ;;  %v475_v28 = vmul.f32 %v2779_v61, %v3400_v43  ;;  %v3401_v6 = vld [vmem:[#allocation6_spill] sm:$0xff]  ;;  %v2801_v23 = vld [vmem:[%s3284_s1 + $0xf] ss:$0 sm:$0xff]  ;;  %v3404_v39 = vld [vmem:[#allocation44_spill] sm:$0xff] }
 0x198   : > { %3393 = vst [vmem:[#allocation93_spill] sm:$0xff] %v2729_v49  ;;  %v333_v38 = vpop.permute.xlu0 %332  ;;  %v2796_v42 = vmul.f32 %v2759_v48, %v3401_v6  ;;  %3403 = vst [vmem:[#allocation5_spill] sm:$0xff] %v2801_v23  ;;  %v356_v52 = vadd.f32 %v348_v47, %v300_v17  ;;  %v354_v49 = vadd.f32 %v346_v46, %v298_v12  ;;  %v3405_v6 = vld [vmem:[#allocation7_spill] sm:$0xff]  ;;  %v3408_v12 = vld [vmem:[#allocation10_spill] sm:$0xff] }
 0x199   : > { %3399 = vst [vmem:[#allocation3_spill] sm:$0xff] %v2790_v54  ;;  %v349_v53 = vmul.f32 %v2704_v5, %v325_v36  ;;  %v427_v63 = vadd.f32 %v419_v29, %v355_v3  ;;  %v302_v10 = vadd.f32 %v294_v37, %v246_v57  ;;  %v425_v43 = vadd.f32 %v417_v45, %v353_v32  ;;  %v3407_v54 = vld [vmem:[#allocation9_spill] sm:$0xff]  ;;  %v2820_v57 = vld [vmem:[%s3284_s1 + $0x5] ss:$0 sm:$0xff]  ;;  %v3410_v3 = vld [vmem:[#allocation12_spill] sm:$0xff] }
 0x19a   : > { %1442 = vperm.xlu1 %2053, %v2423_v62   ;;  %3402 = vst [vmem:[#allocation4_spill] sm:$0xff] %v2796_v42  ;;  %v421_v42 = vmul.f32 %v1922_v41, %v3405_v6  ;;  %v2810_v56 = vmul.f32 %v2759_v48, %v3406_v26  ;;  %v423_v17 = vmul.f32 %v1922_v41, %v3407_v54  ;;  %v3411_v47 = vld [vmem:[#allocation15_spill] sm:$0xff]  ;;  %v3412_v6 = vld [vmem:[#allocation16_spill] sm:$0xff] }
 0x19b   : > { %v2781_v62 = vpop.permute.xlu1 %1057  ;;  %v2815_v36 = vmul.f32 %v2759_v48, %v3408_v12  ;;  %v473_v26 = vmul.f32 %v2779_v61, %v3410_v3  ;;  %v483_v46 = vadd.f32 %v475_v28, %v427_v63  ;;  %v2829_v41 = vmul.f32 %v2801_v23, %v3411_v47  ;;  %v2833_v32 = vld [vmem:[%s2122_s17 + $0x41] sm:$0xff]  ;;  %v3413_v28 = vld [vmem:[#allocation17_spill] sm:$0xff] }
 0x19c   : > { %3395 = vst [vmem:[#allocation2_spill] sm:$0xff] %v2781_v62  ;;  %v493_v34 = vpop.permute.xlu0 %492  ;;  %v296_v62 = vmul.f32 %v2678_v8, %v3404_v39  ;;  %v426_v37 = vadd.f32 %v418_v27, %v354_v49  ;;  %v357_v54 = vadd.f32 %v349_v53, %v301_v33  ;;  %v351_v39 = vmul.f32 %v2704_v5, %v333_v38  ;;  %v3416_v49 = vld [vmem:[#allocation18_spill] sm:$0xff]  ;;  %v3417_v38 = vld [vmem:[#allocation19_spill] sm:$0xff] }
 0x19d   : > { %3409 = vst [vmem:[#allocation14_spill] sm:$0xff] %v2815_v36  ;;  %v529_v29 = vmul.f32 %v2820_v57, %v493_v34  ;;  %v476_v12 = vmul.f32 %v2779_v61, %v3412_v6  ;;  %v481_v63 = vadd.f32 %v473_v26, %v425_v43  ;;  %v2841_v47 = vmul.f32 %v2801_v23, %v3413_v28  ;;  %v3415_v36 = vld [vmem:[#allocation25_spill] sm:$0xff] }
 0x19e   : > { %2054 = vset.pattern.permute.xlu1 %v3324_v2  ;;  %v358_v2 = vadd.f32 %v350_v51, %v302_v10  ;;  %v304_v3 = vadd.f32 %v296_v62, %v2706_v1  ;;  %v531_v34 = vmul.f32 %v2820_v57, %v3415_v36  ;;  %v474_v33 = vmul.f32 %v2779_v61, %v2498_v60  ;;  %v3419_v62 = vld [vmem:[#allocation20_spill] sm:$0xff]  ;;  %v3421_v6 = vld [vmem:[#allocation33_spill] sm:$0xff] }
 0x19f   : > { %1484 = vperm.xlu1 %2054, %v2163_v11   ;;  %v2823_v8 = vpop.permute.xlu1 %1065  ;;  %v428_v11 = vadd.f32 %v420_v30, %v356_v52  ;;  %3414 = vst [vmem:[#allocation6_spill] sm:$0xff] %v2841_v47  ;;  %v478_v1 = vmul.f32 %v2779_v61, %v3416_v49  ;;  %v2855_v51 = vmul.f32 %v2801_v23, %v3417_v38  ;;  %v3422_v38 = vld [vmem:[#allocation23_spill] sm:$0xff] }
 0x1a0   : > { %v505_v45 = vpop.permute.xlu0 %504  ;;  %v480_v27 = vmul.f32 %v2779_v61, %v3419_v62  ;;  %v537_v52 = vadd.f32 %v529_v29, %v481_v63  ;;  %v482_v53 = vadd.f32 %v474_v33, %v426_v37  ;;  %v429_v60 = vadd.f32 %v421_v42, %v357_v54  ;;  %v3423_v37 = vld [vmem:[#allocation27_spill] sm:$0xff] }
 0x1a1   : > { %v532_v5 = vmul.f32 %v2820_v57, %v505_v45  ;;  %3418 = vst [vmem:[#allocation44_spill] sm:$0xff] %v2855_v51  ;;  %v359_v43 = vadd.f32 %v351_v39, %v2731_v40  ;;  %v484_v36 = vadd.f32 %v476_v12, %v428_v11  ;;  %v3420_v45 = vld [vmem:[#allocation31_spill] sm:$0xff]  ;;  %v603_v28 = vmul.f32 %v2727_v15, %v3421_v6  ;;  %v3424_v39 = vld [vmem:[#allocation29_spill] sm:$0xff]  ;;  %v3428_v6 = vld [vmem:[#allocation48_spill] sm:$0xff] }
 0x1a2   : > { %v601_v26 = vmul.f32 %v2727_v15, %v3420_v45  ;;  %v360_v49 = vadd.f32 %v352_v19, %v304_v3  ;;  %v430_v47 = vadd.f32 %v2719_v35, %v358_v2  ;;  %v530_v51 = vmul.f32 %v2820_v57, %v3422_v38  ;;  %v3425_v12 = vld [vmem:[#allocation35_spill] sm:$0xff] }
 0x1a3   : > { %1489 = vperm.xlu1 %2054, %v2833_v32   ;;  %v2849_v30 = vpop.permute.xlu1 %1073  ;;  %v539_v23 = vadd.f32 %v531_v34, %v483_v46  ;;  %v477_v29 = vmul.f32 %v2779_v61, %v2504_v18  ;;  %v540_v42 = vadd.f32 %v532_v5, %v484_v36  ;;  %v533_v54 = vmul.f32 %v2820_v57, %v3423_v37  ;;  %v1930_v18 = vld [vmem:[%s3284_s1 + $0x7] ss:$0 sm:$0xff] }
 0x1a4   : > { %v513_v10 = vpop.permute.xlu0 %512  ;;  %v535_v11 = vmul.f32 %v2820_v57, %v3424_v39  ;;  %v609_v19 = vadd.f32 %v601_v26, %v537_v52  ;;  %v604_v46 = vmul.f32 %v2727_v15, %v3425_v12  ;;  %v431_v3 = vadd.f32 %v423_v17, %v359_v43  ;;  %v3426_v52 = vld [vmem:[#allocation37_spill] sm:$0xff]  ;;  %v3427_v36 = vld [vmem:[#allocation42_spill] sm:$0xff]  ;;  %v1932_v26 = vld [vmem:[%s3284_s1 + $0x8] ss:$0 sm:$0xff] }
 0x1a5   : > { %v534_v2 = vmul.f32 %v2820_v57, %v513_v10  ;;  %v538_v63 = vadd.f32 %v530_v51, %v482_v53  ;;  %v611_v34 = vadd.f32 %v603_v28, %v539_v23  ;;  %v657_v33 = vmul.f32 %v1930_v18, %v2516_v21  ;;  %v3429_v51 = vld [vmem:[#allocation11_spill] sm:$0xff]  ;;  %v3433_v39 = vld [vmem:[#allocation46_spill] sm:$0xff] }
 0x1a6   : > { %v486_v5 = vadd.f32 %v478_v1, %v430_v47  ;;  %v432_v62 = vadd.f32 %v2722_v16, %v360_v49  ;;  %v606_v10 = vmul.f32 %v2727_v15, %v3426_v52  ;;  %v659_v45 = vmul.f32 %v1930_v18, %v3427_v36  ;;  %v3430_v21 = vld [vmem:[#allocation39_spill] sm:$0xff] }
 0x1a7   : > { %1499 = vperm.xlu1 %2054, %v2218_v22   ;;  %v485_v22 = vadd.f32 %v477_v29, %v429_v60  ;;  %v479_v60 = vmul.f32 %v2779_v61, %v3428_v6  ;;  %v612_v17 = vadd.f32 %v604_v46, %v540_v42  ;;  %v608_v47 = vmul.f32 %v2727_v15, %v3430_v21  ;;  %v3431_v28 = vld [vmem:[#allocation51_spill] sm:$0xff]  ;;  %v3432_v61 = vld [vmem:[#allocation41_spill] sm:$0xff] }
 0x1a8   : > { %v521_v40 = vpop.permute.xlu0 %520  ;;  %v2875_v35 = vpop.permute.xlu1 %1115  ;;  %v665_v16 = vadd.f32 %v657_v33, %v609_v19  ;;  %v542_v1 = vadd.f32 %v534_v2, %v486_v5  ;;  %v660_v49 = vmul.f32 %v1930_v18, %v3431_v28  ;;  %v610_v29 = vadd.f32 %v2735_v7, %v538_v63  ;;  %v3434_v46 = vld [vmem:[#allocation47_spill] sm:$0xff]  ;;  %v3436_v5 = vld [vmem:[#allocation45_spill] sm:$0xff] }
 0x1a9   : > { %v536_v53 = vmul.f32 %v2820_v57, %v521_v40  ;;  %v487_v38 = vadd.f32 %v479_v60, %v431_v3  ;;  %v541_v37 = vadd.f32 %v533_v54, %v485_v22  ;;  %v658_v42 = vmul.f32 %v1930_v18, %v3432_v61  ;;  %v3435_v19 = vld [vmem:[#allocation43_spill] sm:$0xff]  ;;  %v3437_v63 = vld [vmem:[#allocation49_spill] sm:$0xff] }
 0x1aa   : > { %v713_v12 = vmul.f32 %v1932_v26, %v3433_v39  ;;  %v715_v52 = vmul.f32 %v1932_v26, %v3434_v46  ;;  %v488_v36 = vadd.f32 %v480_v27, %v432_v62  ;;  %v667_v15 = vadd.f32 %v659_v45, %v611_v34 }
 0x1ab   : > { %1509 = vperm.xlu1 %2054, %v3429_v51   ;;  %v661_v2 = vmul.f32 %v1930_v18, %v3435_v19  ;;  %v668_v33 = vadd.f32 %v660_v49, %v612_v17  ;;  %v663_v3 = vmul.f32 %v1930_v18, %v3436_v5  ;;  %v614_v6 = vadd.f32 %v606_v10, %v542_v1  ;;  %v3438_v17 = vld [vmem:[#allocation50_spill] sm:$0xff]  ;;  %v3440_v1 = vld [vmem:[#allocation52_spill] sm:$0xff]  ;;  %v3444_v19 = vld [vmem:[#allocation57_spill] sm:$0xff] }
 0x1ac   : > { %v681_v23 = vpop.permute.xlu0 %680  ;;  %v2896_v43 = vpop.permute.xlu1 %1120  ;;  %v544_v7 = vadd.f32 %v536_v53, %v488_v36  ;;  %v721_v22 = vadd.f32 %v713_v12, %v665_v16  ;;  %v716_v60 = vmul.f32 %v1932_v26, %v3437_v63  ;;  %v666_v27 = vadd.f32 %v658_v42, %v610_v29  ;;  %v3442_v42 = vld [vmem:[#allocation55_spill] sm:$0xff]  ;;  %v3443_v12 = vld [vmem:[#allocation56_spill] sm:$0xff] }
 0x1ad   : > { %v714_v57 = vmul.f32 %v1932_v26, %v681_v23  ;;  %v613_v34 = vadd.f32 %v2741_v44, %v541_v37  ;;  %v543_v62 = vadd.f32 %v535_v11, %v487_v38  ;;  %v723_v45 = vadd.f32 %v715_v52, %v667_v15  ;;  %v3439_v23 = vld [vmem:[#allocation53_spill] sm:$0xff]  ;;  %v3441_v11 = vld [vmem:[#allocation54_spill] sm:$0xff] }
 0x1ae   : > { %v718_v51 = vmul.f32 %v1932_v26, %v3438_v17  ;;  %v662_v21 = vmul.f32 %v1930_v18, %v3439_v23  ;;  %v788_v10 = vmul.f32 %v2746_v14, %v2539_v9  ;;  %v720_v53 = vmul.f32 %v1932_v26, %v3440_v1  ;;  %v2950_v17 = vld [vmem:[%s3284_s1 + $0xd] ss:$0 sm:$0xff]  ;;  %v3448_v23 = vld [vmem:[#allocation64_spill] sm:$0xff] }
 0x1af   : > { %2055 = vset.pattern.permute.xlu1 %v3336_v58  ;;  %v722_v16 = vadd.f32 %v714_v57, %v666_v27  ;;  %v724_v44 = vadd.f32 %v716_v60, %v668_v33  ;;  %v787_v38 = vmul.f32 %v2746_v14, %v3441_v11  ;;  %v616_v37 = vadd.f32 %v608_v47, %v544_v7  ;;  %v3445_v47 = vld [vmem:[#allocation58_spill] sm:$0xff]  ;;  %v2062_v27 = vld [vmem:[%s2122_s17 + $0x51] sm:$0xff] }
 0x1b0   : > { %v693_v40 = vpop.permute.xlu0 %692  ;;  %1542 = vperm.xlu1 %2055, %v2208_v20   ;;  %v2907_v54 = vpop.permute.xlu1 %1130  ;;  %v2919_v20 = vld [vmem:[%s3284_s1 + $0xa] ss:$0 sm:$0xff]  ;;  %v670_v29 = vadd.f32 %v662_v21, %v614_v6  ;;  %v794_v9 = vadd.f32 %v2766_v50, %v721_v22  ;;  %v664_v39 = vmul.f32 %v1930_v18, %v3442_v42  ;;  %v669_v52 = vadd.f32 %v661_v2, %v613_v34  ;;  %v2940_v50 = vld [vmem:[%s3284_s1 + $0xb] ss:$0 sm:$0xff] }
 0x1b1   : > { %v717_v28 = vmul.f32 %v1932_v26, %v693_v40  ;;  %v843_v46 = vmul.f32 %v2919_v20, %v3443_v12  ;;  %v615_v36 = vadd.f32 %v2750_v25, %v543_v62  ;;  %v796_v15 = vadd.f32 %v788_v10, %v723_v45  ;;  %v3446_v40 = vld [vmem:[#allocation62_spill] sm:$0xff]  ;;  %v3447_v62 = vld [vmem:[#allocation59_spill] sm:$0xff] }
 0x1b2   : > { %v790_v33 = vmul.f32 %v2746_v14, %v3444_v19  ;;  %v846_v57 = vmul.f32 %v2919_v20, %v3445_v47  ;;  %v842_v5 = vmul.f32 %v2919_v20, %v3446_v40  ;;  %v795_v18 = vadd.f32 %v787_v38, %v722_v16  ;;  %v3450_v16 = vld [vmem:[#allocation60_spill] sm:$0xff]  ;;  %v3452_v19 = vld [vmem:[#allocation63_spill] sm:$0xff]  ;;  %v3453_v40 = vld [vmem:[#allocation65_spill] sm:$0xff] }
 0x1b3   : > { %v725_v6 = vadd.f32 %v717_v28, %v669_v52  ;;  %v797_v25 = vadd.f32 %v2772_v59, %v724_v44  ;;  %v672_v22 = vadd.f32 %v664_v39, %v616_v37  ;;  %v726_v34 = vadd.f32 %v718_v51, %v670_v29  ;;  %v3449_v59 = vld [vmem:[#allocation66_spill] sm:$0xff]  ;;  %v3451_v28 = vld [vmem:[#allocation61_spill] sm:$0xff] }
 0x1b4   : > { %v701_v49 = vpop.permute.xlu0 %700  ;;  %1550 = vperm.xlu1 %2055, %v2833_v32   ;;  %v2924_v61 = vpop.permute.xlu1 %1140  ;;  %v850_v63 = vadd.f32 %v842_v5, %v794_v9  ;;  %v792_v45 = vmul.f32 %v2746_v14, %v3447_v62  ;;  %v845_v21 = vmul.f32 %v2919_v20, %v3449_v59  ;;  %v671_v10 = vadd.f32 %v663_v3, %v615_v36  ;;  %v2063_v39 = vld [vmem:[%s2122_s17 + $0x71] sm:$0xff]  ;;  %v3455_v62 = vld [vmem:[#allocation67_spill] sm:$0xff] }
 0x1b5   : > { %v719_v2 = vmul.f32 %v1932_v26, %v701_v49  ;;  %v844_v26 = vmul.f32 %v2919_v20, %v3448_v23  ;;  %v848_v51 = vmul.f32 %v2919_v20, %v3450_v16  ;;  %v1026_v14 = vmul.f32 %v2950_v17, %v3451_v28  ;;  %v3456_v23 = vld [vmem:[#allocation69_spill] sm:$0xff]  ;;  %v3457_v59 = vld [vmem:[#allocation68_spill] sm:$0xff] }
 0x1b6   : > { %v970_v49 = vmul.f32 %v2759_v48, %v2617_v24  ;;  %v851_v11 = vadd.f32 %v843_v46, %v795_v18  ;;  %v798_v38 = vadd.f32 %v790_v33, %v725_v6  ;;  %v853_v37 = vadd.f32 %v845_v21, %v797_v25  ;;  %v3004_v21 = vld [vmem:[%s3284_s1 + $0xe] ss:$0 sm:$0xff]  ;;  %v3459_v16 = vld [vmem:[#allocation81_spill] sm:$0xff] }
 0x1b7   : > { %v727_v29 = vadd.f32 %v719_v2, %v671_v10  ;;  %v799_v12 = vadd.f32 %v2785_v13, %v726_v34  ;;  %v728_v52 = vadd.f32 %v720_v53, %v672_v22  ;;  %v852_v36 = vadd.f32 %v844_v26, %v796_v15  ;;  %v2980_v13 = vld [vmem:[%s3284_s1 + $0x10] ss:$0 sm:$0xff] }
 0x1b8   : > { %v862_v7 = vpop.permute.xlu0 %861  ;;  %1554 = vperm.xlu1 %2055, %v2062_v27   ;;  %v1029_v47 = vmul.f32 %v2950_v17, %v3452_v19  ;;  %v1031_v24 = vmul.f32 %v2950_v17, %v3453_v40  ;;  %v899_v46 = vmul.f32 %v2940_v50, %v2591_v0  ;;  %v847_v5 = vmul.f32 %v2919_v20, %v2579_v55  ;;  %v3454_v27 = vld [vmem:[#allocation3_spill] sm:$0xff] }
 0x1b9   : > { %v898_v60 = vmul.f32 %v2940_v50, %v862_v7  ;;  %v2956_v1 = vpop.permute.xlu1 %1173  ;;  %v973_v53 = vmul.f32 %v2759_v48, %v2629_v31  ;;  %v900_v6 = vmul.f32 %v2940_v50, %v2597_v4  ;;  %v854_v0 = vadd.f32 %v846_v57, %v798_v38  ;;  %v3458_v57 = vld [vmem:[#allocation73_spill] sm:$0xff]  ;;  %v3463_v40 = vld [vmem:[#allocation75_spill] sm:$0xff] }
 0x1ba   : > { %v800_v2 = vadd.f32 %v792_v45, %v727_v29  ;;  %v907_v25 = vadd.f32 %v899_v46, %v851_v11  ;;  %v855_v55 = vadd.f32 %v847_v5, %v799_v12  ;;  %v801_v34 = vadd.f32 %v3454_v27, %v728_v52  ;;  %v3464_v5 = vld [vmem:[#allocation83_spill] sm:$0xff] }
 0x1bb   : > { %v906_v44 = vadd.f32 %v898_v60, %v850_v63  ;;  %v2064_v60 = vld [vmem:[%s2122_s17 + $0x91] sm:$0xff]  ;;  %v1033_v31 = vmul.f32 %v2950_v17, %v3455_v62  ;;  %v849_v26 = vmul.f32 %v2919_v20, %v3456_v23  ;;  %v2997_v4 = vmul.f32 %v2980_v13, %v3457_v59 }
 0x1bc   : > { %v874_v9 = vpop.permute.xlu0 %873  ;;  %1562 = vperm.xlu1 %2055, %v2063_v39   ;;  %v902_v45 = vmul.f32 %v2940_v50, %v3458_v57  ;;  %v975_v28 = vmul.f32 %v2759_v48, %v3459_v16  ;;  %v908_v11 = vadd.f32 %v900_v6, %v852_v36  ;;  %v856_v38 = vadd.f32 %v848_v51, %v800_v2  ;;  %v3469_v57 = vld [vmem:[#allocation5_spill] sm:$0xff]  ;;  %v3470_v16 = vld [vmem:[#allocation6_spill] sm:$0xff] }
 0x1bd   : > { %v978_v42 = vadd.f32 %v970_v49, %v906_v44  ;;  %v901_v3 = vmul.f32 %v2940_v50, %v874_v9  ;;  %v2973_v33 = vpop.permute.xlu1 %1181  ;;  %v857_v12 = vadd.f32 %v849_v26, %v801_v34  ;;  %v3462_v19 = vmov 2   ;;  %v3468_v26 = vld [vmem:[#allocation89_spill] sm:$0xff] }
 0x1be   : > { %v904_v46 = vmul.f32 %v2940_v50, %v3463_v40  ;;  %v1087_v36 = vmul.f32 %v3004_v21, %v2823_v8  ;;  %v1030_v59 = vmul.f32 %v2950_v17, %v3468_v26  ;;  %v1158_v40 = vmul.f32 %v3469_v57, %v2907_v54  ;;  %v3477_v26 = vld [vmem:[#allocation92_spill] sm:$0xff] }
 0x1bf   : > { %v2984_v15 = vadd.f32 %v1026_v14, %v978_v42  ;;  %v909_v18 = vadd.f32 %v901_v3, %v853_v37  ;;  %v3460_v14 = vld [vmem:[#allocation2_spill] sm:$0xff]  ;;  %v3461_v37 = vld [vmem:[#allocation4_spill] sm:$0xff]  ;;  %v910_v42 = vadd.f32 %v902_v45, %v854_v0  ;;  %v1155_v45 = vmul.f32 %v3469_v57, %v2875_v35 }
 0x1c0   : > { %v882_v7 = vpop.permute.xlu0 %881  ;;  %1570 = vperm.xlu1 %2055, %v2064_v60   ;;  %v1085_v49 = vmul.f32 %v3004_v21, %v3460_v14  ;;  %v979_v9 = vadd.f32 %v3461_v37, %v907_v25  ;;  %v912_v27 = vadd.f32 %v904_v46, %v856_v38  ;;  %v2066_v46 = vld [vmem:[%s2122_s17 + $0x61] sm:$0xff] }
 0x1c1   : > { %v981_v22 = vadd.f32 %v973_v53, %v909_v18  ;;  %v903_v63 = vmul.f32 %v2940_v50, %v882_v7  ;;  %v1186_v10 = vpop.permute.xlu1 %1185  ;;  %v3465_v53 = vld [vmem:[#allocation85_spill] sm:$0xff]  ;;  %v982_v60 = vadd.f32 %v2810_v56, %v910_v42 }
 0x1c2   : > { %v1027_v51 = vmul.f32 %v2950_v17, %v3465_v53  ;;  %v2065_v18 = vld [vmem:[%s2122_s17 + $0x31] sm:$0xff]  ;;  %v1213_v7 = vmul.f32 %v2980_v13, %v1186_v10 }
 0x1c3   : > { %v1037_v20 = vadd.f32 %v1029_v47, %v981_v22  ;;  %v911_v44 = vadd.f32 %v903_v63, %v855_v55  ;;  %v977_v47 = vmul.f32 %v2759_v48, %v3464_v5  ;;  %v3466_v22 = vld [vmem:[#allocation78_spill] sm:$0xff]  ;;  %v3474_v5 = vld [vmem:[#allocation44_spill] sm:$0xff] }
 0x1c4   : > { %v890_v29 = vpop.permute.xlu0 %889  ;;  %2056 = vset.pattern.permute.xlu1 %v3462_v19  ;;  %v1035_v55 = vadd.f32 %v1027_v51, %v979_v9 }
 0x1c5   : > { %v983_v3 = vadd.f32 %v975_v28, %v911_v44  ;;  %v1093_v39 = vadd.f32 %v1085_v49, %v1037_v20  ;;  %v905_v52 = vmul.f32 %v2940_v50, %v890_v29  ;;  %1602 = vperm.xlu1 %2056, %v2065_v18   ;;  %v1194_v6 = vpop.permute.xlu1 %1193  ;;  %v972_v50 = vmul.f32 %v2759_v48, %v3466_v22  ;;  %v3471_v44 = vld [vmem:[#allocation93_spill] sm:$0xff] }
 0x1c6   : > { %v1089_v48 = vmul.f32 %v3004_v21, %v2849_v30  ;;  %v1215_v14 = vmul.f32 %v2980_v13, %v1194_v6  ;;  %v1084_v38 = vmul.f32 %v3004_v21, %v3471_v44  ;;  %v1038_v29 = vadd.f32 %v1030_v59, %v982_v60  ;;  %v3472_v30 = vld [vmem:[#allocation14_spill] sm:$0xff]  ;;  %v3479_v44 = vld [vmem:[#allocation13_spill] sm:$0xff] }
 0x1c7   : > { %v1039_v0 = vadd.f32 %v1031_v24, %v983_v3  ;;  %v1165_v2 = vadd.f32 %v2829_v41, %v1093_v39  ;;  %v913_v25 = vadd.f32 %v905_v52, %v857_v12  ;;  %v3467_v24 = vld [vmem:[#allocation87_spill] sm:$0xff]  ;;  %v980_v20 = vadd.f32 %v972_v50, %v908_v11  ;;  %v3050_v3 = vld [vmem:[%s3284_s1 + $0x11] ss:$0 sm:$0xff]  ;;  %v3475_v6 = vld [vmem:[#allocation70_spill] sm:$0xff] }
 0x1c8   : > { %v1050_v63 = vpop.permute.xlu0 %1049  ;;  %v1028_v41 = vmul.f32 %v2950_v17, %v3467_v24  ;;  %v984_v9 = vadd.f32 %v3472_v30, %v912_v27  ;;  %v3473_v11 = vld [vmem:[#allocation91_spill] sm:$0xff]  ;;  %v1156_v52 = vmul.f32 %v3469_v57, %v2896_v43  ;;  %v1212_v43 = vmul.f32 %v2980_v13, %v2973_v33 }
 0x1c9   : > { %v3027_v34 = vadd.f32 %v1213_v7, %v1165_v2  ;;  %v985_v8 = vadd.f32 %v977_v47, %v913_v25  ;;  %v1095_v62 = vadd.f32 %v1087_v36, %v1039_v0  ;;  %v1083_v23 = vmul.f32 %v3004_v21, %v1050_v63  ;;  %1606 = vperm.xlu1 %2056, %v2833_v32   ;;  %v1202_v56 = vpop.permute.xlu1 %1201  ;;  %v3476_v24 = vld [vmem:[#allocation71_spill] sm:$0xff] }
 0x1ca   : > { %v1036_v39 = vadd.f32 %v1028_v41, %v980_v20  ;;  %v1032_v12 = vmul.f32 %v2950_v17, %v3473_v11  ;;  %v1217_v53 = vmul.f32 %v2980_v13, %v1202_v56  ;;  %v1214_v17 = vmul.f32 %v2980_v13, %v3475_v6  ;;  %v3088_v20 = vld [vmem:[%s2122_s17 + $0x42] sm:$0xff]  ;;  %v3111_v11 = vld [vmem:[%s3284_s1 + $0x13] ss:$0 sm:$0xff] }
 0x1cb   : > { %v1041_v10 = vadd.f32 %v1033_v31, %v985_v8  ;;  %v1167_v28 = vadd.f32 %v3470_v16, %v1095_v62  ;;  %v1091_v49 = vadd.f32 %v1083_v23, %v1035_v55  ;;  %v1160_v60 = vmul.f32 %v3469_v57, %v2924_v61  ;;  %v3083_v61 = vld [vmem:[%s2122_s17 + $0x22] sm:$0xff] }
 0x1cc   : > { %v1062_v37 = vpop.permute.xlu0 %1061  ;;  %v1092_v0 = vadd.f32 %v1084_v38, %v1036_v39  ;;  %v1040_v22 = vadd.f32 %v1032_v12, %v984_v9  ;;  %v1216_v41 = vmul.f32 %v2980_v13, %v3476_v24  ;;  %v1082_v59 = vmul.f32 %v3004_v21, %v3477_v26  ;;  %v3102_v39 = vld [vmem:[%s2122_s17 + $0x52] sm:$0xff] }
 0x1cd   : > { %v3044_v42 = vadd.f32 %v1215_v14, %v1167_v28  ;;  %v1163_v35 = vadd.f32 %v1155_v45, %v1091_v49  ;;  %v1097_v32 = vadd.f32 %v1089_v48, %v1041_v10  ;;  %v1086_v31 = vmul.f32 %v3004_v21, %v1062_v37  ;;  %1614 = vperm.xlu1 %2056, %v2066_v46  }
 0x1ce   : > { %v1234_v36 = vpop.permute.xlu1 %1233  ;;  %v1164_v55 = vadd.f32 %v1156_v52, %v1092_v0  ;;  %v3478_v56 = vmov 0   ;;  %v1090_v10 = vadd.f32 %v1082_v59, %v2984_v15  ;;  %v1210_v30 = vmul.f32 %v2980_v13, %v2956_v1  ;;  %v3480_v52 = vld [vmem:[#allocation72_spill] sm:$0xff] }
 0x1cf   : > { %v1169_v47 = vadd.f32 %v3474_v5, %v1097_v32  ;;  %v1094_v51 = vadd.f32 %v1086_v31, %v1038_v29  ;;  %v1219_v18 = vadd.f32 %v2997_v4, %v1163_v35  ;;  %v1267_v54 = vmul.f32 %v3050_v3, %v1234_v36  ;;  %v2067_v4 = vld [vmem:[%s2122_s17 + $0x81] sm:$0xff]  ;;  %v3116_v5 = vld [vmem:[%s2122_s17 + $0x72] sm:$0xff] }
 0x1d0   : > { %v1070_v2 = vpop.permute.xlu0 %1069  ;;  %v1220_v62 = vadd.f32 %v1212_v43, %v1164_v55 }
 0x1d1   : > { %v3067_v7 = vadd.f32 %v1217_v53, %v1169_v47  ;;  %v1166_v25 = vadd.f32 %v1158_v40, %v1094_v51  ;;  %v1088_v50 = vmul.f32 %v3004_v21, %v1070_v2  ;;  %v3070_v63 = vadd.f32 %v1267_v54, %v1219_v18  ;;  %1622 = vperm.xlu1 %2056, %v2067_v4   ;;  %v2071_v4 = vld [vmem:[%s2122_s17 + $0x32] sm:$0xff] }
 0x1d2   : > { %v1238_v33 = vpop.permute.xlu1 %1237  ;;  %v1154_v21 = vmul.f32 %v3469_v57, %v3479_v44  ;;  %v1984_v57 = vld [vmem:[%s3284_s1 + $0x12] ss:$0 sm:$0xff]  ;;  %v1395_v40 = vmul.f32 %v3111_v11, %v3480_v52 }
 0x1d3   : > { %v1096_v27 = vadd.f32 %v1088_v50, %v1040_v22  ;;  %v1222_v8 = vadd.f32 %v1214_v17, %v1166_v25  ;;  %v1268_v23 = vmul.f32 %v3050_v3, %v1238_v33  ;;  %v3481_v17 = vld [vmem:[#allocation40_spill] sm:$0xff]  ;;  %v3482_v22 = vld [vmem:[#allocation74_spill] sm:$0xff] }
 0x1d4   : > { %v1230_v14 = vpop.permute.xlu0 %1229  ;;  %v1162_v29 = vadd.f32 %v1154_v21, %v1090_v10  ;;  %v1398_v50 = vmul.f32 %v3111_v11, %v3482_v22  ;;  %v2072_v10 = vld [vmem:[%s2122_s17 + $0x62] sm:$0xff] }
 0x1d5   : > { %v1168_v48 = vadd.f32 %v1160_v60, %v1096_v27  ;;  %v1276_v45 = vadd.f32 %v1268_v23, %v1220_v62  ;;  %2057 = vset.pattern.permute.xlu1 %v3478_v56  ;;  %v1266_v9 = vmul.f32 %v3050_v3, %v1230_v14  ;;  %v3483_v62 = vld [vmem:[#allocation76_spill] sm:$0xff]  ;;  %v3485_v56 = vld [vmem:[#allocation21_spill] sm:$0xff]  ;;  %v2073_v21 = vld [vmem:[%s2122_s17 + $0x82] sm:$0xff] }
 0x1d6   : > { %1663 = vperm.xlu1 %2057, %v3083_v61   ;;  %v1246_v16 = vpop.permute.xlu1 %1245  ;;  %v1218_v31 = vadd.f32 %v1210_v30, %v1162_v29  ;;  %v1400_v23 = vmul.f32 %v3111_v11, %v3483_v62 }
 0x1d7   : > { %v1224_v28 = vadd.f32 %v1216_v41, %v1168_v48  ;;  %v1270_v49 = vmul.f32 %v3050_v3, %v1246_v16  ;;  %v3484_v48 = vld [vmem:[#allocation77_spill] sm:$0xff] }
 0x1d8   : > { %v1242_v35 = vpop.permute.xlu0 %1241  ;;  %v1274_v13 = vadd.f32 %v1266_v9, %v1218_v31  ;;  %v3487_v31 = vld [vmem:[#allocation24_spill] sm:$0xff] }
 0x1d9   : > { %v3092_v38 = vadd.f32 %v1270_v49, %v1222_v8  ;;  %v1269_v51 = vmul.f32 %v3050_v3, %v1242_v35 }
 0x1da   : > { %1673 = vperm.xlu1 %2057, %v3088_v20   ;;  %v1254_v15 = vpop.permute.xlu1 %1253 }
 0x1db   : > { %v1272_v37 = vmul.f32 %v3050_v3, %v1254_v15  ;;  %v1277_v43 = vadd.f32 %v1269_v51, %v3027_v34  ;;  %v3486_v15 = vld [vmem:[#allocation22_spill] sm:$0xff]  ;;  %v2074_v51 = vld [vmem:[%s2122_s17 + $0x92] sm:$0xff] }
 0x1dc   : > { %v1250_v47 = vpop.permute.xlu0 %1249 }
 0x1dd   : > { %v3099_v32 = vadd.f32 %v1272_v37, %v1224_v28  ;;  %v1271_v54 = vmul.f32 %v3050_v3, %v1250_v47  ;;  %v1343_v37 = vmul.f32 %v1984_v57, %v3486_v15 }
 0x1de   : > { %1678 = vperm.xlu1 %2057, %v3102_v39  }
 0x1df   : > { %v1296_v1 = vpop.permute.xlu1 %1295  ;;  %v1279_v27 = vadd.f32 %v1271_v54, %v3044_v42  ;;  %v1351_v35 = vadd.f32 %v1343_v37, %v3092_v38 }
 0x1e0   : > { %v1339_v12 = vmul.f32 %v1984_v57, %v1296_v1  ;;  %v1258_v25 = vpop.permute.xlu0 %1257  ;;  %v1345_v1 = vmul.f32 %v1984_v57, %v3487_v31  ;;  %v3492_v31 = vld [vmem:[#allocation28_spill] sm:$0xff] }
 0x1e1   : > { %v1273_v33 = vmul.f32 %v3050_v3, %v1258_v25  ;;  %v1340_v3 = vmul.f32 %v1984_v57, %v3485_v56 }
 0x1e2   : > { %v1347_v46 = vadd.f32 %v1339_v12, %v1274_v13  ;;  %1688 = vperm.xlu1 %2057, %v3116_v5   ;;  %v1353_v52 = vadd.f32 %v1345_v1, %v3099_v32 }
 0x1e3   : > { %v1306_v53 = vpop.permute.xlu1 %1305  ;;  %v1348_v14 = vadd.f32 %v1340_v3, %v3070_v63 }
 0x1e4   : > { %v1341_v36 = vmul.f32 %v1984_v57, %v1306_v53  ;;  %v1403_v18 = vadd.f32 %v1395_v40, %v1347_v46 }
 0x1e6   : > { %v1349_v6 = vadd.f32 %v1341_v36, %v1276_v45  ;;  %1698 = vperm.xlu1 %2057, %v3481_v17   ;;  %v1402_v45 = vmul.f32 %v3111_v11, %v3484_v48 }
 0x1e7   : > { %v1311_v0 = vpop.permute.xlu1 %1310 }
 0x1e8   : > { %v1342_v2 = vmul.f32 %v1984_v57, %v1311_v0 }
 0x1ea   : > { %v1350_v55 = vadd.f32 %v1342_v2, %v1277_v43  ;;  %2059 = vset.pattern.permute.xlu1 %v3336_v58  ;;  %v1281_v58 = vadd.f32 %v1273_v33, %v3067_v7  ;;  %v1419_v43 = vpop.permute.xlu0 %1418 }
 0x1eb   : > { %1730 = vperm.xlu1 %2059, %v2071_v4   ;;  %v1321_v60 = vpop.permute.xlu1 %1320 }
 0x1ec   : > { %v1344_v8 = vmul.f32 %v1984_v57, %v1321_v60  ;;  %v1406_v34 = vadd.f32 %v1398_v50, %v1350_v55  ;;  %v3488_v60 = vld [vmem:[#allocation79_spill] sm:$0xff] }
 0x1ee   : > { %v1352_v24 = vadd.f32 %v1344_v8, %v1279_v27  ;;  %v1431_v4 = vpop.permute.xlu0 %1430 }
 0x1ef   : > { %1734 = vperm.xlu1 %2059, %v3088_v20   ;;  %v1331_v41 = vpop.permute.xlu1 %1330 }
 0x1f0   : > { %v1346_v26 = vmul.f32 %v1984_v57, %v1331_v41  ;;  %v1408_v59 = vadd.f32 %v1400_v23, %v1352_v24 }
 0x1f2   : > { %v1354_v42 = vadd.f32 %v1346_v26, %v1281_v58  ;;  %v1439_v41 = vpop.permute.xlu0 %1438 }
 0x1f3   : > { %1742 = vperm.xlu1 %2059, %v2072_v10  }
 0x1f4   : > { %v1363_v16 = vpop.permute.xlu1 %1362  ;;  %v1410_v28 = vadd.f32 %v1402_v45, %v1354_v42  ;;  %v3489_v45 = vld [vmem:[#allocation80_spill] sm:$0xff] }
 0x1f5   : > { %v1396_v49 = vmul.f32 %v3111_v11, %v1363_v16 }
 0x1f7   : > { %v1404_v44 = vadd.f32 %v1396_v49, %v1348_v14  ;;  %1750 = vperm.xlu1 %2059, %v2073_v21   ;;  %v3490_v14 = vld [vmem:[#allocation82_spill] sm:$0xff] }
 0x1f8   : > { %v1367_v7 = vpop.permute.xlu1 %1366  ;;  %v3491_v21 = vld [vmem:[#allocation26_spill] sm:$0xff] }
 0x1f9   : > { %v1397_v29 = vmul.f32 %v3111_v11, %v1367_v7 }
 0x1fb   : > { %v1405_v30 = vadd.f32 %v1397_v29, %v1349_v6  ;;  %2061 = vset.pattern.permute.xlu1 %v3462_v19  ;;  %v1988_v19 = vld [vmem:[%s3284_s1 + $0x14] ss:$0 sm:$0xff] }
 0x1fc   : > { %1782 = vperm.xlu1 %2061, %v3083_v61   ;;  %v1375_v9 = vpop.permute.xlu1 %1374  ;;  %v1452_v2 = vmul.f32 %v1988_v19, %v1419_v43  ;;  %v1457_v26 = vmul.f32 %v1988_v19, %v1439_v41 }
 0x1fd   : > { %v1399_v63 = vmul.f32 %v3111_v11, %v1375_v9 }
 0x1fe   : > { %v1460_v50 = vadd.f32 %v1452_v2, %v1404_v44 }
 0x1ff   : > { %v1407_v13 = vadd.f32 %v1399_v63, %v1351_v35 }
 0x200   : > { %1790 = vperm.xlu1 %2061, %v3088_v20   ;;  %v1383_v12 = vpop.permute.xlu1 %1382 }
 0x201   : > { %v1401_v40 = vmul.f32 %v3111_v11, %v1383_v12 }
 0x203   : > { %v1409_v46 = vadd.f32 %v1401_v40, %v1353_v52 }
 0x204   : > { %1794 = vperm.xlu1 %2061, %v3102_v39  }
 0x205   : > { %v1415_v61 = vpop.permute.xlu1 %1414  ;;  %v1465_v10 = vadd.f32 %v1457_v26, %v1409_v46  ;;  %v3493_v46 = vld [vmem:[#allocation30_spill] sm:$0xff] }
 0x206   : > { %v1451_v38 = vmul.f32 %v1988_v19, %v1415_v61 }
 0x208   : > { %v1459_v47 = vadd.f32 %v1451_v38, %v1403_v18  ;;  %1802 = vperm.xlu1 %2061, %v3116_v5   ;;  %v1998_v5 = vld [vmem:[%s3284_s1 + $0x15] ss:$0 sm:$0xff]  ;;  %v2000_v18 = vld [vmem:[%s3284_s1 + $0x16] ss:$0 sm:$0xff] }
 0x209   : > { %v1423_v57 = vpop.permute.xlu1 %1422  ;;  %v1580_v27 = vmul.f32 %v2000_v18, %v3488_v60  ;;  %v1583_v42 = vmul.f32 %v2000_v18, %v3489_v45  ;;  %v1585_v49 = vmul.f32 %v2000_v18, %v3490_v14  ;;  %v1523_v7 = vmul.f32 %v1998_v5, %v3491_v21  ;;  %v3495_v60 = vld [vmem:[#allocation84_spill] sm:$0xff] }
 0x20a   : > { %v1453_v53 = vmul.f32 %v1988_v19, %v1423_v57  ;;  %v1526_v1 = vmul.f32 %v1998_v5, %v3492_v31  ;;  %v3498_v31 = vld [vmem:[#allocation90_spill] sm:$0xff] }
 0x20b   : > { %v1531_v37 = vadd.f32 %v1523_v7, %v1459_v47 }
 0x20c   : > { %v1461_v20 = vadd.f32 %v1453_v53, %v1405_v30  ;;  %1810 = vperm.xlu1 %2061, %v2074_v51  }
 0x20d   : > { %v1427_v32 = vpop.permute.xlu1 %1426 }
 0x20e   : > { %v1454_v36 = vmul.f32 %v1988_v19, %v1427_v32 }
 0x210   : > { %v1462_v11 = vadd.f32 %v1454_v36, %v1406_v34  ;;  %v1455_v34 = vmul.f32 %v1988_v19, %v1431_v4 }
 0x211   : > { %v1435_v6 = vpop.permute.xlu1 %1434 }
 0x212   : > { %v1456_v17 = vmul.f32 %v1988_v19, %v1435_v6  ;;  %v1534_v52 = vadd.f32 %v1526_v1, %v1462_v11  ;;  %v3182_v11 = vld [vmem:[%s3284_s1 + $0x17] ss:$0 sm:$0xff] }
 0x214   : > { %v1464_v39 = vadd.f32 %v1456_v17, %v1408_v59  ;;  %v1463_v59 = vadd.f32 %v1455_v34, %v1407_v13 }
 0x215   : > { %v1443_v0 = vpop.permute.xlu1 %1442 }
 0x216   : > { %v1458_v54 = vmul.f32 %v1988_v19, %v1443_v0  ;;  %v1528_v19 = vmul.f32 %v1998_v5, %v3493_v46  ;;  %v3225_v46 = vld [vmem:[%s3284_s1 + $0x1a] ss:$0 sm:$0xff] }
 0x218   : > { %v1466_v25 = vadd.f32 %v1458_v54, %v1410_v28  ;;  %v1536_v57 = vadd.f32 %v1528_v19, %v1464_v39 }
 0x21a   : > { %v1485_v22 = vpop.permute.xlu1 %1484 }
 0x21b   : > { %v1524_v55 = vmul.f32 %v1998_v5, %v1485_v22  ;;  %v1599_v22 = vpop.permute.xlu0 %1598 }
 0x21c   : > { %v1635_v39 = vmul.f32 %v3182_v11, %v1599_v22 }
 0x21d   : > { %v1532_v33 = vadd.f32 %v1524_v55, %v1460_v50 }
 0x21e   : > { %v1490_v8 = vpop.permute.xlu1 %1489 }
 0x21f   : > { %v1525_v62 = vmul.f32 %v1998_v5, %v1490_v8  ;;  %v3163_v23 = vadd.f32 %v1580_v27, %v1532_v33  ;;  %v1611_v4 = vpop.permute.xlu0 %1610 }
 0x221   : > { %v1533_v24 = vadd.f32 %v1525_v62, %v1461_v20  ;;  %v3494_v20 = vld [vmem:[#allocation32_spill] sm:$0xff]  ;;  %v1638_v62 = vmul.f32 %v3182_v11, %v1611_v4 }
 0x222   : > { %v1500_v58 = vpop.permute.xlu1 %1499  ;;  %v1530_v51 = vmul.f32 %v1998_v5, %v3494_v20 }
 0x223   : > { %v1527_v48 = vmul.f32 %v1998_v5, %v1500_v58 }
 0x224   : > { %v1538_v36 = vadd.f32 %v1530_v51, %v1466_v25  ;;  %v3193_v25 = vld [vmem:[%s3284_s1 + $0x19] ss:$0 sm:$0xff] }
 0x225   : > { %v1535_v56 = vadd.f32 %v1527_v48, %v1463_v59  ;;  %v1763_v27 = vmul.f32 %v3193_v25, %v3495_v60  ;;  %v3496_v59 = vld [vmem:[#allocation86_spill] sm:$0xff]  ;;  %v1770_v1 = vmul.f32 %v3193_v25, %v3498_v31 }
 0x226   : > { %v1510_v3 = vpop.permute.xlu1 %1509  ;;  %v1766_v48 = vmul.f32 %v3193_v25, %v3496_v59 }
 0x227   : > { %v1529_v16 = vmul.f32 %v1998_v5, %v1510_v3  ;;  %v3166_v28 = vadd.f32 %v1583_v42, %v1535_v56  ;;  %v3188_v5 = vld [vmem:[%s3284_s1 + $0x18] ss:$0 sm:$0xff] }
 0x229   : > { %v1537_v44 = vadd.f32 %v1529_v16, %v1465_v10 }
 0x22b   : > { %v1543_v29 = vpop.permute.xlu1 %1542  ;;  %v3170_v15 = vadd.f32 %v1585_v49, %v1537_v44  ;;  %v3497_v44 = vld [vmem:[#allocation88_spill] sm:$0xff] }
 0x22c   : > { %v1579_v30 = vmul.f32 %v2000_v18, %v1543_v29  ;;  %v1768_v21 = vmul.f32 %v3193_v25, %v3497_v44 }
 0x22e   : > { %v1587_v9 = vadd.f32 %v1579_v30, %v1531_v37 }
 0x22f   : > { %v1551_v35 = vpop.permute.xlu1 %1550 }
 0x230   : > { %v1581_v63 = vmul.f32 %v2000_v18, %v1551_v35  ;;  %v1643_v50 = vadd.f32 %v1635_v39, %v1587_v9 }
 0x232   : > { %v3173_v13 = vadd.f32 %v1581_v63, %v1533_v24  ;;  %v1619_v24 = vpop.permute.xlu0 %1618 }
 0x233   : > { %v1555_v12 = vpop.permute.xlu1 %1554  ;;  %v1640_v45 = vmul.f32 %v3182_v11, %v1619_v24 }
 0x234   : > { %v1582_v40 = vmul.f32 %v2000_v18, %v1555_v12 }
 0x236   : > { %v1590_v61 = vadd.f32 %v1582_v40, %v1534_v52  ;;  %v1627_v14 = vpop.permute.xlu0 %1626  ;;  %v3499_v52 = vld [vmem:[#allocation34_spill] sm:$0xff] }
 0x237   : > { %v1563_v38 = vpop.permute.xlu1 %1562  ;;  %v1642_v7 = vmul.f32 %v3182_v11, %v1627_v14  ;;  %v1708_v40 = vmul.f32 %v3188_v5, %v3499_v52 }
 0x238   : > { %v1584_v53 = vmul.f32 %v2000_v18, %v1563_v38  ;;  %v1646_v58 = vadd.f32 %v1638_v62, %v1590_v61 }
 0x23a   : > { %v1592_v47 = vadd.f32 %v1584_v53, %v1536_v57  ;;  %v1787_v19 = vpop.permute.xlu0 %1786 }
 0x23b   : > { %v1571_v32 = vpop.permute.xlu1 %1570  ;;  %v1820_v20 = vmul.f32 %v3225_v46, %v1787_v19 }
 0x23c   : > { %v1586_v6 = vmul.f32 %v2000_v18, %v1571_v32  ;;  %v1648_v3 = vadd.f32 %v1640_v45, %v1592_v47 }
 0x23e   : > { %v1594_v17 = vadd.f32 %v1586_v6, %v1538_v36 }
 0x240   : > { %v1603_v0 = vpop.permute.xlu1 %1602  ;;  %v1650_v30 = vadd.f32 %v1642_v7, %v1594_v17  ;;  %v1799_v17 = vpop.permute.xlu0 %1798 }
 0x241   : > { %v1636_v49 = vmul.f32 %v3182_v11, %v1603_v0  ;;  %v3500_v0 = vld [vmem:[#allocation36_spill] sm:$0xff]  ;;  %v1823_v4 = vmul.f32 %v3225_v46, %v1799_v17 }
 0x243   : > { %v1644_v63 = vadd.f32 %v1636_v49, %v3163_v23 }
 0x244   : > { %v3177_v43 = vpop.permute.xlu1 %1606 }
 0x245   : > { %v1716_v53 = vadd.f32 %v1708_v40, %v1644_v63 }
 0x248   : > { %v1615_v54 = vpop.permute.xlu1 %1614 }
 0x249   : > { %v1639_v57 = vmul.f32 %v3182_v11, %v1615_v54  ;;  %v1711_v54 = vmul.f32 %v3188_v5, %v3500_v0 }
 0x24b   : > { %v1647_v32 = vadd.f32 %v1639_v57, %v3166_v28 }
 0x24c   : > { %v1623_v2 = vpop.permute.xlu1 %1622 }
 0x24d   : > { %v1641_v36 = vmul.f32 %v3182_v11, %v1623_v2  ;;  %v1719_v28 = vadd.f32 %v1711_v54, %v1647_v32 }
 0x251   : > { %v1664_v18 = vpop.permute.xlu1 %1663 }
 0x252   : > { %v1707_v55 = vmul.f32 %v3188_v5, %v1664_v18  ;;  %v1649_v18 = vadd.f32 %v1641_v36, %v3170_v15  ;;  %v1637_v15 = vmul.f32 %v3182_v11, %v3177_v43 }
 0x254   : > { %v1715_v33 = vadd.f32 %v1707_v55, %v1643_v50  ;;  %v3501_v50 = vld [vmem:[#allocation38_spill] sm:$0xff] }
 0x255   : > { %v3198_v8 = vpop.permute.xlu1 %1673  ;;  %v1713_v55 = vmul.f32 %v3188_v5, %v3501_v50 }
 0x256   : > { %v3200_v34 = vadd.f32 %v1763_v27, %v1715_v33  ;;  %v1807_v27 = vpop.permute.xlu0 %1806 }
 0x257   : > { %v1721_v24 = vadd.f32 %v1713_v55, %v1649_v18 }
 0x259   : > { %v1679_v41 = vpop.permute.xlu1 %1678 }
 0x25a   : > { %v1710_v26 = vmul.f32 %v3188_v5, %v1679_v41 }
 0x25c   : > { %v1718_v42 = vadd.f32 %v1710_v26, %v1646_v58  ;;  %v1825_v58 = vmul.f32 %v3225_v46, %v1807_v27 }
 0x25d   : > { %v1689_v56 = vpop.permute.xlu1 %1688 }
 0x25e   : > { %v1712_v10 = vmul.f32 %v3188_v5, %v1689_v56  ;;  %v3208_v16 = vadd.f32 %v1766_v48, %v1718_v42  ;;  %v1709_v48 = vmul.f32 %v3188_v5, %v3198_v8  ;;  %v1645_v56 = vadd.f32 %v1637_v15, %v3173_v13 }
 0x260   : > { %v1720_v29 = vadd.f32 %v1712_v10, %v1648_v3  ;;  %v1717_v11 = vadd.f32 %v1709_v48, %v1645_v56 }
 0x261   : > { %v1699_v37 = vpop.permute.xlu1 %1698 }
 0x262   : > { %v1714_v9 = vmul.f32 %v3188_v5, %v1699_v37  ;;  %v3215_v35 = vadd.f32 %v1768_v21, %v1720_v29 }
 0x264   : > { %v1722_v12 = vadd.f32 %v1714_v9, %v1650_v30 }
 0x266   : > { %v1731_v61 = vpop.permute.xlu1 %1730  ;;  %v3227_v38 = vadd.f32 %v1770_v1, %v1722_v12 }
 0x267   : > { %v1764_v23 = vmul.f32 %v3193_v25, %v1731_v61 }
 0x269   : > { %v1772_v51 = vadd.f32 %v1764_v23, %v1716_v53 }
 0x26a   : > { %v1735_v47 = vpop.permute.xlu1 %1734 }
 0x26b   : > { %v1828_v6 = vadd.f32 %v1820_v20, %v1772_v51  ;;  %v1765_v3 = vmul.f32 %v3193_v25, %v1735_v47 }
 0x26d   : > { %v1836_v22 = vmax.f32 %v1828_v6, 0.0  ;;  %v1773_v5 = vadd.f32 %v1765_v3, %v1717_v11 }
 0x26e   : > { %v1743_v39 = vpop.permute.xlu1 %1742 }
 0x26f   : > { %1845 = vst.msk [vmem:[%s3238_s28 + $0x8] sm:$0xff] %vm1843_vm0, %v1836_v22  ;;  %v1767_v2 = vmul.f32 %v3193_v25, %v1743_v39 }
 0x271   : > { %v1775_v60 = vadd.f32 %v1767_v2, %v1719_v28 }
 0x272   : > { %v1751_v33 = vpop.permute.xlu1 %1750 }
 0x273   : > { %v1831_v62 = vadd.f32 %v1823_v4, %v1775_v60  ;;  %v1769_v41 = vmul.f32 %v3193_v25, %v1751_v33 }
 0x275   : > { %v1839_v26 = vmax.f32 %v1831_v62, 0.0  ;;  %v1777_v59 = vadd.f32 %v1769_v41, %v1721_v24 }
 0x277   : > { %1848 = vst.msk [vmem:[%s3238_s28 + $0x20] sm:$0xff] %vm1843_vm0, %v1839_v26  ;;  %v1833_v45 = vadd.f32 %v1825_v58, %v1777_v59  ;;  %v1783_v42 = vpop.permute.xlu1 %1782 }
 0x278   : > { %v1819_v10 = vmul.f32 %v3225_v46, %v1783_v42 }
 0x279   : > { %v1841_v43 = vmax.f32 %v1833_v45, 0.0 }
 0x27a   : > { %v1827_v14 = vadd.f32 %v1819_v10, %v3200_v34 }
 0x27b   : > { %1850 = vst.msk [vmem:[%s3238_s28 + $0x30] sm:$0xff] %vm1843_vm0, %v1841_v43  ;;  %v1791_v49 = vpop.permute.xlu1 %1790 }
 0x27c   : > { %v1835_v8 = vmax.f32 %v1827_v14, 0.0  ;;  %v1821_v44 = vmul.f32 %v3225_v46, %v1791_v49 }
 0x27e   : > { %1844 = vst.msk [vmem:[%s3238_s28] sm:$0xff] %vm1843_vm0, %v1835_v8  ;;  %v1829_v13 = vadd.f32 %v1821_v44, %v1773_v5 }
 0x27f   : > { %v1795_v21 = vpop.permute.xlu1 %1794 }
 0x280   : > { %v1837_v25 = vmax.f32 %v1829_v13, 0.0  ;;  %v1822_v7 = vmul.f32 %v3225_v46, %v1795_v21 }
 0x282   : > { %1846 = vst.msk [vmem:[%s3238_s28 + $0x10] sm:$0xff] %vm1843_vm0, %v1837_v25  ;;  %v1830_v34 = vadd.f32 %v1822_v7, %v3208_v16 }
 0x283   : > { %v1803_v29 = vpop.permute.xlu1 %1802 }
 0x284   : > { %v1838_v37 = vmax.f32 %v1830_v34, 0.0  ;;  %v1824_v30 = vmul.f32 %v3225_v46, %v1803_v29 }
 0x286   : > { %1847 = vst.msk [vmem:[%s3238_s28 + $0x18] sm:$0xff] %vm1843_vm0, %v1838_v37  ;;  %v1832_v9 = vadd.f32 %v1824_v30, %v3215_v35 }
 0x287   : > { %v1811_v63 = vpop.permute.xlu1 %1810 }
 0x288   : > { %v1840_v31 = vmax.f32 %v1832_v9, 0.0  ;;  %v1826_v1 = vmul.f32 %v3225_v46, %v1811_v63 }
 0x28a   : > { %1849 = vst.msk [vmem:[%s3238_s28 + $0x28] sm:$0xff] %vm1843_vm0, %v1840_v31  ;;  %v1834_v12 = vadd.f32 %v1826_v1, %v3227_v38 }
 0x28c   : > { %v1842_v52 = vmax.f32 %v1834_v12, 0.0 }
 0x28e   : > { %1851 = vst.msk [vmem:[%s3238_s28 + $0x38] sm:$0xff] %vm1843_vm0, %v1842_v52 }
 0x28f PF: > { %s13_s12 = sadd.s32 1, %s2081_s12  }
 0x290   : > { %p10_p4 = scmp.ge.s32.totalorder %s13_s12, 4  }
 0x292   :  { %12 = sbr.rel (!%p10_p4) target bundleno = 1 (0x1), region = 90 }

// kernel: detr_forward.5
= control target key start
LH: loop header
LB: loop body
LE: loop exit
PB: predicated region body
PF: predicated region fallthrough
CT: control target
= control target key end

     0   :  { %s6597_s0 = inlined_call_operand.vmem [shape: f32[32,32], index: 0, kind: input, shape index: {}]   ;;  %s6598_s1 = inlined_call_operand.vmem [shape: f32[32,32], index: 1, kind: input, shape index: {}]   ;;  %s6599_s2 = inlined_call_operand.vmem [shape: f32[32,32], index: 2, kind: input, shape index: {}]   ;;  %s6600_s3 = inlined_call_operand.vmem [shape: bf16[2,32,32], index: 3, kind: input, shape index: {}]   ;;  %s6601_s4 = inlined_call_operand.vmem [shape: f32[2,1,32], index: 4, kind: input, shape index: {}]   ;;  %s6602_s5 = inlined_call_operand.vmem [shape: bf16[2,32,32], index: 5, kind: input, shape index: {}]   ;;  %s6603_s6 = inlined_call_operand.vmem [shape: f32[2,1,32], index: 6, kind: input, shape index: {}]   ;;  %s6604_s7 = inlined_call_operand.vmem [shape: bf16[2,32,32], index: 7, kind: input, shape index: {}]   ;;  %s6605_s8 = inlined_call_operand.vmem [shape: f32[2,1,32], index: 8, kind: input, shape index: {}]   ;;  %s6606_s9 = inlined_call_operand.vmem [shape: bf16[2,32,32], index: 9, kind: input, shape index: {}]   ;;  %s6607_s10 = inlined_call_operand.vmem [shape: f32[2,1,32], index: 10, kind: input, shape index: {}]   ;;  %s6608_s11 = inlined_call_operand.vmem [shape: f32[2,1,32], index: 11, kind: input, shape index: {}]   ;;  %s6609_s12 = inlined_call_operand.vmem [shape: f32[2,1,32], index: 12, kind: input, shape index: {}]   ;;  %s6610_s13 = inlined_call_operand.vmem [shape: bf16[2,32,2048], index: 13, kind: input, shape index: {}]   ;;  %s6611_s14 = inlined_call_operand.vmem [shape: f32[2,1,2048], index: 14, kind: input, shape index: {}]   ;;  %s6612_s15 = inlined_call_operand.vmem [shape: bf16[2,2048,32], index: 15, kind: input, shape index: {}]   ;;  %s6613_s16 = inlined_call_operand.vmem [shape: f32[2,1,32], index: 16, kind: input, shape index: {}]   ;;  %s6614_s17 = inlined_call_operand.vmem [shape: f32[2,1,32], index: 17, kind: input, shape index: {}]   ;;  %s6615_s18 = inlined_call_operand.vmem [shape: f32[2,1,32], index: 18, kind: input, shape index: {}]   ;;  %s6616_s19 = inlined_call_operand.vmem [shape: bf16[32,180], index: 19, kind: input, shape index: {}]   ;;  %s6617_s20 = inlined_call_operand.vmem [shape: f32[1,180], index: 20, kind: input, shape index: {}]   ;;  %s6618_s21 = inlined_call_operand.vmem [shape: f32[32,180], index: 21, kind: output, shape index: {}]  }
   0x1   :  { %6629 = sst [smem:[#allocation8_spill]] %s6597_s0 }
   0x2   :  { %6630 = sst [smem:[#allocation9_spill]] %s6598_s1 }
   0x3   :  { %6631 = sst [smem:[#allocation10_spill]] %s6599_s2  ;;  %s5642_s2 = smov 0  }
   0x4   :  { %6632 = sst [smem:[#allocation11_spill]] %s6600_s3 }
   0x5   :  { %6633 = sst [smem:[#allocation12_spill]] %s6601_s4 }
   0x6   :  { %6634 = sst [smem:[#allocation13_spill]] %s6602_s5 }
   0x7   :  { %6635 = sst [smem:[#allocation14_spill]] %s6603_s6 }
   0x8   :  { %6636 = sst [smem:[#allocation15_spill]] %s6604_s7 }
   0x9   :  { %6637 = sst [smem:[#allocation16_spill]] %s6606_s9 }
   0xa   :  { %6638 = sst [smem:[#allocation17_spill]] %s6610_s13 }
   0xb   :  { %6639 = sst [smem:[#allocation18_spill]] %s6611_s14 }
   0xc   :  { %6640 = sst [smem:[#allocation19_spill]] %s6615_s18 }
   0xd   :  { %6641 = sst [smem:[#allocation20_spill]] %s6616_s19 }
   0xe   :  { %6642 = sst [smem:[#allocation21_spill]] %s6617_s20 }
   0xf   :  { %6643 = sst [smem:[#allocation22_spill]] %s6618_s21 }
  0x10 LB: > { %6644 = sst [smem:[#allocation3_spill]] %s5528_s2  ;;  %s5648_s25 = sadd.s32 4294967295, %s5528_s2   ;;  %s5528_s2 = sphi %s5642_s2, %s31_s2  }
  0x11   : > { %6645 = sst [smem:[#allocation4_spill]] %s5648_s25  ;;  %p4642_p0 = scmp.ge.s32.totalorder %s5528_s2, 1 }
  0x12   : > { %p713_p1 = scmp.lt.s32.totalorder %s5528_s2, 3 }
  0x14   : > { %p714_p2 = pnand %p4642_p0, %p713_p1 }
  0x16   : > { %717 = sbr.rel (%p714_p2) target bundleno = 3229 (0xc9d), region = 104 }
  0x1b   : > { %p824_p3 = scmp.lt.s32.totalorder %s5648_s25, 1  ;;  %s6647_s5 = sld [smem:[#allocation11_spill]] }
  0x1c   : > { %s6648_s24 = sld [smem:[#allocation13_spill]] }
  0x1d   : > { %s5654_s26 = scalar_select %p824_p3, %s5648_s25, 1 }
  0x1e   : > { %s6650_s7 = sld [smem:[#allocation15_spill]] }
  0x1f   : > { %s4907_s27 = sshll.u32 %s5654_s26, 4  ;;  %s6651_s9 = sld [smem:[#allocation16_spill]] }
  0x20   : > { %s4911_s6 = sshll.u32 %s5654_s26, 8  ;;  %s6652_s13 = sld [smem:[#allocation17_spill]] }
  0x21   : > { %s5664_s22 = scalar_lea.vmem %s6647_s5, %s4907_s27  ;;  %s6653_s14 = sld [smem:[#allocation18_spill]] }
  0x22   : > { %s5669_s2 = scalar_lea.vmem %s6648_s24, %s4907_s27  ;;  %s4912_s1 = sshll.u32 %s5654_s26, 10 }
  0x23   : > { %s5720_s18 = scalar_lea.vmem %s6612_s15, %s4912_s1 }
  0x24   : > { %s5678_s3 = scalar_lea.vmem %s6650_s7, %s4907_s27 }
  0x25   : > { %s5687_s23 = scalar_lea.vmem %s6651_s9, %s4907_s27 }
  0x26   : > { %s5705_s4 = scalar_lea.vmem %s6652_s13, %s4911_s6  ;;  %s881_s6 = scalar_lea.vmem %s6614_s17, %s5654_s26 }
  0x27   : > { %s5710_s9 = scalar_lea.vmem %s6653_s14, %s4907_s27  ;;  %s6654_s13 = sld [smem:[#allocation19_spill]] }
  0x28   : > { %s6655_s27 = sld [smem:[#allocation4_spill]] }
  0x2d   : > { %s884_s30 = scalar_lea.vmem %s6654_s13, %s5654_s26 }
  0x2e   : > { %p4656_p4 = scmp.ne.s32.totalorder %s6655_s27, 0 }
  0x2f   : > { %s6656_s0 = sld [smem:[#allocation8_spill]] (!%p4656_p4) }
  0x30   : > { %889 = sbr.rel (%p4656_p4) target bundleno = 60 (0x3c), region = 108  ;;  %s6657_s19 = sld [smem:[#allocation9_spill]] (!%p4656_p4) }
  0x35   : > { %v890_v0 = vld [vmem:[%s6656_s0] sm:$0xff]  ;;  %vm902_vm0 = vcmask 261120   ;;  %v891_v2 = vld [vmem:[%s6656_s0 + $0x8] sm:$0xff]  ;;  %v892_v5 = vld [vmem:[%s6656_s0 + $0x10] sm:$0xff] }
  0x36   : > { %v894_v1 = vld [vmem:[%s6657_s19] sm:$0xff]  ;;  %v895_v4 = vld [vmem:[%s6657_s19 + $0x8] sm:$0xff]  ;;  %v896_v6 = vld [vmem:[%s6657_s19 + $0x10] sm:$0xff] }
  0x37   : > { %v898_v3 = vadd.f32 %v894_v1, %v890_v0  ;;  %v899_v7 = vadd.f32 %v895_v4, %v891_v2  ;;  %v900_v8 = vadd.f32 %v896_v6, %v892_v5  ;;  %v893_v9 = vld [vmem:[%s6656_s0 + $0x18] sm:$0xff] }
  0x38   : > { %v897_v10 = vld [vmem:[%s6657_s19 + $0x18] sm:$0xff] }
  0x39   : > { %903 = vst.msk [vmem:[#allocation2] sm:$0xff] %vm902_vm0, %v898_v3  ;;  %v901_v11 = vadd.f32 %v897_v10, %v893_v9  ;;  %904 = vst.msk [vmem:[#allocation2 + $0x8] sm:$0xff] %vm902_vm0, %v899_v7 }
  0x3a   : > { %905 = vst.msk [vmem:[#allocation2 + $0x10] sm:$0xff] %vm902_vm0, %v900_v8 }
  0x3b   : > { %906 = vst.msk [vmem:[#allocation2 + $0x18] sm:$0xff] %vm902_vm0, %v901_v11 }
  0x3c PF: > { %v5296_v12 = vld [vmem:[%s5669_s2 + $0x8] sm:$0xff]   ;;  %v5297_v13 = vld [vmem:[%s5669_s2] sm:$0xff]   ;;  %vm936_vm1 = vcmask 261120   ;;  %v1178_v25 = vlaneseq  ;;  %s6658_s1 = sld [smem:[#allocation14_spill]]  ;;  %s6668_s29 = scalar_lea.vmem %s6605_s8, %s5654_s26 }
  0x3d   : > { %5193 = vmatprep.subr.bf16.mxu1 %v5296_v12  ;;  %v5298_v19 = vld [vmem:[%s5664_s22 + $0x8] sm:$0xff]   ;;  %v5299_v20 = vld [vmem:[%s5664_s22] sm:$0xff]   ;;  %s6660_s25 = sld [smem:[#allocation12_spill]]  ;;  %s6675_s14 = scalar_lea.vmem %s6608_s11, %s5654_s26 }
  0x3e   : > { %5194 = vmatpush3.bf16.msra.mxu1 %v5296_v12  ;;  %5185 = vmatprep.subr.bf16.mxu0 %v5298_v19  ;;  %v5300_v22 = vld [vmem:[%s5678_s3 + $0x8] sm:$0xff]   ;;  %v5301_v23 = vld [vmem:[%s5678_s3] sm:$0xff]   ;;  %v5778_v30 = vand.u32 127, %v1178_v25  ;;  %s6671_s5 = sld [smem:[#allocation10_spill]]  ;;  %s6676_s27 = scalar_lea.vmem %s6609_s12, %s5654_s26 }
  0x3f   : > { %5195 = vmatprep.subr.bf16.mxu1 %v5297_v13  ;;  %5186 = vmatpush3.bf16.msra.mxu0 %v5298_v19 }
  0x40   : > { %v907_v14 = vld [vmem:[#allocation2] sm:$0xff]  ;;  %v908_v15 = vld [vmem:[#allocation2 + $0x8] sm:$0xff]  ;;  %5187 = vmatprep.subr.bf16.mxu0 %v5299_v20  ;;  %vm1181_vm2 = vcmp.lt.s32.totalorder %v5778_v30, 8  ;;  %vm1298_vm3 = vcmp.ge.s32.totalorder %v5778_v30, 8  ;;  %vm1299_vm4 = vcmp.lt.s32.totalorder %v5778_v30, 16  ;;  %vm1526_vm5 = vcmp.ge.s32.totalorder %v5778_v30, 16 }
  0x41   : > { %v909_v16 = vld [vmem:[#allocation2 + $0x10] sm:$0xff]  ;;  %v911_v17 = vpack.c.bf16 %v908_v15, %v907_v14  ;;  %vm1527_vm6 = vcmp.lt.s32.totalorder %v5778_v30, 24  ;;  %vm1703_vm7 = vcmp.ge.s32.totalorder %v5778_v30, 24  ;;  %vm5786_vm8 = vmand %vm1298_vm3, %vm1299_vm4  ;;  %vm1704_vm9 = vcmp.lt.s32.totalorder %v5778_v30, 32 }
  0x42   : > { %v910_v18 = vld [vmem:[#allocation2 + $0x18] sm:$0xff]  ;;  %5196 = vmatpush3.bf16.msra.mxu1 %v5297_v13  ;;  %s6659_s21 = scalar_lea.vmem %s6658_s1, %s5654_s26  ;;  %vm5791_vm10 = vmand %vm1526_vm5, %vm1527_vm6 }
  0x43   : > { %5197 = vmatprep.mubr.msk.bf16.mxu1 %vm936_vm1, %v911_v17  ;;  %5189 = vmatprep.mubr.msk.bf16.mxu0 %vm936_vm1, %v911_v17  ;;  %v912_v21 = vpack.c.bf16 %v910_v18, %v909_v16  ;;  %v4662_v26 = vld [vmem:[%s6659_s21] ss:$0 sm:$0xff]  ;;  %s6661_s13 = scalar_lea.vmem %s6660_s25, %s5654_s26  ;;  %vm5803_vm11 = vmand %vm1703_vm7, %vm1704_vm9  ;;  %s6674_s25 = scalar_lea.vmem %s6607_s10, %s5654_s26 }
  0x44   : > { %5188 = vmatpush3.bf16.msra.mxu0 %v5299_v20  ;;  %v4657_v28 = vld [vmem:[%s6661_s13] ss:$0 sm:$0xff]  ;;  %vm4676_vm12 = vmpackc.low %vm5786_vm8, %vm5786_vm8  ;;  %v5895_v30 = vld [vmem:[%s6671_s5 + $0x10] sm:$0xff] }
  0x45   : > { %5198 = vmatmul.mubr.msk.bf16.vlgmr.msra.gmra.mxu1 %vm936_vm1, %v912_v21  ;;  %5201 = vmatprep.subr.bf16.mxu0 %v5300_v22  ;;  %v4667_v16 = vld [vmem:[%s6668_s29] ss:$0 sm:$0xff]  ;;  %vm4684_vm13 = vmpackc.low %vm1181_vm2, %vm1181_vm2  ;;  %v5908_v38 = vld [vmem:[%s6671_s5 + $0x8] sm:$0xff] }
  0x46   : > { %vm5882_vm14 = vmpackc.low %vm5791_vm10, %vm5791_vm10 }
  0x47   : > { %5190 = vmatmul.mubr.msk.bf16.vlgmr.msra.gmra.mxu0 %vm936_vm1, %v912_v21  ;;  %vm6030_vm15 = vmpackc.low %vm5803_vm11, %vm5803_vm11 }
  0x48   : > { %5202 = vmatpush3.bf16.msra.mxu0 %v5300_v22  ;;  %5205 = vmatprep.mubr.msk.bf16.mxu0 %vm936_vm1, %v911_v17 }
  0x49   : > { %5203 = vmatprep.subr.bf16.mxu0 %v5301_v23 }
  0x4c   : > { %5204 = vmatpush3.bf16.msra.mxu0 %v5301_v23 }
  0x4f   : > { %5206 = vmatmul.mubr.msk.bf16.vlgmr.msra.gmra.mxu0 %vm936_vm1, %v912_v21 }
 0x105   : > { %v5199_v24 = vpop.f32.mrf.mxu1 }
 0x106   : > { %v1062_v48 = vadd.f32 %v5199_v24, %v4662_v26 }
 0x107   : > { %v1053_v27 = vpop.f32.mrf.mxu1  ;;  %v5191_v32 = vpop.f32.mrf.mxu0 }
 0x108   : > { %v1054_v29 = vadd.f32 %v4662_v26, %v1053_v27  ;;  %v986_v33 = vadd.f32 %v5191_v32, %v4657_v28  ;;  %v5900_v32 = vld [vmem:[%s6671_s5] sm:$0xff] }
 0x109   : > { %v5200_v31 = vpop.f32.mrf.mxu1  ;;  %v977_v35 = vpop.f32.mrf.mxu0 }
 0x10a   : > { %1140 = vxpose.xlu0.b32.start [1/4] (short) (narrow) %v1054_v29, 32  ;;  %v994_v37 = vmul.f32 0.35355338, %v986_v33  ;;  %v978_v40 = vadd.f32 %v4657_v28, %v977_v35  ;;  %v1065_v53 = vadd.f32 %v5200_v31, %v4662_v26 }
 0x10b   : > { %v1056_v34 = vpop.f32.mrf.mxu1  ;;  %v5192_v41 = vpop.f32.mrf.mxu0 }
 0x10c   : > { %v1057_v36 = vadd.f32 %v4662_v26, %v1056_v34  ;;  %v5797_v42 = vsel %vm1181_vm2, %v994_v37, 0.0  ;;  %v1305_v43 = vsel %vm5786_vm8, %v994_v37, 0.0  ;;  %v1533_v44 = vsel %vm5791_vm10, %v994_v37, 0.0 }
 0x10d   : > { %v989_v46 = vadd.f32 %v5192_v41, %v4657_v28  ;;  %v980_v47 = vpop.f32.mrf.mxu0  ;;  %v1710_v50 = vsel %vm5803_vm11, %v994_v37, 0.0  ;;  %v992_v51 = vmul.f32 0.35355338, %v978_v40 }
 0x10e   : > { %1141 = vxpose.xlu0.b32.cont [2/4] (short) (narrow) %v1057_v36, 32  ;;  %v981_v49 = vadd.f32 %v4657_v28, %v980_v47 }
 0x10f   : > { %v995_v52 = vmul.f32 0.35355338, %v989_v46  ;;  %v1185_v63 = vsel %vm1181_vm2, %v992_v51, 0.0  ;;  %v1303_v1 = vsel %vm5786_vm8, %v992_v51, 0.0  ;;  %v1531_v4 = vsel %vm5791_vm10, %v992_v51, 0.0  ;;  %v5207_v12 = vpop.f32.mrf.mxu0 }
 0x110   : > { %v993_v54 = vmul.f32 0.35355338, %v981_v49  ;;  %v1708_v7 = vsel %vm5803_vm11, %v992_v51, 0.0  ;;  %v1134_v20 = vadd.f32 %v5207_v12, %v4667_v16 }
 0x111   : > { %v1188_v55 = vsel %vm1181_vm2, %v995_v52, 0.0  ;;  %v1306_v56 = vsel %vm5786_vm8, %v995_v52, 0.0  ;;  %v1534_v57 = vsel %vm5791_vm10, %v995_v52, 0.0  ;;  %v1711_v58 = vsel %vm5803_vm11, %v995_v52, 0.0  ;;  %v1125_v14 = vpop.f32.mrf.mxu0 }
 0x112   : > { %1142 = vxpose.xlu0.b32.cont [3/4] (short) (narrow) %v1062_v48, 32  ;;  %v1190_v59 = vpack.c.bf16 %v1188_v55, %v5797_v42  ;;  %v1308_v60 = vpack.c.bf16 %v1306_v56, %v1305_v43  ;;  %v5818_v61 = vpack.c.bf16 %v1534_v57, %v1533_v44  ;;  %v5820_v62 = vpack.c.bf16 %v1711_v58, %v1710_v50  ;;  %v5915_v42 = vld [vmem:[%s6671_s5 + $0x18] sm:$0xff] }
 0x113   : > { %v1186_v0 = vsel %vm1181_vm2, %v993_v54, 0.0  ;;  %v1304_v3 = vsel %vm5786_vm8, %v993_v54, 0.0  ;;  %v1532_v6 = vsel %vm5791_vm10, %v993_v54, 0.0  ;;  %v1709_v8 = vsel %vm5803_vm11, %v993_v54, 0.0  ;;  %v5208_v17 = vpop.f32.mrf.mxu0 }
 0x114   : > { %v1189_v2 = vpack.c.bf16 %v1186_v0, %v1185_v63  ;;  %v1307_v5 = vpack.c.bf16 %v1304_v3, %v1303_v1  ;;  %v5839_v9 = vpack.c.bf16 %v1532_v6, %v1531_v4  ;;  %v5841_v10 = vpack.c.bf16 %v1709_v8, %v1708_v7 }
 0x115   : > { %v1137_v21 = vadd.f32 %v5208_v17, %v4667_v16  ;;  %v1128_v22 = vpop.f32.mrf.mxu0  ;;  %v1126_v24 = vadd.f32 %v4667_v16, %v1125_v14 }
 0x116   : > { %1143 = vxpose.xlu0.b32.end [4/4] (short) (narrow) %v1065_v53, 32  ;;  %5213 = vmatprep.mubr.msk.bf16.mxu1 %vm936_vm1, %v1189_v2  ;;  %v1129_v27 = vadd.f32 %v4667_v16, %v1128_v22 }
 0x117   : > { %5221 = vmatprep.mubr.msk.bf16.mxu0 %vm936_vm1, %v1307_v5  ;;  %v5859_v26 = vpack.c.bf16 %v1137_v21, %v1134_v20 }
 0x118   : > { %v5869_v28 = vpack.c.bf16 %v1129_v27, %v1126_v24 }
 0x186   : > { %v1156_v11 = vpop.trf.xlu0 }
 0x18a   : > { %v1157_v13 = vpop.trf.xlu0 }
 0x18b   : > { %v5851_v23 = vpack.c.bf16 %v1157_v13, %v1156_v11 }
 0x18e   : > { %v1158_v15 = vpop.trf.xlu0 }
 0x192   : > { %v1159_v18 = vpop.trf.xlu0 }
 0x193   : > { %v5849_v19 = vpack.c.bf16 %v1159_v18, %v1158_v15 }
 0x195   : > { %5209 = vmatprep.subr.bf16.mxu1 %v5849_v19  ;;  %5217 = vmatprep.subr.bf16.mxu0 %v5849_v19 }
 0x196   : > { %5210 = vmatpush3.bf16.msra.mxu1 %v5849_v19  ;;  %5218 = vmatpush3.bf16.msra.mxu0 %v5849_v19 }
 0x197   : > { %5211 = vmatprep.subr.bf16.mxu1 %v5851_v23  ;;  %5219 = vmatprep.subr.bf16.mxu0 %v5851_v23 }
 0x19a   : > { %5212 = vmatpush3.bf16.msra.mxu1 %v5851_v23  ;;  %5220 = vmatpush3.bf16.msra.mxu0 %v5851_v23 }
 0x19b   : > { %5225 = vmatprep.subr.msk.bf16.mxu1 %vm4676_vm12, %v5859_v26  ;;  %5233 = vmatprep.subr.msk.bf16.mxu0 %vm4684_vm13, %v5859_v26 }
 0x19d   : > { %5214 = vmatmul.mubr.msk.bf16.vlgmr.msra.gmra.mxu1 %vm936_vm1, %v1190_v59  ;;  %5222 = vmatmul.mubr.msk.bf16.vlgmr.msra.gmra.mxu0 %vm936_vm1, %v1308_v60 }
 0x19e   : > { %5226 = vmatpush3.bf16.msk.msra.mxu1 %vm4676_vm12, %v5859_v26  ;;  %5234 = vmatpush3.bf16.msk.msra.mxu0 %vm4684_vm13, %v5859_v26 }
 0x19f   : > { %5227 = vmatprep.subr.msk.bf16.mxu1 %vm4676_vm12, %v5869_v28  ;;  %5235 = vmatprep.subr.msk.bf16.mxu0 %vm4684_vm13, %v5869_v28 }
 0x1a2   : > { %5228 = vmatpush3.bf16.msk.msra.mxu1 %vm4676_vm12, %v5869_v28  ;;  %5236 = vmatpush3.bf16.msk.msra.mxu0 %vm4684_vm13, %v5869_v28 }
 0x1a3   : > { %5241 = vmatprep.subr.bf16.mxu1 %v5849_v19  ;;  %5249 = vmatprep.subr.msk.bf16.mxu0 %vm5882_vm14, %v5859_v26 }
 0x25d   : > { %v5223_v31 = vpop.f32.mrf.mxu0  ;;  %v5215_v63 = vpop.f32.mrf.mxu1 }
 0x25e   : > { %v1358_v33 = vadd.f32 %v5223_v31, %v5895_v30  ;;  %v5931_v14 = vadd.f32 %v5215_v63, %v5895_v30 }
 0x25f   : > { %v1349_v34 = vpop.f32.mrf.mxu0  ;;  %v1231_v2 = vpop.f32.mrf.mxu1 }
 0x260   : > { %v1350_v35 = vadd.f32 %v1349_v34, %v5900_v32  ;;  %v1370_v36 = vsel %vm936_vm1, %v1358_v33, -inf  ;;  %v5924_v7 = vadd.f32 %v1231_v2, %v5900_v32  ;;  %v1252_v17 = vsel %vm936_vm1, %v5931_v14, -inf }
 0x261   : > { %1371 = vmax.xlane.f32.xlu1 %v1370_v36  ;;  %v5224_v37 = vpop.f32.mrf.mxu0  ;;  %v5216_v5 = vpop.f32.mrf.mxu1 }
 0x262   : > { %v1364_v41 = vsel %vm936_vm1, %v1350_v35, -inf  ;;  %v1361_v43 = vadd.f32 %v5224_v37, %v5915_v42  ;;  %v1246_v13 = vsel %vm936_vm1, %v5924_v7, -inf  ;;  %v5935_v16 = vadd.f32 %v5216_v5, %v5915_v42 }
 0x263   : > { %v1352_v39 = vpop.f32.mrf.mxu0  ;;  %v1234_v11 = vpop.f32.mrf.mxu1 }
 0x264   : > { %v1353_v40 = vadd.f32 %v1352_v39, %v5908_v38  ;;  %v1373_v46 = vsel %vm936_vm1, %v1361_v43, -inf  ;;  %v1235_v12 = vadd.f32 %v1234_v11, %v5908_v38  ;;  %v1255_v18 = vsel %vm936_vm1, %v5935_v16, -inf }
 0x265   : > { %1365 = vmax.xlane.f32.xlu1 %v1364_v41 }
 0x266   : > { %v1367_v44 = vsel %vm936_vm1, %v1353_v40, -inf  ;;  %v1249_v15 = vsel %vm936_vm1, %v1235_v12, -inf }
 0x269   : > { %1368 = vmax.xlane.f32.xlu1 %v1367_v44 }
 0x26d   : > { %1374 = vmax.xlane.f32.xlu1 %v1373_v46 }
 0x2ea   : > { %v1372_v47 = vpop.xlane.xlu1 %1371 }
 0x2eb   : > { %v1378_v48 = vsub.f32 %v1358_v33, %v1372_v47 }
 0x2ed   : > { %v1384_v49 = vmul.f32 1.442695, %v1378_v48 }
 0x2ee   : > { %v1366_v50 = vpop.xlane.xlu1 %1365 }
 0x2ef   : > { %5432 = vpow2.f32 %v1384_v49  ;;  %v1376_v51 = vsub.f32 %v1350_v35, %v1366_v50 }
 0x2f1   : > { %v1380_v52 = vmul.f32 1.442695, %v1376_v51 }
 0x2f2   : > { %v1369_v53 = vpop.xlane.xlu1 %1368 }
 0x2f3   : > { %5434 = vpow2.f32 %v1380_v52  ;;  %v1377_v54 = vsub.f32 %v1353_v40, %v1369_v53 }
 0x2f5   : > { %v1382_v55 = vmul.f32 1.442695, %v1377_v54 }
 0x2f6   : > { %v1375_v56 = vpop.xlane.xlu1 %1374 }
 0x2f7   : > { %5436 = vpow2.f32 %v1382_v55  ;;  %v1379_v57 = vsub.f32 %v1361_v43, %v1375_v56 }
 0x2f9   : > { %v1386_v58 = vmul.f32 1.442695, %v1379_v57 }
 0x2fb   : > { %5438 = vpow2.f32 %v1386_v58 }
 0x2fc   : > { %v5433_v59 = vpop.eup %5432 }
 0x2fd   : > { %v1394_v60 = vsel %vm936_vm1, %v5433_v59, 0.0 }
 0x2fe   : > { %1395 = vadd.xlane.f32.xlu1 %v1394_v60 }
 0x300   : > { %v5435_v0 = vpop.eup %5434 }
 0x301   : > { %v1388_v1 = vsel %vm936_vm1, %v5435_v0, 0.0 }
 0x302   : > { %1389 = vadd.xlane.f32.xlu0 %v1388_v1 }
 0x304   : > { %v5437_v3 = vpop.eup %5436 }
 0x305   : > { %v1391_v4 = vsel %vm936_vm1, %v5437_v3, 0.0 }
 0x306   : > { %1392 = vadd.xlane.f32.xlu1 %v1391_v4 }
 0x308   : > { %v5439_v6 = vpop.eup %5438 }
 0x309   : > { %v1397_v8 = vsel %vm936_vm1, %v5439_v6, 0.0 }
 0x30a   : > { %1398 = vadd.xlane.f32.xlu1 %v1397_v8 }
 0x30e   : > { %1247 = vmax.xlane.f32.xlu1 %v1246_v13 }
 0x312   : > { %1250 = vmax.xlane.f32.xlu1 %v1249_v15 }
 0x316   : > { %1253 = vmax.xlane.f32.xlu1 %v1252_v17 }
 0x31a   : > { %1256 = vmax.xlane.f32.xlu1 %v1255_v18 }
 0x387   : > { %v1396_v20 = vpop.xlane.xlu1 %1395 }
 0x38b   : > { %v1390_v21 = vpop.xlane.xlu0 %1389 }
 0x38c   : > { %5440 = vrcp.f32 %v1390_v21 }
 0x38f   : > { %v1393_v22 = vpop.xlane.xlu1 %1392 }
 0x390   : > { %5442 = vrcp.f32 %v1393_v22 }
 0x391   : > { %5444 = vrcp.f32 %v1396_v20 }
 0x393   : > { %v1399_v24 = vpop.xlane.xlu1 %1398 }
 0x394   : > { %5446 = vrcp.f32 %v1399_v24 }
 0x399   : > { %v5441_v27 = vpop.eup %5440 }
 0x39a   : > { %v1404_v33 = vmul.f32 %v5441_v27, %v5435_v0 }
 0x39d   : > { %v5443_v31 = vpop.eup %5442 }
 0x39e   : > { %v1405_v34 = vmul.f32 %v5443_v31, %v5437_v3  ;;  %v5445_v35 = vpop.eup %5444 }
 0x39f   : > { %v1406_v39 = vmul.f32 %v5445_v35, %v5433_v59 }
 0x3a0   : > { %v1414_v36 = vpack.c.bf16 %v1405_v34, %v1404_v33 }
 0x3a1   : > { %v5447_v37 = vpop.eup %5446 }
 0x3a2   : > { %5229 = vmatprep.mubr.msk.bf16.mxu1 %vm936_vm1, %v1414_v36  ;;  %v1407_v40 = vmul.f32 %v5447_v37, %v5439_v6 }
 0x3a4   : > { %v1415_v41 = vpack.c.bf16 %v1407_v40, %v1406_v39 }
 0x3a6   : > { %5230 = vmatmul.mubr.msk.bf16.vlgmr.msra.gmra.mxu1 %vm936_vm1, %v1415_v41 }
 0x3a7   : > { %5242 = vmatpush3.bf16.msra.mxu1 %v5849_v19  ;;  %5245 = vmatprep.mubr.msk.bf16.mxu1 %vm936_vm1, %v5839_v9  ;;  %v1248_v9 = vpop.xlane.xlu1 %1247 }
 0x3a8   : > { %5243 = vmatprep.subr.bf16.mxu1 %v5851_v23  ;;  %v1258_v51 = vsub.f32 %v5924_v7, %v1248_v9 }
 0x3aa   : > { %v1262_v57 = vmul.f32 1.442695, %v1258_v51 }
 0x3ab   : > { %5244 = vmatpush3.bf16.msra.mxu1 %v5851_v23  ;;  %v1251_v43 = vpop.xlane.xlu1 %1250 }
 0x3ac   : > { %5257 = vmatprep.subr.bf16.mxu1 %v5849_v19 }
 0x3ae   : > { %5246 = vmatmul.mubr.msk.bf16.vlgmr.msra.gmra.mxu1 %vm936_vm1, %v5818_v61 }
 0x3af   : > { %5258 = vmatpush3.bf16.msra.mxu1 %v5849_v19  ;;  %5261 = vmatprep.mubr.msk.bf16.mxu1 %vm936_vm1, %v5841_v10  ;;  %v1254_v47 = vpop.xlane.xlu1 %1253  ;;  %v1259_v10 = vsub.f32 %v1235_v12, %v1251_v43 }
 0x3b0   : > { %5259 = vmatprep.subr.bf16.mxu1 %v5851_v23  ;;  %v1260_v58 = vsub.f32 %v5931_v14, %v1254_v47 }
 0x3b1   : > { %v1264_v54 = vmul.f32 1.442695, %v1259_v10 }
 0x3b2   : > { %v1266_v2 = vmul.f32 1.442695, %v1260_v58 }
 0x3b3   : > { %5260 = vmatpush3.bf16.msra.mxu1 %v5851_v23  ;;  %v1257_v50 = vpop.xlane.xlu1 %1256  ;;  %5448 = vpow2.f32 %v1264_v54 }
 0x3b4   : > { %v1261_v55 = vsub.f32 %v5935_v16, %v1257_v50  ;;  %5450 = vpow2.f32 %v1262_v57 }
 0x3b6   : > { %5262 = vmatmul.mubr.msk.bf16.vlgmr.msra.gmra.mxu1 %vm936_vm1, %v5820_v62  ;;  %v1268_v0 = vmul.f32 1.442695, %v1261_v55 }
 0x3b8   : > { %5452 = vpow2.f32 %v1268_v0 }
 0x3b9   : > { %5454 = vpow2.f32 %v1266_v2 }
 0x3c0   : > { %v5984_v17 = vpop.eup %5448 }
 0x466   : > { %v5958_v44 = vpop.f32.mrf.mxu1 }
 0x468   : > { %v5960_v46 = vpop.f32.mrf.mxu1 }
 0x46a   : > { %v5962_v61 = vpop.f32.mrf.mxu1 }
 0x46c   : > { %v5964_v19 = vpop.f32.mrf.mxu1 }
 0x46e   : > { %v5247_v48 = vpop.f32.mrf.mxu1 }
 0x46f   : > { %v1586_v49 = vadd.f32 %v5247_v48, %v5895_v30 }
 0x470   : > { %v1577_v23 = vpop.f32.mrf.mxu1 }
 0x471   : > { %v1578_v62 = vadd.f32 %v1577_v23, %v5900_v32  ;;  %v1598_v52 = vsel %vm936_vm1, %v1586_v49, -inf }
 0x472   : > { %v5248_v53 = vpop.f32.mrf.mxu1  ;;  %1599 = vmax.xlane.f32.xlu1 %v1598_v52 }
 0x473   : > { %v1592_v60 = vsel %vm936_vm1, %v1578_v62, -inf  ;;  %v1589_v3 = vadd.f32 %v5248_v53, %v5915_v42 }
 0x474   : > { %v1580_v56 = vpop.f32.mrf.mxu1 }
 0x475   : > { %v1581_v59 = vadd.f32 %v1580_v56, %v5908_v38  ;;  %v1601_v11 = vsel %vm936_vm1, %v1589_v3, -inf }
 0x476   : > { %v5263_v63 = vpop.f32.mrf.mxu1  ;;  %1593 = vmax.xlane.f32.xlu1 %v1592_v60 }
 0x477   : > { %v1595_v4 = vsel %vm936_vm1, %v1581_v59, -inf  ;;  %v1763_v14 = vadd.f32 %v5263_v63, %v5895_v30 }
 0x478   : > { %v1754_v1 = vpop.f32.mrf.mxu1 }
 0x479   : > { %v1755_v7 = vadd.f32 %v1754_v1, %v5900_v32  ;;  %v1775_v32 = vsel %vm936_vm1, %v1763_v14, -inf }
 0x47a   : > { %v5264_v5 = vpop.f32.mrf.mxu1  ;;  %1596 = vmax.xlane.f32.xlu1 %v1595_v4 }
 0x47b   : > { %v1766_v12 = vadd.f32 %v5264_v5, %v5915_v42  ;;  %v1769_v15 = vsel %vm936_vm1, %v1755_v7, -inf  ;;  %v1273_v42 = vsel %vm936_vm1, %v5984_v17, 0.0 }
 0x47c   : > { %v1757_v6 = vpop.f32.mrf.mxu1 }
 0x47d   : > { %v1758_v8 = vadd.f32 %v1757_v6, %v5908_v38  ;;  %v1778_v16 = vsel %vm936_vm1, %v1766_v12, -inf  ;;  %v5987_v38 = vpop.eup %5450 }
 0x47e   : > { %1602 = vmax.xlane.f32.xlu1 %v1601_v11  ;;  %v5991_v18 = vpop.eup %5452  ;;  %v1270_v30 = vsel %vm936_vm1, %v5987_v38, 0.0 }
 0x47f   : > { %v1772_v13 = vsel %vm936_vm1, %v1758_v8, -inf  ;;  %v5995_v20 = vpop.eup %5454  ;;  %v1279_v21 = vsel %vm936_vm1, %v5991_v18, 0.0 }
 0x480   : > { %1773 = vmax.xlane.f32.xlu0 %v1772_v13  ;;  %v1276_v22 = vsel %vm936_vm1, %v5995_v20, 0.0 }
 0x482   : > { %1770 = vmax.xlane.f32.xlu1 %v1769_v15 }
 0x484   : > { %1779 = vmax.xlane.f32.xlu0 %v1778_v16 }
 0x486   : > { %1776 = vmax.xlane.f32.xlu1 %v1775_v32 }
 0x488   : > { %1274 = vadd.xlane.f32.xlu0 %v1273_v42 }
 0x48a   : > { %1271 = vadd.xlane.f32.xlu1 %v1270_v30 }
 0x48c   : > { %1280 = vadd.xlane.f32.xlu0 %v1279_v21 }
 0x48e   : > { %1277 = vadd.xlane.f32.xlu1 %v1276_v22 }
 0x4fb   : > { %v1600_v24 = vpop.xlane.xlu1 %1599 }
 0x4fc   : > { %v1606_v27 = vsub.f32 %v1586_v49, %v1600_v24 }
 0x4fe   : > { %v1612_v34 = vmul.f32 1.442695, %v1606_v27 }
 0x4ff   : > { %v1594_v31 = vpop.xlane.xlu1 %1593 }
 0x500   : > { %v1604_v33 = vsub.f32 %v1578_v62, %v1594_v31 }
 0x502   : > { %v1608_v35 = vmul.f32 1.442695, %v1604_v33 }
 0x503   : > { %v1597_v36 = vpop.xlane.xlu1 %1596 }
 0x504   : > { %5456 = vpow2.f32 %v1608_v35  ;;  %v1605_v37 = vsub.f32 %v1581_v59, %v1597_v36 }
 0x505   : > { %5458 = vpow2.f32 %v1612_v34 }
 0x506   : > { %v1610_v39 = vmul.f32 1.442695, %v1605_v37 }
 0x507   : > { %v1603_v40 = vpop.xlane.xlu1 %1602 }
 0x508   : > { %5460 = vpow2.f32 %v1610_v39  ;;  %v1607_v41 = vsub.f32 %v1589_v3, %v1603_v40 }
 0x509   : > { %v1774_v9 = vpop.xlane.xlu0 %1773 }
 0x50a   : > { %v1614_v43 = vmul.f32 1.442695, %v1607_v41  ;;  %v1782_v47 = vsub.f32 %v1758_v8, %v1774_v9 }
 0x50b   : > { %v1771_v48 = vpop.xlane.xlu1 %1770 }
 0x50c   : > { %5462 = vpow2.f32 %v1614_v43  ;;  %v1787_v10 = vmul.f32 1.442695, %v1782_v47  ;;  %v1781_v50 = vsub.f32 %v1755_v7, %v1771_v48 }
 0x50d   : > { %v1780_v49 = vpop.xlane.xlu0 %1779 }
 0x50e   : > { %5464 = vpow2.f32 %v1787_v10  ;;  %v1785_v23 = vmul.f32 1.442695, %v1781_v50  ;;  %v1784_v51 = vsub.f32 %v1766_v12, %v1780_v49 }
 0x50f   : > { %v1777_v62 = vpop.xlane.xlu1 %1776 }
 0x510   : > { %5466 = vpow2.f32 %v1785_v23  ;;  %v1791_v52 = vmul.f32 1.442695, %v1784_v51  ;;  %v1783_v53 = vsub.f32 %v1763_v14, %v1777_v62 }
 0x511   : > { %v6001_v54 = vpop.eup %5456  ;;  %v1275_v55 = vpop.xlane.xlu0 %1274 }
 0x512   : > { %5468 = vpow2.f32 %v1791_v52  ;;  %v1789_v56 = vmul.f32 1.442695, %v1783_v53  ;;  %v1616_v57 = vsel %vm936_vm1, %v6001_v54, 0.0  ;;  %v6005_v58 = vpop.eup %5458 }
 0x513   : > { %5470 = vrcp.f32 %v1275_v55  ;;  %1617 = vadd.xlane.f32.xlu1 %v1616_v57  ;;  %v1272_v59 = vpop.xlane.xlu1 %1271  ;;  %v1622_v0 = vsel %vm936_vm1, %v6005_v58, 0.0  ;;  %v5303_v57 = vld [vmem:[%s5687_s23] sm:$0xff]  }
 0x514   : > { %5472 = vpow2.f32 %v1789_v56 }
 0x515   : > { %v5461_v60 = vpop.eup %5460  ;;  %5474 = vrcp.f32 %v1272_v59  ;;  %v1281_v63 = vpop.xlane.xlu0 %1280 }
 0x516   : > { %5476 = vrcp.f32 %v1281_v63  ;;  %v1619_v1 = vsel %vm936_vm1, %v5461_v60, 0.0 }
 0x517   : > { %1623 = vadd.xlane.f32.xlu1 %v1622_v0  ;;  %1620 = vadd.xlane.f32.xlu0 %v1619_v1  ;;  %v1278_v2 = vpop.xlane.xlu1 %1277 }
 0x518   : > { %5478 = vrcp.f32 %v1278_v2 }
 0x519   : > { %v5463_v3 = vpop.eup %5462 }
 0x51a   : > { %v1625_v4 = vsel %vm936_vm1, %v5463_v3, 0.0 }
 0x51b   : > { %v5465_v5 = vpop.eup %5464  ;;  %1626 = vadd.xlane.f32.xlu0 %v1625_v4 }
 0x51c   : > { %v1796_v7 = vsel %vm936_vm1, %v5465_v5, 0.0 }
 0x51d   : > { %v5467_v6 = vpop.eup %5466 }
 0x51e   : > { %v1793_v8 = vsel %vm936_vm1, %v5467_v6, 0.0 }
 0x51f   : > { %v5469_v11 = vpop.eup %5468  ;;  %1797 = vadd.xlane.f32.xlu0 %v1796_v7  ;;  %1794 = vadd.xlane.f32.xlu1 %v1793_v8 }
 0x520   : > { %v5471_v12 = vpop.eup %5470  ;;  %v1802_v15 = vsel %vm936_vm1, %v5469_v11, 0.0 }
 0x521   : > { %v5473_v13 = vpop.eup %5472  ;;  %v1287_v30 = vmul.f32 %v5471_v12, %v5984_v17  ;;  %v5512_v17 = vld [vmem:[#allocation2] sm:$0xff] }
 0x522   : > { %v5475_v14 = vpop.eup %5474  ;;  %v1799_v16 = vsel %vm936_vm1, %v5473_v13, 0.0 }
 0x523   : > { %v5477_v32 = vpop.eup %5476  ;;  %1803 = vadd.xlane.f32.xlu0 %v1802_v15  ;;  %1800 = vadd.xlane.f32.xlu1 %v1799_v16  ;;  %v1286_v42 = vmul.f32 %v5475_v14, %v5987_v38 }
 0x524   : > { %v1289_v27 = vmul.f32 %v5477_v32, %v5991_v18 }
 0x525   : > { %v5479_v21 = vpop.eup %5478  ;;  %v1296_v22 = vpack.c.bf16 %v1287_v30, %v1286_v42 }
 0x526   : > { %v1288_v24 = vmul.f32 %v5479_v21, %v5995_v20 }
 0x527   : > { %5237 = vmatprep.mubr.msk.bf16.mxu0 %vm936_vm1, %v1296_v22 }
 0x528   : > { %v1297_v31 = vpack.c.bf16 %v1289_v27, %v1288_v24 }
 0x52a   : > { %5238 = vmatmul.mubr.msk.bf16.vlgmr.msra.gmra.mxu0 %vm936_vm1, %v1297_v31 }
 0x52b   : > { %5250 = vmatpush3.bf16.msk.msra.mxu0 %vm5882_vm14, %v5859_v26 }
 0x52c   : > { %5251 = vmatprep.subr.msk.bf16.mxu0 %vm5882_vm14, %v5869_v28 }
 0x52f   : > { %5252 = vmatpush3.bf16.msk.msra.mxu0 %vm5882_vm14, %v5869_v28 }
 0x530   : > { %5265 = vmatprep.subr.msk.bf16.mxu0 %vm6030_vm15, %v5859_v26 }
 0x59c   : > { %v1618_v38 = vpop.xlane.xlu1 %1617 }
 0x59d   : > { %5480 = vrcp.f32 %v1618_v38 }
 0x5a0   : > { %v1621_v18 = vpop.xlane.xlu0 %1620  ;;  %v1624_v20 = vpop.xlane.xlu1 %1623 }
 0x5a1   : > { %5482 = vrcp.f32 %v1621_v18 }
 0x5a2   : > { %5484 = vrcp.f32 %v1624_v20 }
 0x5a4   : > { %v1627_v45 = vpop.xlane.xlu0 %1626 }
 0x5a5   : > { %5486 = vrcp.f32 %v1627_v45 }
 0x5a8   : > { %v1798_v33 = vpop.xlane.xlu0 %1797  ;;  %v1795_v34 = vpop.xlane.xlu1 %1794 }
 0x5a9   : > { %5488 = vrcp.f32 %v1798_v33 }
 0x5aa   : > { %5490 = vrcp.f32 %v1795_v34  ;;  %v5481_v35 = vpop.eup %5480  ;;  %v5513_v34 = vld [vmem:[#allocation2 + $0x10] sm:$0xff] }
 0x5ab   : > { %v1632_v39 = vmul.f32 %v5481_v35, %v6001_v54 }
 0x5ac   : > { %v1804_v36 = vpop.xlane.xlu0 %1803  ;;  %v1801_v29 = vpop.xlane.xlu1 %1800 }
 0x5ad   : > { %5492 = vrcp.f32 %v1804_v36  ;;  %v5514_v36 = vld [vmem:[#allocation2 + $0x8] sm:$0xff] }
 0x5ae   : > { %v5483_v37 = vpop.eup %5482  ;;  %5494 = vrcp.f32 %v1801_v29 }
 0x5af   : > { %v1633_v40 = vmul.f32 %v5483_v37, %v5461_v60  ;;  %v5485_v41 = vpop.eup %5484 }
 0x5b0   : > { %v1634_v47 = vmul.f32 %v5485_v41, %v6005_v58 }
 0x5b1   : > { %v1642_v9 = vpack.c.bf16 %v1633_v40, %v1632_v39  ;;  %v5515_v40 = vld [vmem:[#allocation2 + $0x18] sm:$0xff] }
 0x5b2   : > { %v5487_v43 = vpop.eup %5486 }
 0x5b3   : > { %5253 = vmatprep.mubr.msk.bf16.mxu0 %vm936_vm1, %v1642_v9  ;;  %v1635_v48 = vmul.f32 %v5487_v43, %v5463_v3 }
 0x5b5   : > { %v1643_v10 = vpack.c.bf16 %v1635_v48, %v1634_v47 }
 0x5b6   : > { %v5489_v50 = vpop.eup %5488 }
 0x5b7   : > { %v5491_v49 = vpop.eup %5490  ;;  %5254 = vmatmul.mubr.msk.bf16.vlgmr.msra.gmra.mxu0 %vm936_vm1, %v1643_v10  ;;  %v1810_v23 = vmul.f32 %v5489_v50, %v5465_v5 }
 0x5b8   : > { %5266 = vmatpush3.bf16.msk.msra.mxu0 %vm6030_vm15, %v5859_v26  ;;  %v1809_v51 = vmul.f32 %v5491_v49, %v5467_v6  ;;  %v5302_v26 = vld [vmem:[%s5687_s23 + $0x8] sm:$0xff]  }
 0x5b9   : > { %5267 = vmatprep.subr.msk.bf16.mxu0 %vm6030_vm15, %v5869_v28  ;;  %5273 = vmatprep.subr.bf16.mxu1 %v5302_v26 }
 0x5ba   : > { %v5493_v62 = vpop.eup %5492  ;;  %v1819_v52 = vpack.c.bf16 %v1810_v23, %v1809_v51  ;;  %5274 = vmatpush3.bf16.msra.mxu1 %v5302_v26 }
 0x5bb   : > { %v5495_v53 = vpop.eup %5494  ;;  %v1812_v54 = vmul.f32 %v5493_v62, %v5469_v11  ;;  %5275 = vmatprep.subr.bf16.mxu1 %v5303_v57 }
 0x5bc   : > { %5268 = vmatpush3.bf16.msk.msra.mxu0 %vm6030_vm15, %v5869_v28  ;;  %5269 = vmatprep.mubr.msk.bf16.mxu0 %vm936_vm1, %v1819_v52  ;;  %v1811_v55 = vmul.f32 %v5495_v53, %v5473_v13 }
 0x5be   : > { %v1820_v56 = vpack.c.bf16 %v1812_v54, %v1811_v55  ;;  %5276 = vmatpush3.bf16.msra.mxu1 %v5303_v57 }
 0x5c0   : > { %5270 = vmatmul.mubr.msk.bf16.vlgmr.msra.gmra.mxu0 %vm936_vm1, %v1820_v56 }
 0x5ea   : > { %v5239_v58 = vpop.f32.mrf.mxu0 }
 0x5eb   : > { %v1520_v8 = vadd.f32 %v5239_v58, %v5958_v44  ;;  %v4712_v44 = vld [vmem:[%s6674_s25] ss:$0 sm:$0xff] }
 0x5ec   : > { %v1511_v59 = vpop.f32.mrf.mxu0 }
 0x5ed   : > { %v1512_v6 = vadd.f32 %v1511_v59, %v5960_v46 }
 0x5ee   : > { %v5240_v60 = vpop.f32.mrf.mxu0 }
 0x5ef   : > { %v1523_v4 = vadd.f32 %v5240_v60, %v5962_v61 }
 0x5f0   : > { %v1514_v63 = vpop.f32.mrf.mxu0 }
 0x5f1   : > { %v1515_v7 = vadd.f32 %v1514_v63, %v5964_v19 }
 0x677   : > { %v5255_v0 = vpop.f32.mrf.mxu0 }
 0x678   : > { %v1701_v15 = vadd.f32 %v5255_v0, %v1520_v8  ;;  %v2057_v0 = vld [vmem:[%s5705_s4 + $0x80] sm:$0xff] }
 0x679   : > { %v1684_v1 = vpop.f32.mrf.mxu0  ;;  %v2049_v8 = vld [vmem:[%s5705_s4 + $0x40] sm:$0xff] }
 0x67a   : > { %v1699_v13 = vadd.f32 %v1684_v1, %v1512_v6  ;;  %v2065_v1 = vld [vmem:[%s5705_s4 + $0xc0] sm:$0xff] }
 0x67b   : > { %v5256_v2 = vpop.f32.mrf.mxu0 }
 0x67c   : > { %v1702_v11 = vadd.f32 %v5256_v2, %v1523_v4  ;;  %v2058_v2 = vld [vmem:[%s5705_s4 + $0x88] sm:$0xff]  ;;  %v4735_v4 = vcombine.low %v2057_v0, %v2065_v1 }
 0x67d   : > { %v1687_v28 = vpop.f32.mrf.mxu0 }
 0x67e   : > { %v1700_v14 = vadd.f32 %v1687_v28, %v1515_v7  ;;  %v4736_v28 = vcombine.high %v2057_v0, %v2065_v1  ;;  %v2041_v7 = vld [vmem:[%s5705_s4] sm:$0xff]  ;;  %v2070_v0 = vld [vmem:[%s5705_s4 + $0xe8] sm:$0xff] }
 0x680   : > { %v5271_v3 = vpop.f32.mrf.mxu0  ;;  %2335 = vmatprep.subr.bf16.mxu0 %v4736_v28 }
 0x681   : > { %v1878_v21 = vadd.f32 %v5271_v3, %v1701_v15  ;;  %v2066_v3 = vld [vmem:[%s5705_s4 + $0xc8] sm:$0xff]  ;;  %2336 = vmatpush1.bf16.msra.mxu0 %v4735_v4 }
 0x682   : > { %v1861_v5 = vpop.f32.mrf.mxu0  ;;  %v4738_v6 = vcombine.high %v2058_v2, %v2066_v3 }
 0x683   : > { %v1876_v42 = vadd.f32 %v1861_v5, %v1699_v13  ;;  %v4737_v5 = vcombine.low %v2058_v2, %v2066_v3  ;;  %v2050_v13 = vld [vmem:[%s5705_s4 + $0x48] sm:$0xff] }
 0x684   : > { %v5272_v12 = vpop.f32.mrf.mxu0  ;;  %2388 = vmatprep.subr.bf16.mxu1 %v4738_v6 }
 0x685   : > { %v1879_v16 = vadd.f32 %v5272_v12, %v1702_v11  ;;  %v2042_v11 = vld [vmem:[%s5705_s4 + $0x8] sm:$0xff]  ;;  %v4720_v12 = vcombine.high %v2041_v7, %v2049_v8 }
 0x686   : > { %v1864_v32 = vpop.f32.mrf.mxu0  ;;  %v4721_v15 = vcombine.low %v2042_v11, %v2050_v13 }
 0x687   : > { %v1877_v30 = vadd.f32 %v1864_v32, %v1700_v14  ;;  %v1881_v61 = vpack.c.bf16 %v1879_v16, %v1878_v21  ;;  %v4719_v14 = vcombine.low %v2041_v7, %v2049_v8  ;;  %v4722_v16 = vcombine.high %v2042_v11, %v2050_v13  ;;  %2337 = vmatprep.subr.bf16.mxu0 %v4720_v12  ;;  %v2060_v21 = vld [vmem:[%s5705_s4 + $0x98] sm:$0xff]  ;;  %v2045_v7 = vld [vmem:[%s5705_s4 + $0x20] sm:$0xff]  ;;  %v2046_v11 = vld [vmem:[%s5705_s4 + $0x28] sm:$0xff] }
 0x688   : > { %v5530_v32 = vmov 0   ;;  %v2053_v8 = vld [vmem:[%s5705_s4 + $0x60] sm:$0xff]  ;;  %v2054_v12 = vld [vmem:[%s5705_s4 + $0x68] sm:$0xff] }
 0x689   : > { %v1880_v22 = vpack.c.bf16 %v1877_v30, %v1876_v42  ;;  %2338 = vmatpush1.bf16.msra.mxu0 %v4719_v14  ;;  %2355 = vmatprep.mubr.bf16.mxu0 %v5530_v32  ;;  %v2059_v42 = vld [vmem:[%s5705_s4 + $0x90] sm:$0xff] }
 0x68a   : > { %v2067_v30 = vld [vmem:[%s5705_s4 + $0xd0] sm:$0xff] }
 0x68b   : > { %5277 = vmatprep.mubr.msk.bf16.mxu1 %vm936_vm1, %v1880_v22  ;;  %v4740_v22 = vcombine.high %v2059_v42, %v2067_v30 }
 0x68c   : > { %5278 = vmatmul.mubr.msk.bf16.vlgmr.msra.gmra.mxu1 %vm936_vm1, %v1881_v61  ;;  %v2068_v61 = vld [vmem:[%s5705_s4 + $0xd8] sm:$0xff] }
 0x68d   : > { %2389 = vmatpush1.bf16.msra.mxu1 %v4737_v5  ;;  %2408 = vmatprep.mubr.bf16.mxu1 %v5530_v32 }
 0x68e   : > { %2390 = vmatprep.subr.bf16.mxu1 %v4722_v16  ;;  %2441 = vmatprep.subr.bf16.mxu0 %v4740_v22  ;;  %v4730_v16 = vcombine.high %v2046_v11, %v2054_v12  ;;  %v2072_v22 = vld [vmem:[%s5705_s4 + $0xf8] sm:$0xff] }
 0x691   : > { %2391 = vmatpush1.bf16.msra.mxu1 %v4721_v15  ;;  %v4728_v15 = vcombine.high %v2045_v7, %v2053_v8 }
 0x74c   : > { %v5279_v46 = vpop.f32.mrf.mxu1 }
 0x74d   : > { %v1954_v24 = vadd.f32 %v5279_v46, %v4712_v44  ;;  %v4739_v46 = vcombine.low %v2059_v42, %v2067_v30  ;;  %v2063_v42 = vld [vmem:[%s5705_s4 + $0xb0] sm:$0xff] }
 0x74e   : > { %v1945_v19 = vpop.f32.mrf.mxu1  ;;  %v2071_v30 = vld [vmem:[%s5705_s4 + $0xf0] sm:$0xff] }
 0x74f   : > { %v1946_v27 = vadd.f32 %v4712_v44, %v1945_v19  ;;  %v1962_v35 = vadd.f32 %v5513_v34, %v1954_v24  ;;  %v4742_v19 = vcombine.high %v2060_v21, %v2068_v61 }
 0x750   : > { %v5280_v31 = vpop.f32.mrf.mxu1 }
 0x751   : > { %v1960_v38 = vadd.f32 %v5512_v17, %v1946_v27  ;;  %v1957_v20 = vadd.f32 %v5280_v31, %v4712_v44  ;;  %v1972_v39 = vsel %vm936_vm1, %v1962_v35, 0.0  ;;  %2494 = vmatprep.subr.bf16.mxu1 %v4742_v19 }
 0x752   : > { %v1948_v18 = vpop.f32.mrf.mxu1 }
 0x753   : > { %v1949_v45 = vadd.f32 %v4712_v44, %v1948_v18  ;;  %v1966_v33 = vsel %vm936_vm1, %v1960_v38, 0.0  ;;  %v1963_v41 = vadd.f32 %v5515_v40, %v1957_v20  ;;  %v4741_v44 = vcombine.low %v2060_v21, %v2068_v61  ;;  %v2064_v21 = vld [vmem:[%s5705_s4 + $0xb8] sm:$0xff] }
 0x754   : > { %1967 = vadd.xlane.f32.xlu1 %v1966_v33  ;;  %v4727_v61 = vcombine.low %v2045_v7, %v2053_v8  ;;  %v4750_v19 = vcombine.high %v2064_v21, %v2072_v22  ;;  %v5337_v7 = vld [vmem:[%s5720_s18 + $0x1f8] sm:$0xff]   ;;  %v6237_v8 = vshrl.u32 %v1178_v25, 7 }
 0x755   : > { %v1961_v29 = vadd.f32 %v5514_v36, %v1949_v45  ;;  %v1975_v9 = vsel %vm936_vm1, %v1963_v41, 0.0 }
 0x757   : > { %v1969_v37 = vsel %vm936_vm1, %v1961_v29, 0.0 }
 0x758   : > { %1970 = vadd.xlane.f32.xlu0 %v1969_v37  ;;  %1973 = vadd.xlane.f32.xlu1 %v1972_v39  ;;  %v4717_v39 = vld [vmem:[%s6675_s14] ss:$0 sm:$0xff] }
 0x75c   : > { %1976 = vadd.xlane.f32.xlu0 %v1975_v9 }
 0x7dd   : > { %v1968_v43 = vpop.xlane.xlu1 %1967 }
 0x7de   : > { %v1979_v47 = vmul.f32 0.03125, %v1968_v43 }
 0x7e0   : > { %v6072_v48 = vsub.f32 %v1960_v38, %v1979_v47  ;;  %v4718_v47 = vld [vmem:[%s6676_s27] ss:$0 sm:$0xff] }
 0x7e1   : > { %v1971_v10 = vpop.xlane.xlu0 %1970  ;;  %v1974_v50 = vpop.xlane.xlu1 %1973 }
 0x7e2   : > { %v1980_v49 = vmul.f32 0.03125, %v1971_v10  ;;  %v1981_v23 = vmul.f32 0.03125, %v1974_v50  ;;  %v1987_v51 = vmul.f32 %v6072_v48, %v6072_v48 }
 0x7e4   : > { %v6076_v62 = vsub.f32 %v1961_v29, %v1980_v49  ;;  %v6078_v52 = vsub.f32 %v1962_v35, %v1981_v23  ;;  %v1991_v53 = vsel %vm936_vm1, %v1987_v51, 0.0 }
 0x7e5   : > { %v1977_v54 = vpop.xlane.xlu0 %1976  ;;  %1992 = vadd.xlane.f32.xlu1 %v1991_v53  ;;  %v2051_v53 = vld [vmem:[%s5705_s4 + $0x50] sm:$0xff] }
 0x7e6   : > { %v1982_v55 = vmul.f32 0.03125, %v1977_v54  ;;  %v1988_v56 = vmul.f32 %v6076_v62, %v6076_v62  ;;  %v1989_v26 = vmul.f32 %v6078_v52, %v6078_v52  ;;  %v2044_v54 = vld [vmem:[%s5705_s4 + $0x18] sm:$0xff] }
 0x7e8   : > { %v6085_v57 = vsub.f32 %v1963_v41, %v1982_v55  ;;  %v1994_v58 = vsel %vm936_vm1, %v1988_v56, 0.0  ;;  %v1997_v59 = vsel %vm936_vm1, %v1989_v26, 0.0  ;;  %v2052_v55 = vld [vmem:[%s5705_s4 + $0x58] sm:$0xff] }
 0x7e9   : > { %1995 = vadd.xlane.f32.xlu0 %v1994_v58  ;;  %1998 = vadd.xlane.f32.xlu1 %v1997_v59  ;;  %v4726_v59 = vcombine.high %v2044_v54, %v2052_v55  ;;  %v4725_v28 = vcombine.low %v2044_v54, %v2052_v55  ;;  %v5321_v54 = vld [vmem:[%s5720_s18 + $0xd8] sm:$0xff]  }
 0x7ea   : > { %v1990_v60 = vmul.f32 %v6085_v57, %v6085_v57  ;;  %v5322_v55 = vld [vmem:[%s5720_s18 + $0x18] sm:$0xff]  }
 0x7ec   : > { %v2000_v63 = vsel %vm936_vm1, %v1990_v60, 0.0  ;;  %v2061_v60 = vld [vmem:[%s5705_s4 + $0xa0] sm:$0xff] }
 0x7ed   : > { %2001 = vadd.xlane.f32.xlu0 %v2000_v63 }
 0x86e   : > { %v1993_v24 = vpop.xlane.xlu1 %1992 }
 0x86f   : > { %v2003_v27 = vmul.f32 0.03125, %v1993_v24  ;;  %v2047_v24 = vld [vmem:[%s5705_s4 + $0x30] sm:$0xff] }
 0x871   : > { %v2007_v31 = vadd.f32 1e-05, %v2003_v27  ;;  %v2055_v27 = vld [vmem:[%s5705_s4 + $0x70] sm:$0xff] }
 0x872   : > { %v1996_v17 = vpop.xlane.xlu0 %1995  ;;  %v1999_v38 = vpop.xlane.xlu1 %1998 }
 0x873   : > { %5496 = vrsqrt.f32 %v2007_v31  ;;  %v2004_v18 = vmul.f32 0.03125, %v1996_v17  ;;  %v2005_v20 = vmul.f32 0.03125, %v1999_v38  ;;  %v2048_v31 = vld [vmem:[%s5705_s4 + $0x38] sm:$0xff]  ;;  %v4747_v38 = vcombine.low %v2063_v42, %v2071_v30 }
 0x874   : > { %v2056_v17 = vld [vmem:[%s5705_s4 + $0x78] sm:$0xff] }
 0x875   : > { %v2008_v45 = vadd.f32 1e-05, %v2004_v18  ;;  %v2009_v33 = vadd.f32 1e-05, %v2005_v20  ;;  %v4749_v18 = vcombine.low %v2064_v21, %v2072_v22  ;;  %v4732_v20 = vcombine.high %v2047_v24, %v2055_v27 }
 0x876   : > { %v2002_v34 = vpop.xlane.xlu0 %2001 }
 0x877   : > { %5498 = vrsqrt.f32 %v2008_v45  ;;  %v2006_v35 = vmul.f32 0.03125, %v2002_v34  ;;  %v4734_v45 = vcombine.high %v2048_v31, %v2056_v17  ;;  %v4733_v34 = vcombine.low %v2048_v31, %v2056_v17 }
 0x878   : > { %5500 = vrsqrt.f32 %v2009_v33  ;;  %v4731_v33 = vcombine.low %v2047_v24, %v2055_v27 }
 0x879   : > { %v2010_v36 = vadd.f32 1e-05, %v2006_v35  ;;  %v5304_v35 = vld [vmem:[%s5720_s18 + $0x78] sm:$0xff]  }
 0x87b   : > { %5502 = vrsqrt.f32 %v2010_v36  ;;  %v5305_v36 = vld [vmem:[%s5720_s18 + $0xf8] sm:$0xff]  }
 0x880   : > { %v5497_v29 = vpop.eup %5496 }
 0x881   : > { %v2015_v37 = vmul.f32 %v5497_v29, %v6072_v48  ;;  %v2043_v48 = vld [vmem:[%s5705_s4 + $0x10] sm:$0xff]  ;;  %v5306_v29 = vld [vmem:[%s5720_s18 + $0x38] sm:$0xff]  }
 0x882   : > { %v4724_v58 = vcombine.high %v2043_v48, %v2051_v53  ;;  %v4723_v2 = vcombine.low %v2043_v48, %v2051_v53  ;;  %v5317_v48 = vld [vmem:[%s5720_s18 + $0xe0] sm:$0xff]   ;;  %v5320_v53 = vld [vmem:[%s5720_s18 + $0x58] sm:$0xff]  }
 0x883   : > { %v2025_v41 = vmul.f32 %v4717_v39, %v2015_v37  ;;  %v5307_v37 = vld [vmem:[%s5720_s18 + $0xb8] sm:$0xff]  }
 0x884   : > { %v5499_v40 = vpop.eup %5498 }
 0x885   : > { %v2016_v9 = vmul.f32 %v5499_v40, %v6076_v62  ;;  %v5501_v43 = vpop.eup %5500  ;;  %v6119_v49 = vadd.f32 %v4718_v47, %v2025_v41  ;;  %v5309_v40 = vld [vmem:[%s5720_s18 + $0xf0] sm:$0xff]  }
 0x886   : > { %v2017_v51 = vmul.f32 %v5501_v43, %v6078_v52  ;;  %v2069_v52 = vld [vmem:[%s5705_s4 + $0xe0] sm:$0xff]  ;;  %v5310_v41 = vld [vmem:[%s5720_s18 + $0x30] sm:$0xff]   ;;  %v5312_v43 = vld [vmem:[%s5720_s18 + $0x68] sm:$0xff]  }
 0x887   : > { %v2026_v10 = vmul.f32 %v4717_v39, %v2016_v9  ;;  %v4744_v3 = vcombine.high %v2061_v60, %v2069_v52  ;;  %v4743_v13 = vcombine.low %v2061_v60, %v2069_v52  ;;  %v5311_v9 = vld [vmem:[%s5720_s18 + $0xb0] sm:$0xff]   ;;  %v5329_v52 = vld [vmem:[%s5720_s18 + $0xc8] sm:$0xff]  }
 0x888   : > { %v5503_v50 = vpop.eup %5502  ;;  %v2027_v63 = vmul.f32 %v4717_v39, %v2017_v51  ;;  %v5318_v51 = vld [vmem:[%s5720_s18 + $0x20] sm:$0xff]   ;;  %v5327_v60 = vld [vmem:[%s5720_s18 + $0x90] sm:$0xff]  }
 0x889   : > { %v6121_v23 = vadd.f32 %v4718_v47, %v2026_v10  ;;  %v2018_v62 = vmul.f32 %v5503_v50, %v6085_v57  ;;  %v2062_v57 = vld [vmem:[%s5705_s4 + $0xa8] sm:$0xff] }
 0x88a   : > { %v4746_v4 = vcombine.high %v2062_v57, %v2070_v0  ;;  %v6144_v5 = vadd.f32 %v4718_v47, %v2027_v63  ;;  %v4745_v14 = vcombine.low %v2062_v57, %v2070_v0  ;;  %v5314_v10 = vld [vmem:[%s5720_s18 + $0x28] sm:$0xff]  }
 0x88b   : > { %v6130_v56 = vpack.c.bf16 %v6121_v23, %v6119_v49  ;;  %v2028_v26 = vmul.f32 %v4717_v39, %v2018_v62  ;;  %v5308_v39 = vld [vmem:[%s5720_s18 + $0x70] sm:$0xff]   ;;  %v5315_v50 = vld [vmem:[%s5720_s18 + $0xa8] sm:$0xff]   ;;  %v5319_v62 = vld [vmem:[%s5720_s18 + $0xa0] sm:$0xff]  }
 0x88c   : > { %v5328_v63 = vld [vmem:[%s5720_s18 + $0x48] sm:$0xff]  }
 0x88d   : > { %4751 = vmatmul.mubr.msk.bf16.vlgmr.msra.gmra.mxu0 %vm936_vm1, %v6130_v56  ;;  %4753 = vmatmul.mubr.msk.bf16.vlgmr.msra.gmra.mxu1 %vm936_vm1, %v6130_v56  ;;  %v6142_v1 = vadd.f32 %v4718_v47, %v2028_v26  ;;  %v5313_v47 = vld [vmem:[%s5720_s18 + $0xe8] sm:$0xff]   ;;  %v5324_v26 = vld [vmem:[%s5720_s18 + $0x50] sm:$0xff]  }
 0x88e   : > { %2365 = vmatprep.mubr.bf16.mxu0 %v5530_v32  ;;  %2418 = vmatprep.mubr.bf16.mxu1 %v5530_v32  ;;  %v5330_v57 = vld [vmem:[%s5720_s18 + $0x8] sm:$0xff]  }
 0x88f   : > { %6677 = vst [vmem:[#allocation5_spill] sm:$0xff] %v6142_v1  ;;  %2442 = vmatpush1.bf16.msra.mxu0 %v4739_v46  ;;  %2495 = vmatpush1.bf16.msra.mxu1 %v4741_v44  ;;  %v6148_v6 = vpack.c.bf16 %v6142_v1, %v6144_v5  ;;  %v4729_v46 = vcombine.low %v2046_v11, %v2054_v12  ;;  %v5331_v0 = vld [vmem:[%s5720_s18 + $0x88] sm:$0xff]   ;;  %v6240_v11 = vsub.s32 1, %v6237_v8  ;;  %v2091_v12 = vsub.s32 3, %v6237_v8 }
 0x890   : > { %2443 = vmatprep.subr.bf16.mxu0 %v4724_v58  ;;  %2496 = vmatprep.subr.bf16.mxu1 %v4726_v59  ;;  %v4748_v44 = vcombine.high %v2063_v42, %v2071_v30  ;;  %v5325_v58 = vld [vmem:[%s5720_s18 + $0xd0] sm:$0xff]  }
 0x891   : > { %v5326_v59 = vld [vmem:[%s5720_s18 + $0x10] sm:$0xff]   ;;  %6678 = vst [vmem:[#allocation6_spill] sm:$0xff] %v6240_v11 }
 0x893   : > { %2444 = vmatpush1.bf16.msra.mxu0 %v4723_v2  ;;  %2497 = vmatpush1.bf16.msra.mxu1 %v4725_v28  ;;  %v5332_v2 = vld [vmem:[%s5720_s18 + $0x40] sm:$0xff]  }
 0x894   : > { %2547 = vmatprep.subr.bf16.mxu0 %v4744_v3  ;;  %2600 = vmatprep.subr.bf16.mxu1 %v4746_v4  ;;  %v5333_v28 = vld [vmem:[%s5720_s18 + $0xc0] sm:$0xff]  }
 0x895   : > { %4752 = vmatmul.mubr.msk.bf16.gmra.mxu0 %vm936_vm1, %v6148_v6  ;;  %4754 = vmatmul.mubr.msk.bf16.gmra.mxu1 %vm936_vm1, %v6148_v6  ;;  %v5334_v3 = vld [vmem:[%s5720_s18] sm:$0xff]  }
 0x896   : > { %2461 = vmatprep.mubr.bf16.mxu0 %v5530_v32  ;;  %2514 = vmatprep.mubr.bf16.mxu1 %v5530_v32  ;;  %v5335_v4 = vld [vmem:[%s5720_s18 + $0x80] sm:$0xff]  }
 0x89d   : > { %4755 = vmatmul.mubr.msk.bf16.vlgmr.msra.gmra.mxu0 %vm936_vm1, %v6130_v56  ;;  %4757 = vmatmul.mubr.msk.bf16.vlgmr.msra.gmra.mxu1 %vm936_vm1, %v6130_v56 }
 0x89e   : > { %2471 = vmatprep.mubr.bf16.mxu0 %v5530_v32  ;;  %2524 = vmatprep.mubr.bf16.mxu1 %v5530_v32 }
 0x89f   : > { %2548 = vmatpush1.bf16.msra.mxu0 %v4743_v13  ;;  %2601 = vmatpush1.bf16.msra.mxu1 %v4745_v14  ;;  %v6244_v13 = vsub.s32 0, %v6237_v8  ;;  %v2087_v14 = vsub.s32 2, %v6237_v8 }
 0x8a0   : > { %2549 = vmatprep.subr.bf16.mxu0 %v4728_v15  ;;  %2602 = vmatprep.subr.bf16.mxu1 %v4730_v16  ;;  %v6248_v15 = vld [vmem:[%s5710_s9] sm:$0xff] }
 0x8a1   : > { %6679 = vst [vmem:[#allocation7_spill] sm:$0xff] %v6244_v13  ;;  %v2084_v30 = vrot.slane %v6248_v15, %v6240_v11  ;;  %v2092_v25 = vrot.slane %v6248_v15, %v2091_v12  ;;  %v2080_v21 = vrot.slane %v6248_v15, %v6244_v13  ;;  %v2088_v22 = vrot.slane %v6248_v15, %v2087_v14 }
 0x8a3   : > { %2550 = vmatpush1.bf16.msra.mxu0 %v4727_v61  ;;  %2603 = vmatpush1.bf16.msra.mxu1 %v4729_v46 }
 0x8a4   : > { %2653 = vmatprep.subr.bf16.mxu0 %v4748_v44  ;;  %2706 = vmatprep.subr.bf16.mxu1 %v4750_v19 }
 0x8a5   : > { %4756 = vmatmul.mubr.msk.bf16.gmra.mxu0 %vm936_vm1, %v6148_v6  ;;  %4758 = vmatmul.mubr.msk.bf16.gmra.mxu1 %vm936_vm1, %v6148_v6 }
 0x8a6   : > { %2567 = vmatprep.mubr.bf16.mxu0 %v5530_v32  ;;  %2620 = vmatprep.mubr.bf16.mxu1 %v5530_v32 }
 0x8ad   : > { %4759 = vmatmul.mubr.msk.bf16.vlgmr.msra.gmra.mxu0 %vm936_vm1, %v6130_v56  ;;  %4761 = vmatmul.mubr.msk.bf16.vlgmr.msra.gmra.mxu1 %vm936_vm1, %v6130_v56 }
 0x8ae   : > { %2577 = vmatprep.mubr.bf16.mxu0 %v5530_v32  ;;  %2630 = vmatprep.mubr.bf16.mxu1 %v5530_v32 }
 0x8af   : > { %2654 = vmatpush1.bf16.msra.mxu0 %v4747_v38  ;;  %2707 = vmatpush1.bf16.msra.mxu1 %v4749_v18 }
 0x8b0   : > { %2655 = vmatprep.subr.bf16.mxu0 %v4732_v20  ;;  %2708 = vmatprep.subr.bf16.mxu1 %v4734_v45 }
 0x8b3   : > { %2656 = vmatpush1.bf16.msra.mxu0 %v4731_v33  ;;  %2709 = vmatpush1.bf16.msra.mxu1 %v4733_v34 }
 0x8b4   : > { %4961 = vmatprep.subr.bf16.mxu0 %v5304_v35  ;;  %4989 = vmatprep.subr.bf16.mxu1 %v5305_v36 }
 0x8b5   : > { %4760 = vmatmul.mubr.msk.bf16.gmra.mxu0 %vm936_vm1, %v6148_v6  ;;  %4762 = vmatmul.mubr.msk.bf16.gmra.mxu1 %vm936_vm1, %v6148_v6 }
 0x8b6   : > { %2673 = vmatprep.mubr.bf16.mxu0 %v5530_v32  ;;  %2726 = vmatprep.mubr.bf16.mxu1 %v5530_v32 }
 0x8bd   : > { %4763 = vmatmul.mubr.msk.bf16.vlgmr.msra.gmra.mxu0 %vm936_vm1, %v6130_v56  ;;  %4765 = vmatmul.mubr.msk.bf16.vlgmr.msra.gmra.mxu1 %vm936_vm1, %v6130_v56  ;;  %v5323_v56 = vld [vmem:[%s5720_s18 + $0x98] sm:$0xff]  }
 0x8be   : > { %2683 = vmatprep.mubr.bf16.mxu0 %v5530_v32  ;;  %2736 = vmatprep.mubr.bf16.mxu1 %v5530_v32  ;;  %v5316_v32 = vld [vmem:[%s5720_s18 + $0x60] sm:$0xff]  }
 0x8bf   : > { %4962 = vmatpush3.bf16.msra.mxu0 %v5306_v29  ;;  %4990 = vmatpush3.bf16.msra.mxu1 %v5307_v37 }
 0x8c0   : > { %4963 = vmatprep.subr.bf16.mxu0 %v5308_v39  ;;  %4991 = vmatprep.subr.bf16.mxu1 %v5309_v40 }
 0x8c3   : > { %4964 = vmatpush3.bf16.msra.mxu0 %v5310_v41  ;;  %4992 = vmatpush3.bf16.msra.mxu1 %v5311_v9 }
 0x8c4   : > { %4965 = vmatprep.subr.bf16.mxu0 %v5312_v43  ;;  %4993 = vmatprep.subr.bf16.mxu1 %v5313_v47 }
 0x8c5   : > { %4764 = vmatmul.mubr.msk.bf16.gmra.mxu0 %vm936_vm1, %v6148_v6  ;;  %4766 = vmatmul.mubr.msk.bf16.gmra.mxu1 %vm936_vm1, %v6148_v6  ;;  %v5336_v6 = vld [vmem:[%s5720_s18 + $0x178] sm:$0xff]  }
 0x8c7   : > { %4966 = vmatpush3.bf16.msra.mxu0 %v5314_v10  ;;  %4994 = vmatpush3.bf16.msra.mxu1 %v5315_v50 }
 0x8c8   : > { %4967 = vmatprep.subr.bf16.mxu0 %v5316_v32  ;;  %4995 = vmatprep.subr.bf16.mxu1 %v5317_v48 }
 0x8cb   : > { %4968 = vmatpush3.bf16.msra.mxu0 %v5318_v51  ;;  %4996 = vmatpush3.bf16.msra.mxu1 %v5319_v62  ;;  %v5338_v51 = vld [vmem:[%s5720_s18 + $0x138] sm:$0xff]  }
 0x8cc   : > { %4969 = vmatprep.subr.bf16.mxu0 %v5320_v53  ;;  %4997 = vmatprep.subr.bf16.mxu1 %v5321_v54  ;;  %v5339_v62 = vld [vmem:[%s5720_s18 + $0x1b8] sm:$0xff]   ;;  %v2099_v53 = vsub.s32 5, %v6237_v8 }
 0x8cf   : > { %4970 = vmatpush3.bf16.msra.mxu0 %v5322_v55  ;;  %4998 = vmatpush3.bf16.msra.mxu1 %v5323_v56 }
 0x8d0   : > { %4971 = vmatprep.subr.bf16.mxu0 %v5324_v26  ;;  %4999 = vmatprep.subr.bf16.mxu1 %v5325_v58 }
 0x8d3   : > { %4972 = vmatpush3.bf16.msra.mxu0 %v5326_v59  ;;  %5000 = vmatpush3.bf16.msra.mxu1 %v5327_v60  ;;  %v5340_v59 = vld [vmem:[%s5720_s18 + $0x170] sm:$0xff]  }
 0x8d4   : > { %4973 = vmatprep.subr.bf16.mxu0 %v5328_v63  ;;  %5001 = vmatprep.subr.bf16.mxu1 %v5329_v52  ;;  %v5341_v60 = vld [vmem:[%s5720_s18 + $0x1f0] sm:$0xff]   ;;  %v2107_v63 = vsub.s32 7, %v6237_v8 }
 0x8d7   : > { %4974 = vmatpush3.bf16.msra.mxu0 %v5330_v57  ;;  %5002 = vmatpush3.bf16.msra.mxu1 %v5331_v0 }
 0x8d8   : > { %4975 = vmatprep.subr.bf16.mxu0 %v5332_v2  ;;  %5003 = vmatprep.subr.bf16.mxu1 %v5333_v28 }
 0x8db   : > { %4976 = vmatpush3.bf16.msra.mxu0 %v5334_v3  ;;  %5004 = vmatpush3.bf16.msra.mxu1 %v5335_v4 }
 0x8dc   : > { %5017 = vmatprep.subr.bf16.mxu0 %v5336_v6  ;;  %5045 = vmatprep.subr.bf16.mxu1 %v5337_v7 }
 0x94d   : > { %v2357_v16 = vpop.f32.mrf.mxu0  ;;  %v2410_v42 = vpop.f32.mrf.mxu1 }
 0x94e   : > { %v2358_v38 = vadd.f32 %v2357_v16, %v2080_v21  ;;  %v2411_v18 = vadd.f32 %v2410_v42, %v2088_v22  ;;  %v5342_v16 = vld [vmem:[%s5720_s18 + $0x130] sm:$0xff]  }
 0x94f   : > { %v2359_v61 = vpop.f32.mrf.mxu0  ;;  %v2412_v46 = vpop.f32.mrf.mxu1 }
 0x950   : > { %v2360_v24 = vadd.f32 %v2359_v61, %v2084_v30  ;;  %v2413_v27 = vadd.f32 %v2412_v46, %v2092_v25  ;;  %v2747_v43 = vmax.f32 %v2358_v38, 0.0  ;;  %v2749_v47 = vmax.f32 %v2411_v18, 0.0 }
 0x951   : > { %v2361_v44 = vpop.f32.mrf.mxu0  ;;  %v2414_v19 = vpop.f32.mrf.mxu1 }
 0x952   : > { %v2362_v31 = vadd.f32 %v2361_v44, %v2080_v21  ;;  %v2415_v17 = vadd.f32 %v2414_v19, %v2088_v22  ;;  %v2748_v39 = vmax.f32 %v2360_v24, 0.0  ;;  %v2750_v40 = vmax.f32 %v2413_v27, 0.0 }
 0x953   : > { %v2363_v20 = vpop.f32.mrf.mxu0  ;;  %v2416_v45 = vpop.f32.mrf.mxu1 }
 0x954   : > { %v2364_v33 = vadd.f32 %v2363_v20, %v2084_v30  ;;  %v2417_v34 = vadd.f32 %v2416_v45, %v2092_v25  ;;  %v2763_v35 = vmax.f32 %v2362_v31, 0.0  ;;  %v2765_v36 = vmax.f32 %v2415_v17, 0.0  ;;  %v5345_v20 = vld [vmem:[%s5720_s18 + $0x1e8] sm:$0xff]  }
 0x955   : > { %v2367_v29 = vpop.f32.mrf.mxu0  ;;  %v2420_v37 = vpop.f32.mrf.mxu1 }
 0x956   : > { %v2764_v41 = vmax.f32 %v2364_v33, 0.0  ;;  %v2766_v9 = vmax.f32 %v2417_v34, 0.0  ;;  %v2811_v54 = vpack.c.bf16 %v2763_v35, %v2747_v43  ;;  %v2813_v55 = vpack.c.bf16 %v2765_v36, %v2749_v47  ;;  %v5346_v35 = vld [vmem:[%s5720_s18 + $0x128] sm:$0xff]   ;;  %v5349_v47 = vld [vmem:[%s5720_s18 + $0x1e0] sm:$0xff]  }
 0x957   : > { %v2369_v10 = vpop.f32.mrf.mxu0  ;;  %v2422_v50 = vpop.f32.mrf.mxu1  ;;  %v2368_v2 = vadd.f32 %v2367_v29, %v2080_v21  ;;  %v2421_v4 = vadd.f32 %v2420_v37, %v2088_v22 }
 0x958   : > { %v2812_v32 = vpack.c.bf16 %v2764_v41, %v2748_v39  ;;  %v2814_v48 = vpack.c.bf16 %v2766_v9, %v2750_v40  ;;  %v2370_v56 = vadd.f32 %v2369_v10, %v2084_v30  ;;  %v2423_v52 = vadd.f32 %v2422_v50, %v2092_v25  ;;  %v5347_v39 = vld [vmem:[%s5720_s18 + $0x1a8] sm:$0xff]   ;;  %v5348_v40 = vld [vmem:[%s5720_s18 + $0x160] sm:$0xff]  }
 0x959   : > { %v2371_v26 = vpop.f32.mrf.mxu0  ;;  %v2424_v58 = vpop.f32.mrf.mxu1  ;;  %v2779_v17 = vmax.f32 %v2368_v2, 0.0  ;;  %v2781_v45 = vmax.f32 %v2421_v4, 0.0 }
 0x95a   : > { %v2372_v57 = vadd.f32 %v2371_v26, %v2080_v21  ;;  %v2425_v0 = vadd.f32 %v2424_v58, %v2088_v22  ;;  %3906 = vmatprep.mubr.bf16.mxu0 %v2812_v32  ;;  %3955 = vmatprep.mubr.bf16.mxu1 %v2814_v48  ;;  %v2780_v42 = vmax.f32 %v2370_v56, 0.0  ;;  %v6274_v21 = vrot.slane %v6248_v15, %v2099_v53  ;;  %v5344_v22 = vld [vmem:[%s5720_s18 + $0x168] sm:$0xff]   ;;  %v5352_v56 = vld [vmem:[%s5720_s18 + $0x158] sm:$0xff]  }
 0x95b   : > { %v2373_v28 = vpop.f32.mrf.mxu0  ;;  %v2426_v3 = vpop.f32.mrf.mxu1  ;;  %3907 = vmatmul.mubr.bf16.vlgmr.msra.gmra.mxu0 %v2811_v54  ;;  %3956 = vmatmul.mubr.bf16.vlgmr.msra.gmra.mxu1 %v2813_v55  ;;  %v2782_v19 = vmax.f32 %v2423_v52, 0.0  ;;  %v5351_v55 = vld [vmem:[%s5720_s18 + $0x1a0] sm:$0xff]   ;;  %v5353_v52 = vld [vmem:[%s5720_s18 + $0x1d8] sm:$0xff]  }
 0x95c   : > { %v2374_v6 = vadd.f32 %v2373_v28, %v2084_v30  ;;  %v2427_v7 = vadd.f32 %v2426_v3, %v2092_v25  ;;  %5018 = vmatpush3.bf16.msra.mxu0 %v5338_v51  ;;  %5046 = vmatpush3.bf16.msra.mxu1 %v5339_v62  ;;  %v2795_v61 = vmax.f32 %v2372_v57, 0.0  ;;  %v6279_v30 = vrot.slane %v6248_v15, %v2107_v63  ;;  %v5343_v25 = vld [vmem:[%s5720_s18 + $0x1b0] sm:$0xff]   ;;  %v5350_v51 = vld [vmem:[%s5720_s18 + $0x120] sm:$0xff]   ;;  %v5354_v3 = vld [vmem:[%s5720_s18 + $0x118] sm:$0xff]  }
 0x95d   : > { %v6267_v46 = vpop.f32.mrf.mxu0  ;;  %v6269_v44 = vpop.f32.mrf.mxu1  ;;  %5019 = vmatprep.subr.bf16.mxu0 %v5340_v59  ;;  %5047 = vmatprep.subr.bf16.mxu1 %v5341_v60  ;;  %v2797_v24 = vmax.f32 %v2425_v0, 0.0 }
 0x95e   : > { %v2796_v27 = vmax.f32 %v2374_v6, 0.0  ;;  %v2798_v31 = vmax.f32 %v2427_v7, 0.0  ;;  %v2827_v36 = vpack.c.bf16 %v2795_v61, %v2779_v17  ;;  %v5355_v7 = vld [vmem:[%s5720_s18 + $0x198] sm:$0xff]   ;;  %v2095_v61 = vsub.s32 4, %v6237_v8  ;;  %v5359_v17 = vld [vmem:[%s5720_s18 + $0x190] sm:$0xff]  }
 0x95f   : > { %v2465_v38 = vpop.f32.mrf.mxu0  ;;  %v2518_v18 = vpop.f32.mrf.mxu1  ;;  %v2829_v41 = vpack.c.bf16 %v2797_v24, %v2781_v45  ;;  %v5358_v24 = vld [vmem:[%s5720_s18 + $0x110] sm:$0xff]  }
 0x960   : > { %v2828_v33 = vpack.c.bf16 %v2796_v27, %v2780_v42  ;;  %v2830_v34 = vpack.c.bf16 %v2798_v31, %v2782_v19  ;;  %5020 = vmatpush3.bf16.msra.mxu0 %v5342_v16  ;;  %5048 = vmatpush3.bf16.msra.mxu1 %v5343_v25  ;;  %v2466_v9 = vadd.f32 %v2465_v38, %v6274_v21  ;;  %v5356_v16 = vld [vmem:[%s5720_s18 + $0x150] sm:$0xff]   ;;  %v2103_v19 = vsub.s32 6, %v6237_v8  ;;  %v5360_v38 = vld [vmem:[%s5720_s18 + $0x148] sm:$0xff]  }
 0x961   : > { %v6285_v29 = vpop.f32.mrf.mxu0  ;;  %v6287_v37 = vpop.f32.mrf.mxu1  ;;  %5021 = vmatprep.subr.bf16.mxu0 %v5344_v22  ;;  %v2519_v43 = vadd.f32 %v2518_v18, %v6279_v30  ;;  %5049 = vmatprep.subr.bf16.mxu1 %v5345_v20  ;;  %v5357_v42 = vld [vmem:[%s5720_s18 + $0x1d0] sm:$0xff]   ;;  %v5361_v18 = vld [vmem:[%s5720_s18 + $0x1c8] sm:$0xff]   ;;  %v2096_v20 = vrot.slane %v6248_v15, %v2095_v61 }
 0x962   : > { %3914 = vmatprep.mubr.bf16.mxu0 %v2828_v33  ;;  %3963 = vmatprep.mubr.bf16.mxu1 %v2830_v34  ;;  %v2752_v26 = vmax.f32 %v2466_v9, 0.0  ;;  %v2104_v33 = vrot.slane %v6248_v15, %v2103_v19 }
 0x963   : > { %v2469_v10 = vpop.f32.mrf.mxu0  ;;  %v2522_v50 = vpop.f32.mrf.mxu1  ;;  %3915 = vmatmul.mubr.bf16.gmra.mxu0 %v2827_v36  ;;  %3964 = vmatmul.mubr.bf16.gmra.mxu1 %v2829_v41  ;;  %v2754_v58 = vmax.f32 %v2519_v43, 0.0  ;;  %v2468_v36 = vadd.f32 %v6285_v29, %v2096_v20  ;;  %v5365_v43 = vld [vmem:[%s5720_s18 + $0x1c0] sm:$0xff]   ;;  %v2464_v15 = vadd.f32 %v6267_v46, %v2096_v20 }
 0x964   : > { %v2470_v32 = vadd.f32 %v2469_v10, %v6274_v21  ;;  %v2523_v48 = vadd.f32 %v2522_v50, %v6279_v30  ;;  %5022 = vmatpush3.bf16.msra.mxu0 %v5346_v35  ;;  %5050 = vmatpush3.bf16.msra.mxu1 %v5347_v39  ;;  %v5362_v35 = vld [vmem:[%s5720_s18 + $0x108] sm:$0xff]   ;;  %v2521_v41 = vadd.f32 %v6287_v37, %v2104_v33  ;;  %v5366_v37 = vld [vmem:[%s5720_s18 + $0x100] sm:$0xff]  }
 0x965   : > { %v6297_v62 = vpop.f32.mrf.mxu0  ;;  %v6299_v54 = vpop.f32.mrf.mxu1  ;;  %5023 = vmatprep.subr.bf16.mxu0 %v5348_v40  ;;  %5051 = vmatprep.subr.bf16.mxu1 %v5349_v47  ;;  %v5363_v39 = vld [vmem:[%s5720_s18 + $0x188] sm:$0xff]   ;;  %v5364_v40 = vld [vmem:[%s5720_s18 + $0x140] sm:$0xff]   ;;  %v2517_v29 = vadd.f32 %v6269_v44, %v2104_v33  ;;  %v2751_v44 = vmax.f32 %v2464_v15, 0.0 }
 0x966   : > { %v2768_v59 = vmax.f32 %v2470_v32, 0.0  ;;  %v2770_v60 = vmax.f32 %v2523_v48, 0.0  ;;  %v2767_v48 = vmax.f32 %v2468_v36, 0.0  ;;  %v5367_v46 = vld [vmem:[%s5720_s18 + $0x180] sm:$0xff]   ;;  %v2527_v36 = vadd.f32 %v6299_v54, %v2104_v33  ;;  %v5375_v54 = vld [vmem:[%s5720_s18 + $0x2b0] sm:$0xff]  }
 0x967   : > { %v2475_v57 = vpop.f32.mrf.mxu0  ;;  %v2528_v0 = vpop.f32.mrf.mxu1 }
 0x968   : > { %v2816_v2 = vpack.c.bf16 %v2768_v59, %v2752_v26  ;;  %v2818_v28 = vpack.c.bf16 %v2770_v60, %v2754_v58  ;;  %5024 = vmatpush3.bf16.msra.mxu0 %v5350_v51  ;;  %5052 = vmatpush3.bf16.msra.mxu1 %v5351_v55  ;;  %v2476_v50 = vadd.f32 %v2475_v57, %v6274_v21  ;;  %v5368_v55 = vld [vmem:[%s5720_s18 + $0x278] sm:$0xff]  }
 0x969   : > { %v6305_v4 = vpop.f32.mrf.mxu0  ;;  %v6307_v6 = vpop.f32.mrf.mxu1  ;;  %5025 = vmatprep.subr.bf16.mxu0 %v5352_v56  ;;  %5053 = vmatprep.subr.bf16.mxu1 %v5353_v52  ;;  %v2529_v51 = vadd.f32 %v2528_v0, %v6279_v30  ;;  %v2769_v56 = vmax.f32 %v2521_v41, 0.0  ;;  %v5369_v58 = vld [vmem:[%s5720_s18 + $0x2f8] sm:$0xff]   ;;  %v2753_v52 = vmax.f32 %v2517_v29, 0.0  ;;  %v5374_v41 = vld [vmem:[%s5720_s18 + $0x230] sm:$0xff]   ;;  %v2785_v29 = vmax.f32 %v2527_v36, 0.0 }
 0x96a   : > { %4004 = vmatprep.mubr.bf16.mxu0 %v2816_v2  ;;  %4053 = vmatprep.mubr.bf16.mxu1 %v2818_v28  ;;  %v2784_v57 = vmax.f32 %v2476_v50, 0.0  ;;  %v2815_v2 = vpack.c.bf16 %v2767_v48, %v2751_v44 }
 0x96b   : > { %v2479_v25 = vpop.f32.mrf.mxu0  ;;  %v2532_v22 = vpop.f32.mrf.mxu1  ;;  %v2786_v28 = vmax.f32 %v2529_v51, 0.0 }
 0x96c   : > { %5026 = vmatpush3.bf16.msra.mxu0 %v5354_v3  ;;  %5054 = vmatpush3.bf16.msra.mxu1 %v5355_v7  ;;  %v2480_v9 = vadd.f32 %v2479_v25, %v6274_v21  ;;  %v2533_v47 = vadd.f32 %v2532_v22, %v6279_v30  ;;  %v6351_v21 = vld [vmem:[%s5710_s9 + $0x8] sm:$0xff]  ;;  %v2478_v3 = vadd.f32 %v6305_v4, %v2096_v20 }
 0x96d   : > { %v6315_v27 = vpop.f32.mrf.mxu0  ;;  %v6317_v31 = vpop.f32.mrf.mxu1  ;;  %5027 = vmatprep.subr.bf16.mxu0 %v5356_v16  ;;  %5055 = vmatprep.subr.bf16.mxu1 %v5357_v42  ;;  %v6355_v30 = vrot.slane %v6351_v21, %v6240_v11  ;;  %v6361_v7 = vrot.slane %v6351_v21, %v2091_v12  ;;  %v5370_v16 = vld [vmem:[%s5720_s18 + $0x238] sm:$0xff]   ;;  %v2817_v42 = vpack.c.bf16 %v2769_v56, %v2753_v52  ;;  %v5373_v12 = vld [vmem:[%s5720_s18 + $0x2f0] sm:$0xff]  }
 0x96e   : > { %v2800_v26 = vmax.f32 %v2480_v9, 0.0  ;;  %v2802_v59 = vmax.f32 %v2533_v47, 0.0  ;;  %v2531_v25 = vadd.f32 %v6307_v6, %v2104_v33  ;;  %v2474_v4 = vadd.f32 %v6297_v62, %v2096_v20  ;;  %v5377_v47 = vld [vmem:[%s5720_s18 + $0x2e8] sm:$0xff]  }
 0x96f   : > { %v2571_v45 = vpop.f32.mrf.mxu0  ;;  %v6328_v34 = vpop.f32.mrf.mxu1  ;;  %v2112_v36 = vrot.slane %v6351_v21, %v6244_v13 }
 0x970   : > { %5028 = vmatpush3.bf16.msra.mxu0 %v5358_v24  ;;  %5056 = vmatpush3.bf16.msra.mxu1 %v5359_v17  ;;  %v2832_v22 = vpack.c.bf16 %v2800_v26, %v2784_v57  ;;  %v5371_v17 = vld [vmem:[%s5720_s18 + $0x2b8] sm:$0xff]   ;;  %v2572_v6 = vadd.f32 %v2571_v45, %v6355_v30  ;;  %v2625_v62 = vadd.f32 %v6328_v34, %v6361_v7  ;;  %v2801_v9 = vmax.f32 %v2531_v25, 0.0  ;;  %v5376_v45 = vld [vmem:[%s5720_s18 + $0x268] sm:$0xff]   ;;  %v5382_v57 = vld [vmem:[%s5720_s18 + $0x220] sm:$0xff]  }
 0x971   : > { %5029 = vmatprep.subr.bf16.mxu0 %v5360_v38  ;;  %5057 = vmatprep.subr.bf16.mxu1 %v5361_v18  ;;  %v6339_v10 = vpop.f32.mrf.mxu0  ;;  %v6343_v32 = vpop.f32.mrf.mxu1  ;;  %v5372_v38 = vld [vmem:[%s5720_s18 + $0x270] sm:$0xff]   ;;  %v2834_v18 = vpack.c.bf16 %v2802_v59, %v2786_v28  ;;  %v2783_v33 = vmax.f32 %v2474_v4, 0.0  ;;  %v5379_v26 = vld [vmem:[%s5720_s18 + $0x2a8] sm:$0xff]   ;;  %v5381_v59 = vld [vmem:[%s5720_s18 + $0x2e0] sm:$0xff]  }
 0x972   : > { %v2756_v34 = vmax.f32 %v2572_v6, 0.0  ;;  %v2758_v48 = vmax.f32 %v2625_v62, 0.0  ;;  %v5385_v28 = vld [vmem:[%s5720_s18 + $0x2d8] sm:$0xff]   ;;  %v5390_v4 = vld [vmem:[%s5720_s18 + $0x210] sm:$0xff]  }
 0x973   : > { %v2575_v60 = vpop.f32.mrf.mxu0  ;;  %v2628_v0 = vpop.f32.mrf.mxu1  ;;  %v5387_v25 = vld [vmem:[%s5720_s18 + $0x298] sm:$0xff]  }
 0x974   : > { %5030 = vmatpush3.bf16.msra.mxu0 %v5362_v35  ;;  %5058 = vmatpush3.bf16.msra.mxu1 %v5363_v39  ;;  %v2576_v24 = vadd.f32 %v2575_v60, %v6355_v30  ;;  %v2629_v35 = vadd.f32 %v2628_v0, %v6361_v7  ;;  %v5383_v0 = vld [vmem:[%s5720_s18 + $0x2a0] sm:$0xff]  }
 0x975   : > { %5031 = vmatprep.subr.bf16.mxu0 %v5364_v40  ;;  %5059 = vmatprep.subr.bf16.mxu1 %v5365_v43  ;;  %v6373_v39 = vpop.f32.mrf.mxu0  ;;  %v2799_v40 = vmax.f32 %v2478_v3, 0.0  ;;  %v6377_v20 = vpop.f32.mrf.mxu1 }
 0x976   : > { %v2772_v43 = vmax.f32 %v2576_v24, 0.0  ;;  %v2774_v15 = vmax.f32 %v2629_v35, 0.0  ;;  %v5389_v24 = vld [vmem:[%s5720_s18 + $0x2d0] sm:$0xff]   ;;  %v5392_v35 = vld [vmem:[%s5720_s18 + $0x248] sm:$0xff]  }
 0x977   : > { %v6383_v50 = vpop.f32.mrf.mxu0  ;;  %v6385_v51 = vpop.f32.mrf.mxu1 }
 0x978   : > { %5032 = vmatpush3.bf16.msra.mxu0 %v5366_v37  ;;  %5060 = vmatpush3.bf16.msra.mxu1 %v5367_v46  ;;  %v2831_v37 = vpack.c.bf16 %v2799_v40, %v2783_v33  ;;  %v5378_v46 = vld [vmem:[%s5720_s18 + $0x228] sm:$0xff]   ;;  %v2820_v56 = vpack.c.bf16 %v2772_v43, %v2756_v34  ;;  %v2822_v44 = vpack.c.bf16 %v2774_v15, %v2758_v48  ;;  %v5397_v15 = vld [vmem:[%s5720_s18 + $0x2c0] sm:$0xff]  }
 0x979   : > { %5073 = vmatprep.subr.bf16.mxu0 %v5368_v55  ;;  %5101 = vmatprep.subr.bf16.mxu1 %v5369_v58  ;;  %v2833_v55 = vpack.c.bf16 %v2801_v9, %v2785_v29  ;;  %v5380_v58 = vld [vmem:[%s5720_s18 + $0x260] sm:$0xff]   ;;  %v6391_v60 = vpop.f32.mrf.mxu0  ;;  %v6393_v52 = vpop.f32.mrf.mxu1  ;;  %v2120_v40 = vrot.slane %v6351_v21, %v2087_v14  ;;  %v2574_v9 = vadd.f32 %v6339_v10, %v2112_v36  ;;  %v5395_v43 = vld [vmem:[%s5720_s18 + $0x288] sm:$0xff]  }
 0x97a   : > { %v2570_v14 = vadd.f32 %v6315_v27, %v2112_v36  ;;  %v2582_v34 = vadd.f32 %v6383_v50, %v6355_v30  ;;  %v5399_v27 = vld [vmem:[%s5720_s18 + $0x280] sm:$0xff]  }
 0x97b   : > { %4005 = vmatmul.mubr.bf16.vlgmr.msra.gmra.mxu0 %v2815_v2  ;;  %4054 = vmatmul.mubr.bf16.vlgmr.msra.gmra.mxu1 %v2817_v42  ;;  %v5384_v2 = vld [vmem:[%s5720_s18 + $0x258] sm:$0xff]   ;;  %v2585_v3 = vpop.f32.mrf.mxu0  ;;  %v2623_v10 = vadd.f32 %v6317_v31, %v2120_v40  ;;  %v2771_v48 = vmax.f32 %v2574_v9, 0.0 }
 0x97c   : > { %4012 = vmatprep.mubr.bf16.mxu0 %v2832_v22  ;;  %4061 = vmatprep.mubr.bf16.mxu1 %v2834_v18  ;;  %v5386_v42 = vld [vmem:[%s5720_s18 + $0x218] sm:$0xff]   ;;  %v5388_v22 = vld [vmem:[%s5720_s18 + $0x250] sm:$0xff]   ;;  %v2586_v33 = vadd.f32 %v2585_v3, %v6355_v30 }
 0x97d   : > { %5074 = vmatpush3.bf16.msra.mxu0 %v5370_v16  ;;  %5102 = vmatpush3.bf16.msra.mxu1 %v5371_v17  ;;  %v2638_v16 = vpop.f32.mrf.mxu1  ;;  %v6403_v17 = vpop.f32.mrf.mxu0  ;;  %v5391_v18 = vld [vmem:[%s5720_s18 + $0x290] sm:$0xff]   ;;  %v5401_v31 = vld [vmem:[%s5720_s18 + $0x3f8] sm:$0xff]   ;;  %v2757_v50 = vmax.f32 %v2623_v10, 0.0 }
 0x97e   : > { %5075 = vmatprep.subr.bf16.mxu0 %v5372_v38  ;;  %5103 = vmatprep.subr.bf16.mxu1 %v5373_v12  ;;  %v5393_v12 = vld [vmem:[%s5720_s18 + $0x2c8] sm:$0xff]   ;;  %v5402_v3 = vld [vmem:[%s5720_s18 + $0x338] sm:$0xff]  }
 0x97f   : > { %v6405_v38 = vpop.f32.mrf.mxu1  ;;  %v2677_v6 = vpop.f32.mrf.mxu0 }
 0x981   : > { %5076 = vmatpush3.bf16.msra.mxu0 %v5374_v41  ;;  %5104 = vmatpush3.bf16.msra.mxu1 %v5375_v54  ;;  %v2730_v62 = vpop.f32.mrf.mxu1  ;;  %v5394_v41 = vld [vmem:[%s5720_s18 + $0x208] sm:$0xff]   ;;  %v5396_v54 = vld [vmem:[%s5720_s18 + $0x240] sm:$0xff]   ;;  %v6425_v29 = vpop.f32.mrf.mxu0 }
 0x982   : > { %5077 = vmatprep.subr.bf16.mxu0 %v5376_v45  ;;  %5105 = vmatprep.subr.bf16.mxu1 %v5377_v47  ;;  %v2627_v45 = vadd.f32 %v6343_v32, %v2120_v40  ;;  %v2639_v47 = vadd.f32 %v2638_v16, %v6361_v7  ;;  %v5398_v32 = vld [vmem:[%s5720_s18 + $0x200] sm:$0xff]  }
 0x983   : > { %4013 = vmatmul.mubr.bf16.gmra.mxu0 %v2831_v37  ;;  %4062 = vmatmul.mubr.bf16.gmra.mxu1 %v2833_v55  ;;  %v6430_v37 = vpop.f32.mrf.mxu1  ;;  %v5400_v55 = vld [vmem:[%s5720_s18 + $0x378] sm:$0xff]   ;;  %v2681_v30 = vpop.f32.mrf.mxu0 }
 0x984   : > { %4102 = vmatprep.mubr.bf16.mxu0 %v2820_v56  ;;  %4151 = vmatprep.mubr.bf16.mxu1 %v2822_v44  ;;  %v2773_v56 = vmax.f32 %v2627_v45, 0.0  ;;  %v2806_v44 = vmax.f32 %v2639_v47, 0.0 }
 0x985   : > { %5078 = vmatpush3.bf16.msra.mxu0 %v5378_v46  ;;  %5106 = vmatpush3.bf16.msra.mxu1 %v5379_v26  ;;  %v2635_v46 = vadd.f32 %v6385_v51, %v6361_v7  ;;  %v2804_v26 = vmax.f32 %v2586_v33, 0.0  ;;  %v2734_v7 = vpop.f32.mrf.mxu1 }
 0x986   : > { %5079 = vmatprep.subr.bf16.mxu0 %v5380_v58  ;;  %5107 = vmatprep.subr.bf16.mxu1 %v5381_v59  ;;  %v2755_v58 = vmax.f32 %v2570_v14, 0.0  ;;  %v2788_v59 = vmax.f32 %v2582_v34, 0.0  ;;  %v2821_v16 = vpack.c.bf16 %v2773_v56, %v2757_v50  ;;  %v5410_v14 = vld [vmem:[%s5720_s18 + $0x328] sm:$0xff]   ;;  %v5414_v56 = vld [vmem:[%s5720_s18 + $0x320] sm:$0xff]   ;;  %v5418_v50 = vld [vmem:[%s5720_s18 + $0x318] sm:$0xff]  }
 0x987   : > { %v5411_v34 = vld [vmem:[%s5720_s18 + $0x3a8] sm:$0xff]  }
 0x988   : > { %v2819_v51 = vpack.c.bf16 %v2771_v48, %v2755_v58  ;;  %v5417_v58 = vld [vmem:[%s5720_s18 + $0x3d8] sm:$0xff]  }
 0x989   : > { %5080 = vmatpush3.bf16.msra.mxu0 %v5382_v57  ;;  %5108 = vmatpush3.bf16.msra.mxu1 %v5383_v0  ;;  %v6441_v57 = vrot.slane %v6351_v21, %v2099_v53  ;;  %v2790_v0 = vmax.f32 %v2635_v46, 0.0  ;;  %v2637_v53 = vadd.f32 %v6393_v52, %v2120_v40  ;;  %v5413_v46 = vld [vmem:[%s5720_s18 + $0x3e0] sm:$0xff]  }
 0x98a   : > { %5081 = vmatprep.subr.bf16.mxu0 %v5384_v2  ;;  %5109 = vmatprep.subr.bf16.mxu1 %v5385_v28  ;;  %v2584_v2 = vadd.f32 %v6391_v60, %v2112_v36  ;;  %v6447_v28 = vrot.slane %v6351_v21, %v2107_v63  ;;  %v2580_v60 = vadd.f32 %v6373_v39, %v2112_v36  ;;  %v5405_v63 = vld [vmem:[%s5720_s18 + $0x3f0] sm:$0xff]  }
 0x98b   : > { %v2678_v52 = vadd.f32 %v2677_v6, %v6441_v57  ;;  %v5406_v39 = vld [vmem:[%s5720_s18 + $0x330] sm:$0xff]   ;;  %v2805_v36 = vmax.f32 %v2637_v53, 0.0  ;;  %v5424_v53 = vld [vmem:[%s5720_s18 + $0x348] sm:$0xff]  }
 0x98d   : > { %5082 = vmatpush3.bf16.msra.mxu0 %v5386_v42  ;;  %5110 = vmatpush3.bf16.msra.mxu1 %v5387_v25  ;;  %v2836_v42 = vpack.c.bf16 %v2804_v26, %v2788_v59  ;;  %v2682_v25 = vadd.f32 %v2681_v30, %v6441_v57  ;;  %v2760_v33 = vmax.f32 %v2678_v52, 0.0  ;;  %v5415_v26 = vld [vmem:[%s5720_s18 + $0x3a0] sm:$0xff]   ;;  %v5419_v59 = vld [vmem:[%s5720_s18 + $0x398] sm:$0xff]  }
 0x98e   : > { %5083 = vmatprep.subr.bf16.mxu0 %v5388_v22  ;;  %5111 = vmatprep.subr.bf16.mxu1 %v5389_v24  ;;  %v5403_v22 = vld [vmem:[%s5720_s18 + $0x3b8] sm:$0xff]   ;;  %v5404_v24 = vld [vmem:[%s5720_s18 + $0x370] sm:$0xff]  }
 0x98f   : > { %v2776_v9 = vmax.f32 %v2682_v25, 0.0  ;;  %v2128_v25 = vrot.slane %v6351_v21, %v2095_v61 }
 0x991   : > { %5084 = vmatpush3.bf16.msra.mxu0 %v5390_v4  ;;  %5112 = vmatpush3.bf16.msra.mxu1 %v5391_v18  ;;  %v2838_v4 = vpack.c.bf16 %v2806_v44, %v2790_v0  ;;  %v2735_v18 = vadd.f32 %v2734_v7, %v6447_v28  ;;  %v2824_v10 = vpack.c.bf16 %v2776_v9, %v2760_v33  ;;  %v5420_v7 = vld [vmem:[%s5720_s18 + $0x350] sm:$0xff]  }
 0x992   : > { %5085 = vmatprep.subr.bf16.mxu0 %v5392_v35  ;;  %5113 = vmatprep.subr.bf16.mxu1 %v5393_v12  ;;  %v2633_v35 = vadd.f32 %v6377_v20, %v2120_v40  ;;  %v2803_v12 = vmax.f32 %v2584_v2, 0.0  ;;  %v2787_v20 = vmax.f32 %v2580_v60, 0.0  ;;  %v5409_v40 = vld [vmem:[%s5720_s18 + $0x3e8] sm:$0xff]   ;;  %v2676_v8 = vadd.f32 %v6403_v17, %v2128_v25 }
 0x993   : > { %v2778_v6 = vmax.f32 %v2735_v18, 0.0  ;;  %v2680_v18 = vadd.f32 %v6425_v29, %v2128_v25  ;;  %v5430_v29 = vld [vmem:[%s5720_s18 + $0x300] sm:$0xff]  }
 0x994   : > { %v2789_v45 = vmax.f32 %v2633_v35, 0.0  ;;  %v5428_v35 = vld [vmem:[%s5720_s18 + $0x340] sm:$0xff]  }
 0x995   : > { %5086 = vmatpush3.bf16.msra.mxu0 %v5394_v41  ;;  %5114 = vmatpush3.bf16.msra.mxu1 %v5395_v43  ;;  %v2731_v41 = vadd.f32 %v2730_v62, %v6447_v28  ;;  %v5407_v43 = vld [vmem:[%s5720_s18 + $0x3b0] sm:$0xff]   ;;  %v2835_v62 = vpack.c.bf16 %v2803_v12, %v2787_v20  ;;  %v5429_v12 = vld [vmem:[%s5720_s18 + $0x3c0] sm:$0xff]  }
 0x996   : > { %5087 = vmatprep.subr.bf16.mxu0 %v5396_v54  ;;  %5115 = vmatprep.subr.bf16.mxu1 %v5397_v15  ;;  %v5408_v54 = vld [vmem:[%s5720_s18 + $0x368] sm:$0xff]   ;;  %v2837_v47 = vpack.c.bf16 %v2805_v36, %v2789_v45 }
 0x997   : > { %v2762_v15 = vmax.f32 %v2731_v41, 0.0 }
 0x999   : > { %5088 = vmatpush3.bf16.msra.mxu0 %v5398_v32  ;;  %5116 = vmatpush3.bf16.msra.mxu1 %v5399_v27  ;;  %v5412_v32 = vld [vmem:[%s5720_s18 + $0x360] sm:$0xff]   ;;  %v2826_v48 = vpack.c.bf16 %v2778_v6, %v2762_v15  ;;  %v6468_v27 = vpop.f32.mrf.mxu0 }
 0x99a   : > { %5129 = vmatprep.subr.bf16.mxu0 %v5400_v55  ;;  %5157 = vmatprep.subr.bf16.mxu1 %v5401_v31  ;;  %v6470_v55 = vpop.f32.mrf.mxu1  ;;  %v5416_v31 = vld [vmem:[%s5720_s18 + $0x358] sm:$0xff]  }
 0x99b   : > { %v2687_v44 = vpop.f32.mrf.mxu0 }
 0x99c   : > { %4103 = vmatmul.mubr.bf16.vlgmr.msra.gmra.mxu0 %v2819_v51  ;;  %4152 = vmatmul.mubr.bf16.vlgmr.msra.gmra.mxu1 %v2821_v16  ;;  %v2740_v30 = vpop.f32.mrf.mxu1  ;;  %v5421_v51 = vld [vmem:[%s5720_s18 + $0x3d0] sm:$0xff]   ;;  %v2688_v41 = vadd.f32 %v2687_v44, %v6441_v57 }
 0x99d   : > { %4110 = vmatprep.mubr.bf16.mxu0 %v2836_v42  ;;  %4159 = vmatprep.mubr.bf16.mxu1 %v2838_v4  ;;  %v2689_v0 = vpop.f32.mrf.mxu0  ;;  %v5423_v16 = vld [vmem:[%s5720_s18 + $0x390] sm:$0xff]   ;;  %v5425_v42 = vld [vmem:[%s5720_s18 + $0x3c8] sm:$0xff]   ;;  %v2741_v36 = vadd.f32 %v2740_v30, %v6447_v28 }
 0x99e   : > { %5130 = vmatpush3.bf16.msra.mxu0 %v5402_v3  ;;  %5158 = vmatpush3.bf16.msra.mxu1 %v5403_v22  ;;  %v2742_v2 = vpop.f32.mrf.mxu1  ;;  %v5422_v3 = vld [vmem:[%s5720_s18 + $0x310] sm:$0xff]   ;;  %v5426_v4 = vld [vmem:[%s5720_s18 + $0x308] sm:$0xff]   ;;  %v2792_v6 = vmax.f32 %v2688_v41, 0.0  ;;  %v2690_v45 = vadd.f32 %v2689_v0, %v2128_v25 }
 0x99f   : > { %5131 = vmatprep.subr.bf16.mxu0 %v5404_v24  ;;  %5159 = vmatprep.subr.bf16.mxu1 %v5405_v63  ;;  %v2691_v22 = vpop.f32.mrf.mxu0  ;;  %v2136_v24 = vrot.slane %v6351_v21, %v2103_v19  ;;  %v5427_v63 = vld [vmem:[%s5720_s18 + $0x388] sm:$0xff]  }
 0x9a0   : > { %v2744_v60 = vpop.f32.mrf.mxu1  ;;  %v2692_v61 = vadd.f32 %v2691_v22, %v6441_v57 }
 0x9a1   : > { %v2733_v52 = vadd.f32 %v6430_v37, %v2136_v24  ;;  %v2745_v19 = vadd.f32 %v2744_v60, %v6447_v28  ;;  %v2729_v21 = vadd.f32 %v6405_v38, %v2136_v24  ;;  %v5431_v37 = vld [vmem:[%s5720_s18 + $0x380] sm:$0xff]   ;;  %v2794_v38 = vmax.f32 %v2741_v36, 0.0  ;;  %s6680_s18 = scalar_lea.vmem %s6613_s16, %s5654_s26  ;;  %s6683_s26 = sld [smem:[#allocation4_spill]] }
 0x9a2   : > { %5132 = vmatpush3.bf16.msra.mxu0 %v5406_v39  ;;  %5160 = vmatpush3.bf16.msra.mxu1 %v5407_v43  ;;  %v2775_v39 = vmax.f32 %v2680_v18, 0.0  ;;  %v2808_v43 = vmax.f32 %v2692_v61, 0.0  ;;  %v2743_v33 = vadd.f32 %v2742_v2, %v2136_v24  ;;  %v2686_v28 = vadd.f32 %v6468_v27, %v2128_v25 }
 0x9a3   : > { %5133 = vmatprep.subr.bf16.mxu0 %v5408_v54  ;;  %5161 = vmatprep.subr.bf16.mxu1 %v5409_v40  ;;  %v2777_v9 = vmax.f32 %v2733_v52, 0.0  ;;  %v2759_v54 = vmax.f32 %v2676_v8, 0.0  ;;  %v2810_v20 = vmax.f32 %v2745_v19, 0.0  ;;  %v2761_v17 = vmax.f32 %v2729_v21, 0.0 }
 0x9a4   : > { %4111 = vmatmul.mubr.bf16.gmra.mxu0 %v2835_v62  ;;  %4160 = vmatmul.mubr.bf16.gmra.mxu1 %v2837_v47  ;;  %v2840_v62 = vpack.c.bf16 %v2808_v43, %v2792_v6  ;;  %v2807_v47 = vmax.f32 %v2690_v45, 0.0 }
 0x9a5   : > { %4200 = vmatprep.mubr.bf16.mxu0 %v2824_v10  ;;  %4249 = vmatprep.mubr.bf16.mxu1 %v2826_v48  ;;  %v2823_v40 = vpack.c.bf16 %v2775_v39, %v2759_v54  ;;  %v2825_v57 = vpack.c.bf16 %v2777_v9, %v2761_v17  ;;  %v2842_v15 = vpack.c.bf16 %v2810_v20, %v2794_v38  ;;  %v2809_v10 = vmax.f32 %v2743_v33, 0.0  ;;  %v4767_v17 = vld [vmem:[%s6680_s18] ss:$0 sm:$0xff] }
 0x9a6   : > { %5134 = vmatpush3.bf16.msra.mxu0 %v5410_v14  ;;  %5162 = vmatpush3.bf16.msra.mxu1 %v5411_v34  ;;  %v2739_v14 = vadd.f32 %v6470_v55, %v2136_v24  ;;  %v2791_v34 = vmax.f32 %v2686_v28, 0.0 }
 0x9a7   : > { %5135 = vmatprep.subr.bf16.mxu0 %v5412_v32  ;;  %5163 = vmatprep.subr.bf16.mxu1 %v5413_v46  ;;  %p4898_p5 = scmp.ne.s32.totalorder %s6683_s26, 1 }
 0x9a8   : > { %v2793_v32 = vmax.f32 %v2739_v14, 0.0  ;;  %v2839_v48 = vpack.c.bf16 %v2807_v47, %v2791_v34  ;;  %s6684_s3 = sld [smem:[#allocation20_spill]] (!%p4898_p5) }
 0x9a9   : > { %s6685_s27 = sld [smem:[#allocation21_spill]] (!%p4898_p5) }
 0x9aa   : > { %5136 = vmatpush3.bf16.msra.mxu0 %v5414_v56  ;;  %5164 = vmatpush3.bf16.msra.mxu1 %v5415_v26  ;;  %v2841_v46 = vpack.c.bf16 %v2809_v10, %v2793_v32  ;;  %s6688_s18 = sld [smem:[#allocation22_spill]] (!%p4898_p5) }
 0x9ab   : > { %5137 = vmatprep.subr.bf16.mxu0 %v5416_v31  ;;  %5165 = vmatprep.subr.bf16.mxu1 %v5417_v58 }
 0x9ae   : > { %5138 = vmatpush3.bf16.msra.mxu0 %v5418_v50  ;;  %5166 = vmatpush3.bf16.msra.mxu1 %v5419_v59 }
 0x9af   : > { %5139 = vmatprep.subr.bf16.mxu0 %v5420_v7  ;;  %5167 = vmatprep.subr.bf16.mxu1 %v5421_v51 }
 0x9b2   : > { %5140 = vmatpush3.bf16.msra.mxu0 %v5422_v3  ;;  %5168 = vmatpush3.bf16.msra.mxu1 %v5423_v16 }
 0x9b3   : > { %5141 = vmatprep.subr.bf16.mxu0 %v5424_v53  ;;  %5169 = vmatprep.subr.bf16.mxu1 %v5425_v42 }
 0x9b6   : > { %5142 = vmatpush3.bf16.msra.mxu0 %v5426_v4  ;;  %5170 = vmatpush3.bf16.msra.mxu1 %v5427_v63 }
 0x9b7   : > { %5143 = vmatprep.subr.bf16.mxu0 %v5428_v35  ;;  %5171 = vmatprep.subr.bf16.mxu1 %v5429_v12 }
 0x9ba   : > { %5144 = vmatpush3.bf16.msra.mxu0 %v5430_v29  ;;  %5172 = vmatpush3.bf16.msra.mxu1 %v5431_v37 }
 0x9bd   : > { %4201 = vmatmul.mubr.bf16.vlgmr.msra.gmra.mxu0 %v2823_v40  ;;  %4250 = vmatmul.mubr.bf16.vlgmr.msra.gmra.mxu1 %v2825_v57 }
 0x9be   : > { %4208 = vmatprep.mubr.bf16.mxu0 %v2840_v62  ;;  %4257 = vmatprep.mubr.bf16.mxu1 %v2842_v15 }
 0x9c5   : > { %4209 = vmatmul.mubr.bf16.gmra.mxu0 %v2839_v48  ;;  %4258 = vmatmul.mubr.bf16.gmra.mxu1 %v2841_v46 }
 0xa1b   : > { %v4977_v56 = vpop.f32.mrf.mxu0  ;;  %v5005_v26 = vpop.f32.mrf.mxu1 }
 0xa1d   : > { %v4978_v31 = vpop.f32.mrf.mxu0  ;;  %v5006_v58 = vpop.f32.mrf.mxu1 }
 0xa1e   : > { %v4979_v54 = vadd.f32 %v4978_v31, %v4977_v56  ;;  %v5007_v57 = vadd.f32 %v5006_v58, %v5005_v26 }
 0xa1f   : > { %v4980_v27 = vpop.f32.mrf.mxu0  ;;  %v5008_v44 = vpop.f32.mrf.mxu1 }
 0xa20   : > { %v3909_v40 = vadd.f32 %v4979_v54, %v4767_v17 }
 0xa21   : > { %v4981_v30 = vpop.f32.mrf.mxu0  ;;  %v5009_v50 = vpop.f32.mrf.mxu1 }
 0xa22   : > { %v4982_v38 = vadd.f32 %v4981_v30, %v4980_v27  ;;  %v3958_v15 = vadd.f32 %v5007_v57, %v3909_v40  ;;  %v5010_v10 = vadd.f32 %v5009_v50, %v5008_v44 }
 0xa23   : > { %v4983_v55 = vpop.f32.mrf.mxu0  ;;  %v5011_v59 = vpop.f32.mrf.mxu1 }
 0xa24   : > { %v3912_v14 = vadd.f32 %v4982_v38, %v4767_v17 }
 0xa25   : > { %v4984_v7 = vpop.f32.mrf.mxu0  ;;  %v5012_v51 = vpop.f32.mrf.mxu1 }
 0xa26   : > { %v4985_v62 = vadd.f32 %v4984_v7, %v4983_v55  ;;  %v3961_v56 = vadd.f32 %v5010_v10, %v3912_v14  ;;  %v5013_v54 = vadd.f32 %v5012_v51, %v5011_v59 }
 0xa27   : > { %v4986_v0 = vpop.f32.mrf.mxu0  ;;  %v6506_v2 = vpop.f32.mrf.mxu1 }
 0xa28   : > { %v3917_v48 = vadd.f32 %v4985_v62, %v4767_v17 }
 0xa29   : > { %v4987_v3 = vpop.f32.mrf.mxu0  ;;  %v5015_v16 = vpop.f32.mrf.mxu1 }
 0xa2a   : > { %v4988_v31 = vadd.f32 %v4987_v3, %v4986_v0  ;;  %v3966_v58 = vadd.f32 %v5013_v54, %v3917_v48 }
 0xa2c   : > { %v3920_v7 = vadd.f32 %v4988_v31, %v4767_v17 }
 0xa3b   : > { %v5033_v53 = vpop.f32.mrf.mxu0  ;;  %v5061_v42 = vpop.f32.mrf.mxu1 }
 0xa3d   : > { %v5034_v25 = vpop.f32.mrf.mxu0  ;;  %v5062_v22 = vpop.f32.mrf.mxu1 }
 0xa3e   : > { %v5035_v33 = vadd.f32 %v5034_v25, %v5033_v53  ;;  %v5063_v11 = vadd.f32 %v5062_v22, %v5061_v42 }
 0xa3f   : > { %v5036_v24 = vpop.f32.mrf.mxu0  ;;  %v5064_v60 = vpop.f32.mrf.mxu1 }
 0xa40   : > { %v4007_v34 = vadd.f32 %v5035_v33, %v3958_v15 }
 0xa41   : > { %v5037_v4 = vpop.f32.mrf.mxu0  ;;  %v5065_v18 = vpop.f32.mrf.mxu1 }
 0xa42   : > { %v5038_v32 = vadd.f32 %v5037_v4, %v5036_v24  ;;  %v4056_v30 = vadd.f32 %v5063_v11, %v4007_v34  ;;  %v5066_v53 = vadd.f32 %v5065_v18, %v5064_v60  ;;  %v5016_v4 = vadd.f32 %v5015_v16, %v6506_v2 }
 0xa43   : > { %v5039_v63 = vpop.f32.mrf.mxu0  ;;  %v5067_v35 = vpop.f32.mrf.mxu1 }
 0xa44   : > { %v4010_v26 = vadd.f32 %v5038_v32, %v3961_v56  ;;  %v3969_v11 = vadd.f32 %v5016_v4, %v3920_v7 }
 0xa45   : > { %v5040_v52 = vpop.f32.mrf.mxu0  ;;  %v5068_v61 = vpop.f32.mrf.mxu1 }
 0xa46   : > { %v5041_v27 = vadd.f32 %v5040_v52, %v5039_v63  ;;  %v4059_v38 = vadd.f32 %v5066_v53, %v4010_v26  ;;  %v5069_v22 = vadd.f32 %v5068_v61, %v5067_v35 }
 0xa47   : > { %v5042_v12 = vpop.f32.mrf.mxu0  ;;  %v6508_v8 = vpop.f32.mrf.mxu1 }
 0xa48   : > { %v4015_v50 = vadd.f32 %v5041_v27, %v3966_v58 }
 0xa49   : > { %v5043_v19 = vpop.f32.mrf.mxu0  ;;  %v6510_v21 = vpop.f32.mrf.mxu1 }
 0xa4a   : > { %v5044_v0 = vadd.f32 %v5043_v19, %v5042_v12  ;;  %v4064_v60 = vadd.f32 %v5069_v22, %v4015_v50  ;;  %v5072_v2 = vadd.f32 %v6510_v21, %v6508_v8 }
 0xa4c   : > { %v4018_v18 = vadd.f32 %v5044_v0, %v3969_v11 }
 0xa4e   : > { %v4067_v62 = vadd.f32 %v5072_v2, %v4018_v18 }
 0xa5c   : > { %v5089_v41 = vpop.f32.mrf.mxu0  ;;  %v5117_v29 = vpop.f32.mrf.mxu1 }
 0xa5e   : > { %v5090_v39 = vpop.f32.mrf.mxu0  ;;  %v5118_v36 = vpop.f32.mrf.mxu1 }
 0xa5f   : > { %v5091_v13 = vadd.f32 %v5090_v39, %v5089_v41  ;;  %v5119_v3 = vadd.f32 %v5118_v36, %v5117_v29 }
 0xa60   : > { %v5092_v37 = vpop.f32.mrf.mxu0  ;;  %v5120_v9 = vpop.f32.mrf.mxu1 }
 0xa61   : > { %v4105_v25 = vadd.f32 %v5091_v13, %v4056_v30 }
 0xa62   : > { %v5093_v43 = vpop.f32.mrf.mxu0  ;;  %v5121_v20 = vpop.f32.mrf.mxu1 }
 0xa63   : > { %v5094_v40 = vadd.f32 %v5093_v43, %v5092_v37  ;;  %v4154_v63 = vadd.f32 %v5119_v3, %v4105_v25  ;;  %v5122_v37 = vadd.f32 %v5121_v20, %v5120_v9 }
 0xa64   : > { %v5095_v6 = vpop.f32.mrf.mxu0  ;;  %v5123_v45 = vpop.f32.mrf.mxu1 }
 0xa65   : > { %v4108_v52 = vadd.f32 %v5094_v40, %v4059_v38 }
 0xa66   : > { %v5096_v28 = vpop.f32.mrf.mxu0  ;;  %v5124_v47 = vpop.f32.mrf.mxu1 }
 0xa67   : > { %v5097_v59 = vadd.f32 %v5096_v28, %v5095_v6  ;;  %v4157_v35 = vadd.f32 %v5122_v37, %v4108_v52  ;;  %v5125_v6 = vadd.f32 %v5124_v47, %v5123_v45 }
 0xa68   : > { %v5098_v46 = vpop.f32.mrf.mxu0  ;;  %v5126_v1 = vpop.f32.mrf.mxu1 }
 0xa69   : > { %v4113_v16 = vadd.f32 %v5097_v59, %v4064_v60 }
 0xa6a   : > { %v5099_v55 = vpop.f32.mrf.mxu0  ;;  %v5127_v44 = vpop.f32.mrf.mxu1 }
 0xa6b   : > { %v5100_v61 = vadd.f32 %v5099_v55, %v5098_v46  ;;  %v4162_v20 = vadd.f32 %v5125_v6, %v4113_v16  ;;  %v5128_v56 = vadd.f32 %v5127_v44, %v5126_v1  ;;  %v6681_v44 = vld [vmem:[#allocation5_spill] sm:$0xff] }
 0xa6d   : > { %v4116_v34 = vadd.f32 %v5100_v61, %v4067_v62 }
 0xa6f   : > { %v4165_v30 = vadd.f32 %v5128_v56, %v4116_v34 }
 0xa7d   : > { %v5145_v24 = vpop.f32.mrf.mxu0  ;;  %v5173_v42 = vpop.f32.mrf.mxu1 }
 0xa7f   : > { %v5146_v51 = vpop.f32.mrf.mxu0  ;;  %v5174_v39 = vpop.f32.mrf.mxu1 }
 0xa80   : > { %v5147_v41 = vadd.f32 %v5146_v51, %v5145_v24  ;;  %v5175_v17 = vadd.f32 %v5174_v39, %v5173_v42 }
 0xa81   : > { %v5148_v13 = vpop.f32.mrf.mxu0  ;;  %v5176_v57 = vpop.f32.mrf.mxu1 }
 0xa82   : > { %v4203_v43 = vadd.f32 %v5147_v41, %v4154_v63 }
 0xa83   : > { %v5149_v12 = vpop.f32.mrf.mxu0  ;;  %v5177_v36 = vpop.f32.mrf.mxu1 }
 0xa84   : > { %v4252_v19 = vadd.f32 %v5175_v17, %v4203_v43  ;;  %v5150_v29 = vadd.f32 %v5149_v12, %v5148_v13  ;;  %v5178_v15 = vadd.f32 %v5177_v36, %v5176_v57 }
 0xa85   : > { %v5151_v33 = vpop.f32.mrf.mxu0  ;;  %v5179_v14 = vpop.f32.mrf.mxu1 }
 0xa86   : > { %v4206_v28 = vadd.f32 %v5150_v29, %v4157_v35  ;;  %v4266_v9 = vadd.f32 %v4252_v19, %v6119_v49 }
 0xa87   : > { %v5152_v10 = vpop.f32.mrf.mxu0  ;;  %v5180_v21 = vpop.f32.mrf.mxu1 }
 0xa88   : > { %v4255_v32 = vadd.f32 %v5178_v15, %v4206_v28  ;;  %v5153_v8 = vadd.f32 %v5152_v10, %v5151_v33  ;;  %v4272_v48 = vsel %vm936_vm1, %v4266_v9, 0.0  ;;  %v5181_v45 = vadd.f32 %v5180_v21, %v5179_v14  ;;  %v4896_v28 = vld [vmem:[%s881_s6] ss:$0 sm:$0xff] }
 0xa89   : > { %v5154_v46 = vpop.f32.mrf.mxu0  ;;  %4273 = vadd.xlane.f32.xlu1 %v4272_v48  ;;  %v5182_v47 = vpop.f32.mrf.mxu1  ;;  %v4897_v14 = vld [vmem:[%s884_s30] ss:$0 sm:$0xff] }
 0xa8a   : > { %v4211_v31 = vadd.f32 %v5153_v8, %v4162_v20  ;;  %v4267_v54 = vadd.f32 %v4255_v32, %v6121_v23 }
 0xa8b   : > { %v5155_v27 = vpop.f32.mrf.mxu0  ;;  %v5183_v58 = vpop.f32.mrf.mxu1 }
 0xa8c   : > { %v4260_v26 = vadd.f32 %v5181_v45, %v4211_v31  ;;  %v5156_v49 = vadd.f32 %v5155_v27, %v5154_v46  ;;  %v4275_v55 = vsel %vm936_vm1, %v4267_v54, 0.0  ;;  %v5184_v53 = vadd.f32 %v5183_v58, %v5182_v47 }
 0xa8d   : > { %4276 = vadd.xlane.f32.xlu0 %v4275_v55 }
 0xa8e   : > { %v4214_v7 = vadd.f32 %v5156_v49, %v4165_v30  ;;  %v4268_v25 = vadd.f32 %v4260_v26, %v6144_v5 }
 0xa90   : > { %v4263_v40 = vadd.f32 %v5184_v53, %v4214_v7  ;;  %v4278_v1 = vsel %vm936_vm1, %v4268_v25, 0.0 }
 0xa91   : > { %4279 = vadd.xlane.f32.xlu1 %v4278_v1 }
 0xa92   : > { %v4269_v50 = vadd.f32 %v4263_v40, %v6681_v44 }
 0xa94   : > { %v4281_v23 = vsel %vm936_vm1, %v4269_v50, 0.0 }
 0xa95   : > { %4282 = vadd.xlane.f32.xlu0 %v4281_v23 }
 0xb12   : > { %v4274_v24 = vpop.xlane.xlu1 %4273 }
 0xb13   : > { %v4284_v4 = vmul.f32 0.03125, %v4274_v24 }
 0xb15   : > { %v4288_v38 = vsub.f32 %v4266_v9, %v4284_v4 }
 0xb16   : > { %v4277_v0 = vpop.xlane.xlu0 %4276 }
 0xb17   : > { %v4285_v3 = vmul.f32 0.03125, %v4277_v0  ;;  %v4292_v42 = vmul.f32 %v4288_v38, %v4288_v38 }
 0xb19   : > { %v4289_v22 = vsub.f32 %v4267_v54, %v4285_v3  ;;  %v4296_v59 = vsel %vm936_vm1, %v4292_v42, 0.0 }
 0xb1a   : > { %4297 = vadd.xlane.f32.xlu1 %v4296_v59  ;;  %v4280_v5 = vpop.xlane.xlu1 %4279 }
 0xb1b   : > { %v4286_v51 = vmul.f32 0.03125, %v4280_v5  ;;  %v4293_v11 = vmul.f32 %v4289_v22, %v4289_v22 }
 0xb1d   : > { %v4290_v63 = vsub.f32 %v4268_v25, %v4286_v51  ;;  %v4299_v52 = vsel %vm936_vm1, %v4293_v11, 0.0 }
 0xb1e   : > { %4300 = vadd.xlane.f32.xlu0 %v4299_v52  ;;  %v4283_v41 = vpop.xlane.xlu0 %4282 }
 0xb1f   : > { %v4287_v39 = vmul.f32 0.03125, %v4283_v41  ;;  %v4294_v60 = vmul.f32 %v4290_v63, %v4290_v63 }
 0xb21   : > { %v4291_v13 = vsub.f32 %v4269_v50, %v4287_v39  ;;  %v4302_v18 = vsel %vm936_vm1, %v4294_v60, 0.0 }
 0xb22   : > { %4303 = vadd.xlane.f32.xlu1 %v4302_v18 }
 0xb23   : > { %v4295_v37 = vmul.f32 %v4291_v13, %v4291_v13 }
 0xb25   : > { %v4305_v43 = vsel %vm936_vm1, %v4295_v37, 0.0 }
 0xb26   : > { %4306 = vadd.xlane.f32.xlu0 %v4305_v43 }
 0xba3   : > { %v4298_v17 = vpop.xlane.xlu1 %4297 }
 0xba4   : > { %v4308_v57 = vmul.f32 0.03125, %v4298_v17 }
 0xba6   : > { %v4312_v2 = vadd.f32 1e-05, %v4308_v57 }
 0xba7   : > { %v4301_v16 = vpop.xlane.xlu0 %4300 }
 0xba8   : > { %5504 = vrsqrt.f32 %v4312_v2  ;;  %v4309_v12 = vmul.f32 0.03125, %v4301_v16 }
 0xbaa   : > { %v4313_v35 = vadd.f32 1e-05, %v4309_v12 }
 0xbab   : > { %v4304_v61 = vpop.xlane.xlu1 %4303 }
 0xbac   : > { %5506 = vrsqrt.f32 %v4313_v35  ;;  %v4310_v19 = vmul.f32 0.03125, %v4304_v61 }
 0xbae   : > { %v4314_v29 = vadd.f32 1e-05, %v4310_v19 }
 0xbaf   : > { %v4307_v36 = vpop.xlane.xlu0 %4306 }
 0xbb0   : > { %5508 = vrsqrt.f32 %v4314_v29  ;;  %v4311_v6 = vmul.f32 0.03125, %v4307_v36 }
 0xbb2   : > { %v4315_v33 = vadd.f32 1e-05, %v4311_v6 }
 0xbb4   : > { %5510 = vrsqrt.f32 %v4315_v33 }
 0xbb5   : > { %v5505_v62 = vpop.eup %5504 }
 0xbb6   : > { %v4320_v15 = vmul.f32 %v5505_v62, %v4288_v38 }
 0xbb8   : > { %v4330_v9 = vmul.f32 %v4896_v28, %v4320_v15 }
 0xbb9   : > { %v5507_v20 = vpop.eup %5506 }
 0xbba   : > { %v4340_v10 = vadd.f32 %v4897_v14, %v4330_v9  ;;  %v4321_v34 = vmul.f32 %v5507_v20, %v4289_v22 }
 0xbbc   : > { %4344 = vst.msk [vmem:[#allocation2] sm:$0xff] %vm936_vm1, %v4340_v10  ;;  %v4331_v32 = vmul.f32 %v4896_v28, %v4321_v34 }
 0xbbd   : > { %v5509_v8 = vpop.eup %5508 }
 0xbbe   : > { %v4341_v21 = vadd.f32 %v4897_v14, %v4331_v32  ;;  %v4322_v48 = vmul.f32 %v5509_v8, %v4290_v63 }
 0xbc0   : > { %4345 = vst.msk [vmem:[#allocation2 + $0x8] sm:$0xff] %vm936_vm1, %v4341_v21  ;;  %v4332_v46 = vmul.f32 %v4896_v28, %v4322_v48 }
 0xbc1   : > { %v5511_v56 = vpop.eup %5510 }
 0xbc2   : > { %v4342_v31 = vadd.f32 %v4897_v14, %v4332_v46  ;;  %v4323_v45 = vmul.f32 %v5511_v56, %v4291_v13 }
 0xbc4   : > { %4346 = vst.msk [vmem:[#allocation2 + $0x10] sm:$0xff] %vm936_vm1, %v4342_v31  ;;  %v4333_v47 = vmul.f32 %v4896_v28, %v4323_v45  ;;  %4351 = sbr.rel (%p4898_p5) target bundleno = 3229 (0xc9d), region = 112 }
 0xbc6   : > { %v4343_v54 = vadd.f32 %v4897_v14, %v4333_v47 }
 0xbc8   : > { %4347 = vst.msk [vmem:[#allocation2 + $0x18] sm:$0xff] %vm936_vm1, %v4343_v54 }
 0xbc9   : > { %v5516_v27 = vld [vmem:[%s6684_s3 + $0x14] ss:$8 sps:$4 sm:$0xff]   ;;  %v5518_v30 = vld [vmem:[%s6684_s3 + $0x10] ss:$8 sps:$4 sm:$0xff]   ;;  %v5531_v26 = vmov 0   ;;  %v4352_v55 = vpack.c.bf16 %v4341_v21, %v4340_v10  ;;  %v4353_v7 = vpack.c.bf16 %v4343_v54, %v4342_v31  ;;  %v6687_v1 = vld [vmem:[#allocation6_spill] sm:$0xff] }
 0xbca   : > { %4428 = vmatprep.mubr.bf16.mxu0 %v5531_v26  ;;  %4438 = vmatprep.mubr.bf16.mxu1 %v5531_v26  ;;  %v5519_v49 = vld [vmem:[%s6684_s3 + $0x4] ss:$8 sps:$4 sm:$0xff]   ;;  %v5521_v58 = vld [vmem:[%s6684_s3] ss:$8 sps:$4 sm:$0xff]   ;;  %v6686_v25 = vld [vmem:[#allocation7_spill] sm:$0xff]  ;;  %vm4450_vm0 = vcmask 424960  }
 0xbcb   : > { %4408 = vmatprep.subr.bf16.mxu0 %v5516_v27  ;;  %5281 = vmatprep.subr.bf16.mxu1 %v5516_v27  ;;  %v4358_v53 = vld [vmem:[%s6685_s27] sm:$0x3] }
 0xbcc   : > { %4409 = vmatpush1.bf16.msra.mxu0 %v5518_v30  ;;  %5283 = vmatpush1.bf16.msra.mxu1 %v5518_v30  ;;  %v4363_v40 = vrot.slane %v4358_v53, %v6686_v25  ;;  %v4367_v44 = vrot.slane %v4358_v53, %v6687_v1 }
 0xbcd   : > { %4410 = vmatprep.subr.bf16.mxu0 %v5519_v49  ;;  %5282 = vmatprep.subr.bf16.mxu1 %v5519_v49 }
 0xbd0   : > { %4411 = vmatpush1.bf16.msra.mxu0 %v5521_v58  ;;  %5284 = vmatpush1.bf16.msra.mxu1 %v5521_v58 }
 0xbd3   : > { %4903 = vmatmul.mubr.msk.bf16.vlgmr.msra.gmra.mxu0 %vm936_vm1, %v4352_v55  ;;  %4904 = vmatmul.mubr.msk.bf16.vlgmr.msra.gmra.mxu1 %vm936_vm1, %v4353_v7 }
 0xc93   : > { %v4430_v50 = vpop.f32.mrf.mxu0  ;;  %v4440_v23 = vpop.f32.mrf.mxu1 }
 0xc94   : > { %v4431_v24 = vadd.f32 %v4430_v50, %v4363_v40  ;;  %v4441_v4 = vadd.f32 %v4440_v23, %v4363_v40 }
 0xc95   : > { %v4432_v38 = vpop.f32.mrf.mxu0  ;;  %v4442_v0 = vpop.f32.mrf.mxu1 }
 0xc96   : > { %4449 = vst [vmem:[%s6688_s18] sm:$0xff] %v4431_v24  ;;  %4454 = vst [vmem:[%s6688_s18 + $0x20] sm:$0xff] %v4441_v4  ;;  %v4433_v3 = vadd.f32 %v4432_v38, %v4367_v44  ;;  %v4443_v42 = vadd.f32 %v4442_v0, %v4367_v44 }
 0xc97   : > { %v4434_v22 = vpop.f32.mrf.mxu0  ;;  %v4444_v59 = vpop.f32.mrf.mxu1 }
 0xc98   : > { %4451 = vst.msk [vmem:[%s6688_s18 + $0x8] sm:$0xff] %vm4450_vm0, %v4433_v3  ;;  %4455 = vst.msk [vmem:[%s6688_s18 + $0x28] sm:$0xff] %vm4450_vm0, %v4443_v42  ;;  %v4435_v5 = vadd.f32 %v4434_v22, %v4363_v40  ;;  %v4445_v51 = vadd.f32 %v4444_v59, %v4363_v40 }
 0xc99   : > { %v4436_v11 = vpop.f32.mrf.mxu0  ;;  %v4446_v63 = vpop.f32.mrf.mxu1 }
 0xc9a   : > { %4452 = vst [vmem:[%s6688_s18 + $0x10] sm:$0xff] %v4435_v5  ;;  %4456 = vst [vmem:[%s6688_s18 + $0x30] sm:$0xff] %v4445_v51  ;;  %v4437_v52 = vadd.f32 %v4436_v11, %v4367_v44  ;;  %v4447_v41 = vadd.f32 %v4446_v63, %v4367_v44 }
 0xc9c   : > { %4453 = vst.msk [vmem:[%s6688_s18 + $0x18] sm:$0xff] %vm4450_vm0, %v4437_v52  ;;  %4457 = vst.msk [vmem:[%s6688_s18 + $0x38] sm:$0xff] %vm4450_vm0, %v4447_v41 }
 0xc9d PF: > { %s6689_s29 = sld [smem:[#allocation3_spill]] }
 0xca3   : > { %s31_s2 = sadd.s32 1, %s6689_s29  }
 0xca4   : > { %p28_p6 = scmp.ge.s32.totalorder %s31_s2, 4  }
 0xca6   :  { %30 = sbr.rel (!%p28_p6) target bundleno = 16 (0x10), region = 183 }

</bundles_post_ra>
